<compile_context>
chip_gen: v7x
topology: tpu7x:2x2x1
jax: 0.10.0
libtpu: 0.0.40
codegen_flags: <defaults>
</compile_context>

<pallas_src>
import jax
import jax.numpy as jnp
from jax.experimental import pallas as pl
from jax.experimental.pallas import tpu as pltpu

_LANE = 128


def _round_up(c, m=_LANE):
    return ((c + m - 1) // m) * m


def _pad_last(a, n):
    pad = n - a.shape[-1]
    if pad == 0:
        return a
    widths = [(0, 0)] * (a.ndim - 1) + [(0, pad)]
    return jnp.pad(a, widths)


def _pad_mat(w, rows, cols):
    return jnp.pad(w, ((0, rows - w.shape[0]), (0, cols - w.shape[1])))


# --------------------------------- kernel -------------------------------------

def _make_kernel(H, W, need_skip):
    P = H * W

    def kernel(*refs):
        if need_skip:
            (x_ref, s1, t1, w1, s2, t2, w2, s3, t3, w3, bout, wd,
             o_ref, hpad, acc) = refs
        else:
            (x_ref, s1, t1, w1, s2, t2, w2, s3, t3, w3, bout,
             o_ref, hpad, acc) = refs
            wd = None

        cmid = w1.shape[-1]

        x = x_ref[0]                                             # (P, Cin_p) fp32

        # stage 1: relu(bn1(x)) -> conv1 (1x1) -> relu(bn2(.))   (biases folded into t2)
        xa = jnp.maximum(x * s1[...] + t1[...], 0.0)
        h1 = jnp.dot(xa, w1[...], preferred_element_type=jnp.float32)
        h1 = jnp.maximum(h1 * s2[...] + t2[...], 0.0)

        # stage 2: 3x3 conv (stride 1, pad 1) as 9 shifted matmuls accumulated
        # into an fp32 VMEM scratch (no im2col materialization in HBM).
        hpad[...] = jnp.zeros_like(hpad)          # zero halo every step (megacore-safe)
        hpad[1:H + 1, 1:W + 1, :] = h1.reshape(H, W, cmid)
        for k in range(9):
            dy, dx = k // 3, k % 3
            win = hpad[dy:dy + H, dx:dx + W, :].reshape(P, cmid)
            contrib = jnp.dot(win, w2[k], preferred_element_type=jnp.float32)
            if k == 0:
                acc[...] = contrib
            else:
                acc[...] += contrib

        # relu(bn3(conv2(.)))  (conv2 bias folded into t3)
        h2 = jnp.maximum(acc[...] * s3[...] + t3[...], 0.0)

        # stage 3: conv3 (1x1) + residual (1x1 skip conv or identity); no final ReLU.
        y = jnp.dot(h2, w3[...], preferred_element_type=jnp.float32) + bout[...]
        if need_skip:
            r = jnp.dot(x, wd[...], preferred_element_type=jnp.float32)
        else:
            r = x
        o_ref[0] = y + r

    return kernel


# --------------------------------- wrapper ------------------------------------

@jax.jit
def residual_forward(x_nchw, params):
    need_skip = 'wd' in params
    x = jnp.transpose(x_nchw, (0, 2, 3, 1)).astype(jnp.float32)    # NCHW -> NHWC
    N, H, W, cin = x.shape
    cmid = params['w1'].shape[1]
    cout = params['w3'].shape[1]
    P = H * W
    cin_p, cmid_p, cout_p = _round_up(cin), _round_up(cmid), _round_up(cout)
    if not need_skip:
        assert cin == cout, "identity skip requires inp_dim == out_dim"

    eps = 1e-5  # nn.BatchNorm2d default

    def fold(name):
        g, b, m, v = (params[name + '_g'], params[name + '_b'],
                      params[name + '_m'], params[name + '_v'])
        s = g * jax.lax.rsqrt(v + eps)
        return s, b - m * s

    s1, t1 = fold('bn1')
    s2, t2 = fold('bn2')
    s3, t3 = fold('bn3')
    t2 = params['b1'] * s2 + t2                 # fold conv1 bias into bn2 shift
    t3 = params['b2'] * s3 + t3                 # fold conv2 bias into bn3 shift
    bout = params['b3'] + (params['bd'] if need_skip else 0.0)   # conv3 (+ skip) bias

    def vec(v, n):
        return _pad_last(v, n).reshape(1, n)

    args = [
        _pad_last(x.reshape(N, P, cin), cin_p),                      # activations
        vec(s1, cin_p), vec(t1, cin_p),
        _pad_mat(params['w1'], cin_p, cmid_p),
        vec(s2, cmid_p), vec(t2, cmid_p),
        jnp.pad(params['w2'],
                ((0, 0), (0, 0), (0, cmid_p - cmid), (0, cmid_p - cmid))
                ).reshape(9, cmid_p, cmid_p),
        vec(s3, cmid_p), vec(t3, cmid_p),
        _pad_mat(params['w3'], cmid_p, cout_p),
        vec(bout, cout_p),
    ]
    if need_skip:
        args.append(_pad_mat(params['wd'], cin_p, cout_p))

    def const_spec(a):
        zeros = (0,) * a.ndim
        return pl.BlockSpec(a.shape, lambda n, _z=zeros: _z)

    in_specs = [pl.BlockSpec((1, P, cin_p), lambda n: (n, 0, 0))]
    in_specs += [const_spec(a) for a in args[1:]]

    out = pl.pallas_call(
        _make_kernel(H, W, need_skip),
        out_shape=jax.ShapeDtypeStruct((N, P, cout_p), jnp.float32),
        grid_spec=pltpu.PrefetchScalarGridSpec(
            num_scalar_prefetch=0,
            grid=(N,),
            in_specs=in_specs,
            out_specs=pl.BlockSpec((1, P, cout_p), lambda n: (n, 0, 0)),
            scratch_shapes=[pltpu.VMEM((H + 2, W + 2, cmid_p), jnp.float32),
                            pltpu.VMEM((P, cmid_p), jnp.float32)]),
        compiler_params=pltpu.CompilerParams(
            dimension_semantics=("parallel",),
            vmem_limit_bytes=32 * 1024 * 1024),
    )(*args)

    out = out[:, :, :cout].reshape(N, H, W, cout)
    return jnp.transpose(out, (0, 3, 1, 2))                         # NHWC -> NCHW


# --------------------------- pure-JAX reference --------------------------------

def reference(x_nchw, params):
    need_skip = 'wd' in params
    eps = 1e-5
    x = x_nchw.astype(jnp.float32)

    def bn(h, name):
        g, b, m, v = (params[name + '_g'], params[name + '_b'],
                      params[name + '_m'], params[name + '_v'])
        s = (g * jax.lax.rsqrt(v + eps))[None, :, None, None]
        return (h - m[None, :, None, None]) * s + b[None, :, None, None]

    def conv1x1(h, w, b):
        return jnp.einsum('nchw,cd->ndhw', h, w) + b[None, :, None, None]

    def conv3x3(h, w, b):
        y = jax.lax.conv_general_dilated(
            h, w, window_strides=(1, 1), padding=((1, 1), (1, 1)),
            dimension_numbers=('NCHW', 'HWIO', 'NCHW'),
            precision=jax.lax.Precision.HIGHEST)
        return y + b[None, :, None, None]

    residual = conv1x1(x, params['wd'], params['bd']) if need_skip else x
    out = jax.nn.relu(bn(x, 'bn1'))
    out = conv1x1(out, params['w1'], params['b1'])
    out = jax.nn.relu(bn(out, 'bn2'))
    out = conv3x3(out, params['w2'], params['b2'])
    out = jax.nn.relu(bn(out, 'bn3'))
    out = conv1x1(out, params['w3'], params['b3'])
    return out + residual


# ---------------------------------- setup --------------------------------------

def init_params(key, inp_dim, out_dim, need_skip):
    cmid = out_dim // 2
    ks = jax.random.split(key, 20)

    def rn(k, shape, scale=0.1):
        return scale * jax.random.normal(k, shape, jnp.float32)

    p = {
        'w1': rn(ks[0], (inp_dim, cmid)), 'b1': rn(ks[1], (cmid,)),
        'w2': rn(ks[2], (3, 3, cmid, cmid)), 'b2': rn(ks[3], (cmid,)),
        'w3': rn(ks[4], (cmid, out_dim)), 'b3': rn(ks[5], (out_dim,)),
        'bn1_g': 1.0 + rn(ks[6], (inp_dim,)), 'bn1_b': rn(ks[7], (inp_dim,)),
        'bn1_m': rn(ks[8], (inp_dim,)), 'bn1_v': jnp.abs(1.0 + rn(ks[9], (inp_dim,))),
        'bn2_g': 1.0 + rn(ks[10], (cmid,)), 'bn2_b': rn(ks[11], (cmid,)),
        'bn2_m': rn(ks[12], (cmid,)), 'bn2_v': jnp.abs(1.0 + rn(ks[13], (cmid,))),
        'bn3_g': 1.0 + rn(ks[14], (cmid,)), 'bn3_b': rn(ks[15], (cmid,)),
        'bn3_m': rn(ks[16], (cmid,)), 'bn3_v': jnp.abs(1.0 + rn(ks[17], (cmid,))),
    }
    if need_skip:
        p['wd'] = rn(ks[18], (inp_dim, out_dim))
        p['bd'] = rn(ks[19], (out_dim,))
    return p


if __name__ == "__main__":
    key = jax.random.PRNGKey(0)
    kx, kp, kp2 = jax.random.split(key, 3)

    N, H, W = 2, 16, 16
    inp_dim, out_dim = 4, 8          # inp_dim != out_dim -> skip_layer path active

    x = jax.random.normal(kx, (N, inp_dim, H, W), jnp.float32)
    params = init_params(kp, inp_dim, out_dim, need_skip=True)

    out = jax.block_until_ready(residual_forward(x, params))
    ref = jax.block_until_ready(reference(x, params))
    assert out.shape == (N, out_dim, H, W), out.shape
    assert jnp.allclose(out, ref, atol=1e-3, rtol=1e-3), \
        float(jnp.max(jnp.abs(out - ref)))

    # identity-skip configuration (inp_dim == out_dim)
    params_id = init_params(kp2, inp_dim, inp_dim, need_skip=False)
    out2 = jax.block_until_ready(residual_forward(x, params_id))
    ref2 = jax.block_until_ready(reference(x, params_id))
    assert out2.shape == (N, inp_dim, H, W), out2.shape
    assert jnp.allclose(out2, ref2, atol=1e-3, rtol=1e-3), \
        float(jnp.max(jnp.abs(out2 - ref2)))

    print("KERNEL_OK")
</pallas_src>

<mosaic_0001>
module attributes {stable_mosaic.version = 11 : i64} {
  func.func @kernel(%arg0: i32, %arg1: memref<1x256x128xf32, #tpu.memory_space<vmem>>, %arg2: memref<1x128xf32, #tpu.memory_space<vmem>>, %arg3: memref<1x128xf32, #tpu.memory_space<vmem>>, %arg4: memref<128x128xf32, #tpu.memory_space<vmem>>, %arg5: memref<1x128xf32, #tpu.memory_space<vmem>>, %arg6: memref<1x128xf32, #tpu.memory_space<vmem>>, %arg7: memref<9x128x128xf32, #tpu.memory_space<vmem>>, %arg8: memref<1x128xf32, #tpu.memory_space<vmem>>, %arg9: memref<1x128xf32, #tpu.memory_space<vmem>>, %arg10: memref<128x128xf32, #tpu.memory_space<vmem>>, %arg11: memref<1x128xf32, #tpu.memory_space<vmem>>, %arg12: memref<128x128xf32, #tpu.memory_space<vmem>>, %arg13: memref<1x256x128xf32, #tpu.memory_space<vmem>>, %arg14: memref<18x18x128xf32, #tpu.memory_space<vmem>>, %arg15: memref<256x128xf32, #tpu.memory_space<vmem>>) attributes {dimension_semantics = [#tpu.dimension_semantics<parallel>], iteration_bounds = array<i64: 2>, scalar_prefetch = 0 : i64, scratch_operands = 2 : i64, tpu.core_type = #tpu.core_type<tc>, window_params = [{transform_indices = @transform_0, window_bounds = array<i64: 1, 256, 128>}, {pipeline_mode = #tpu.pipeline_mode<synchronous>, transform_indices = @transform_1, window_bounds = array<i64: 1, 128>}, {pipeline_mode = #tpu.pipeline_mode<synchronous>, transform_indices = @transform_2, window_bounds = array<i64: 1, 128>}, {pipeline_mode = #tpu.pipeline_mode<synchronous>, transform_indices = @transform_3, window_bounds = array<i64: 128, 128>}, {pipeline_mode = #tpu.pipeline_mode<synchronous>, transform_indices = @transform_4, window_bounds = array<i64: 1, 128>}, {pipeline_mode = #tpu.pipeline_mode<synchronous>, transform_indices = @transform_5, window_bounds = array<i64: 1, 128>}, {pipeline_mode = #tpu.pipeline_mode<synchronous>, transform_indices = @transform_6, window_bounds = array<i64: 9, 128, 128>}, {pipeline_mode = #tpu.pipeline_mode<synchronous>, transform_indices = @transform_7, window_bounds = array<i64: 1, 128>}, {pipeline_mode = #tpu.pipeline_mode<synchronous>, transform_indices = @transform_8, window_bounds = array<i64: 1, 128>}, {pipeline_mode = #tpu.pipeline_mode<synchronous>, transform_indices = @transform_9, window_bounds = array<i64: 128, 128>}, {pipeline_mode = #tpu.pipeline_mode<synchronous>, transform_indices = @transform_10, window_bounds = array<i64: 1, 128>}, {pipeline_mode = #tpu.pipeline_mode<synchronous>, transform_indices = @transform_11, window_bounds = array<i64: 128, 128>}, {transform_indices = @transform_12, window_bounds = array<i64: 1, 256, 128>}]} {
    %c0 = arith.constant 0 : index
    %c0_0 = arith.constant 0 : index
    %c0_1 = arith.constant 0 : index
    %0 = vector.load %arg1[%c0, %c0_0, %c0_1] : memref<1x256x128xf32, #tpu.memory_space<vmem>>, vector<1x256x128xf32>
    %1 = vector.shape_cast %0 : vector<1x256x128xf32> to vector<256x128xf32>
    %c0_2 = arith.constant 0 : index
    %c0_3 = arith.constant 0 : index
    %2 = vector.load %arg2[%c0_2, %c0_3] : memref<1x128xf32, #tpu.memory_space<vmem>>, vector<1x128xf32>
    %3 = vector.broadcast %2 : vector<1x128xf32> to vector<256x128xf32>
    %4 = arith.mulf %1, %3 : vector<256x128xf32>
    %c0_4 = arith.constant 0 : index
    %c0_5 = arith.constant 0 : index
    %5 = vector.load %arg3[%c0_4, %c0_5] : memref<1x128xf32, #tpu.memory_space<vmem>>, vector<1x128xf32>
    %6 = vector.broadcast %5 : vector<1x128xf32> to vector<256x128xf32>
    %7 = arith.addf %4, %6 : vector<256x128xf32>
    %cst = arith.constant 0.000000e+00 : f32
    %8 = vector.broadcast %cst : f32 to vector<256x128xf32>
    %9 = arith.maximumf %7, %8 : vector<256x128xf32>
    %c0_6 = arith.constant 0 : index
    %c0_7 = arith.constant 0 : index
    %10 = vector.load %arg4[%c0_6, %c0_7] : memref<128x128xf32, #tpu.memory_space<vmem>>, vector<128x128xf32>
    %cst_8 = arith.constant dense<0.000000e+00> : vector<256x128xf32>
    %11 = tpu.matmul %9, %10, %cst_8 {dimension_numbers = #tpu.dot_dimension_numbers<[1], [0], [0], [1], [0, 0, 1, 1], [], []>} : vector<256x128xf32>, vector<128x128xf32>, vector<256x128xf32> -> vector<256x128xf32>
    %c0_9 = arith.constant 0 : index
    %c0_10 = arith.constant 0 : index
    %12 = vector.load %arg5[%c0_9, %c0_10] : memref<1x128xf32, #tpu.memory_space<vmem>>, vector<1x128xf32>
    %13 = vector.broadcast %12 : vector<1x128xf32> to vector<256x128xf32>
    %14 = arith.mulf %11, %13 : vector<256x128xf32>
    %c0_11 = arith.constant 0 : index
    %c0_12 = arith.constant 0 : index
    %15 = vector.load %arg6[%c0_11, %c0_12] : memref<1x128xf32, #tpu.memory_space<vmem>>, vector<1x128xf32>
    %16 = vector.broadcast %15 : vector<1x128xf32> to vector<256x128xf32>
    %17 = arith.addf %14, %16 : vector<256x128xf32>
    %cst_13 = arith.constant 0.000000e+00 : f32
    %18 = vector.broadcast %cst_13 : f32 to vector<256x128xf32>
    %19 = arith.maximumf %17, %18 : vector<256x128xf32>
    %cst_14 = arith.constant 0.000000e+00 : f32
    %20 = vector.broadcast %cst_14 : f32 to vector<18x18x128xf32>
    %c0_15 = arith.constant 0 : index
    %c0_16 = arith.constant 0 : index
    %c0_17 = arith.constant 0 : index
    %21 = vector.load %arg14[%c0_15, %c0_16, %c0_17] : memref<18x18x128xf32, #tpu.memory_space<vmem>>, vector<18x18x128xf32>
    tpu.vector_store %arg14[%c0_15, %c0_16, %c0_17], %20 {strides = array<i32>} : memref<18x18x128xf32, #tpu.memory_space<vmem>>, vector<18x18x128xf32>,
    %22 = vector.shape_cast %19 : vector<256x128xf32> to vector<16x16x128xf32>
    %c1 = arith.constant 1 : index
    %c1_18 = arith.constant 1 : index
    %c0_19 = arith.constant 0 : index
    %23 = vector.load %arg14[%c1, %c1_18, %c0_19] : memref<18x18x128xf32, #tpu.memory_space<vmem>>, vector<16x16x128xf32>
    tpu.vector_store %arg14[%c1, %c1_18, %c0_19], %22 {strides = array<i32>} : memref<18x18x128xf32, #tpu.memory_space<vmem>>, vector<16x16x128xf32>,
    %c0_20 = arith.constant 0 : index
    %c0_21 = arith.constant 0 : index
    %c0_22 = arith.constant 0 : index
    %24 = vector.load %arg14[%c0_20, %c0_21, %c0_22] : memref<18x18x128xf32, #tpu.memory_space<vmem>>, vector<16x16x128xf32>
    %25 = vector.shape_cast %24 : vector<16x16x128xf32> to vector<256x128xf32>
    %c0_23 = arith.constant 0 : index
    %c0_24 = arith.constant 0 : index
    %c0_25 = arith.constant 0 : index
    %26 = vector.load %arg7[%c0_23, %c0_24, %c0_25] : memref<9x128x128xf32, #tpu.memory_space<vmem>>, vector<1x128x128xf32>
    %27 = vector.shape_cast %26 : vector<1x128x128xf32> to vector<128x128xf32>
    %cst_26 = arith.constant dense<0.000000e+00> : vector<256x128xf32>
    %28 = tpu.matmul %25, %27, %cst_26 {dimension_numbers = #tpu.dot_dimension_numbers<[1], [0], [0], [1], [0, 0, 1, 1], [], []>} : vector<256x128xf32>, vector<128x128xf32>, vector<256x128xf32> -> vector<256x128xf32>
    %c0_27 = arith.constant 0 : index
    %c0_28 = arith.constant 0 : index
    %29 = vector.load %arg15[%c0_27, %c0_28] : memref<256x128xf32, #tpu.memory_space<vmem>>, vector<256x128xf32>
    tpu.vector_store %arg15[%c0_27, %c0_28], %28 {strides = array<i32>} : memref<256x128xf32, #tpu.memory_space<vmem>>, vector<256x128xf32>,
    %c0_29 = arith.constant 0 : index
    %c1_30 = arith.constant 1 : index
    %c0_31 = arith.constant 0 : index
    %30 = vector.load %arg14[%c0_29, %c1_30, %c0_31] : memref<18x18x128xf32, #tpu.memory_space<vmem>>, vector<16x16x128xf32>
    %31 = vector.shape_cast %30 : vector<16x16x128xf32> to vector<256x128xf32>
    %c1_32 = arith.constant 1 : index
    %c0_33 = arith.constant 0 : index
    %c0_34 = arith.constant 0 : index
    %32 = vector.load %arg7[%c1_32, %c0_33, %c0_34] : memref<9x128x128xf32, #tpu.memory_space<vmem>>, vector<1x128x128xf32>
    %33 = vector.shape_cast %32 : vector<1x128x128xf32> to vector<128x128xf32>
    %cst_35 = arith.constant dense<0.000000e+00> : vector<256x128xf32>
    %34 = tpu.matmul %31, %33, %cst_35 {dimension_numbers = #tpu.dot_dimension_numbers<[1], [0], [0], [1], [0, 0, 1, 1], [], []>} : vector<256x128xf32>, vector<128x128xf32>, vector<256x128xf32> -> vector<256x128xf32>
    %c0_36 = arith.constant 0 : index
    %c0_37 = arith.constant 0 : index
    %35 = vector.load %arg15[%c0_36, %c0_37] : memref<256x128xf32, #tpu.memory_space<vmem>>, vector<256x128xf32>
    %36 = arith.addf %35, %34 : vector<256x128xf32>
    %c0_38 = arith.constant 0 : index
    %c0_39 = arith.constant 0 : index
    %37 = vector.load %arg15[%c0_38, %c0_39] : memref<256x128xf32, #tpu.memory_space<vmem>>, vector<256x128xf32>
    tpu.vector_store %arg15[%c0_38, %c0_39], %36 {strides = array<i32>} : memref<256x128xf32, #tpu.memory_space<vmem>>, vector<256x128xf32>,
    %c0_40 = arith.constant 0 : index
    %c2 = arith.constant 2 : index
    %c0_41 = arith.constant 0 : index
    %38 = vector.load %arg14[%c0_40, %c2, %c0_41] : memref<18x18x128xf32, #tpu.memory_space<vmem>>, vector<16x16x128xf32>
    %39 = vector.shape_cast %38 : vector<16x16x128xf32> to vector<256x128xf32>
    %c2_42 = arith.constant 2 : index
    %c0_43 = arith.constant 0 : index
    %c0_44 = arith.constant 0 : index
    %40 = vector.load %arg7[%c2_42, %c0_43, %c0_44] : memref<9x128x128xf32, #tpu.memory_space<vmem>>, vector<1x128x128xf32>
    %41 = vector.shape_cast %40 : vector<1x128x128xf32> to vector<128x128xf32>
    %cst_45 = arith.constant dense<0.000000e+00> : vector<256x128xf32>
    %42 = tpu.matmul %39, %41, %cst_45 {dimension_numbers = #tpu.dot_dimension_numbers<[1], [0], [0], [1], [0, 0, 1, 1], [], []>} : vector<256x128xf32>, vector<128x128xf32>, vector<256x128xf32> -> vector<256x128xf32>
    %c0_46 = arith.constant 0 : index
    %c0_47 = arith.constant 0 : index
    %43 = vector.load %arg15[%c0_46, %c0_47] : memref<256x128xf32, #tpu.memory_space<vmem>>, vector<256x128xf32>
    %44 = arith.addf %43, %42 : vector<256x128xf32>
    %c0_48 = arith.constant 0 : index
    %c0_49 = arith.constant 0 : index
    %45 = vector.load %arg15[%c0_48, %c0_49] : memref<256x128xf32, #tpu.memory_space<vmem>>, vector<256x128xf32>
    tpu.vector_store %arg15[%c0_48, %c0_49], %44 {strides = array<i32>} : memref<256x128xf32, #tpu.memory_space<vmem>>, vector<256x128xf32>,
    %c1_50 = arith.constant 1 : index
    %c0_51 = arith.constant 0 : index
    %c0_52 = arith.constant 0 : index
    %46 = vector.load %arg14[%c1_50, %c0_51, %c0_52] : memref<18x18x128xf32, #tpu.memory_space<vmem>>, vector<16x16x128xf32>
    %47 = vector.shape_cast %46 : vector<16x16x128xf32> to vector<256x128xf32>
    %c3 = arith.constant 3 : index
    %c0_53 = arith.constant 0 : index
    %c0_54 = arith.constant 0 : index
    %48 = vector.load %arg7[%c3, %c0_53, %c0_54] : memref<9x128x128xf32, #tpu.memory_space<vmem>>, vector<1x128x128xf32>
    %49 = vector.shape_cast %48 : vector<1x128x128xf32> to vector<128x128xf32>
    %cst_55 = arith.constant dense<0.000000e+00> : vector<256x128xf32>
    %50 = tpu.matmul %47, %49, %cst_55 {dimension_numbers = #tpu.dot_dimension_numbers<[1], [0], [0], [1], [0, 0, 1, 1], [], []>} : vector<256x128xf32>, vector<128x128xf32>, vector<256x128xf32> -> vector<256x128xf32>
    %c0_56 = arith.constant 0 : index
    %c0_57 = arith.constant 0 : index
    %51 = vector.load %arg15[%c0_56, %c0_57] : memref<256x128xf32, #tpu.memory_space<vmem>>, vector<256x128xf32>
    %52 = arith.addf %51, %50 : vector<256x128xf32>
    %c0_58 = arith.constant 0 : index
    %c0_59 = arith.constant 0 : index
    %53 = vector.load %arg15[%c0_58, %c0_59] : memref<256x128xf32, #tpu.memory_space<vmem>>, vector<256x128xf32>
    tpu.vector_store %arg15[%c0_58, %c0_59], %52 {strides = array<i32>} : memref<256x128xf32, #tpu.memory_space<vmem>>, vector<256x128xf32>,
    %c1_60 = arith.constant 1 : index
    %c1_61 = arith.constant 1 : index
    %c0_62 = arith.constant 0 : index
    %54 = vector.load %arg14[%c1_60, %c1_61, %c0_62] : memref<18x18x128xf32, #tpu.memory_space<vmem>>, vector<16x16x128xf32>
    %55 = vector.shape_cast %54 : vector<16x16x128xf32> to vector<256x128xf32>
    %c4 = arith.constant 4 : index
    %c0_63 = arith.constant 0 : index
    %c0_64 = arith.constant 0 : index
    %56 = vector.load %arg7[%c4, %c0_63, %c0_64] : memref<9x128x128xf32, #tpu.memory_space<vmem>>, vector<1x128x128xf32>
    %57 = vector.shape_cast %56 : vector<1x128x128xf32> to vector<128x128xf32>
    %cst_65 = arith.constant dense<0.000000e+00> : vector<256x128xf32>
    %58 = tpu.matmul %55, %57, %cst_65 {dimension_numbers = #tpu.dot_dimension_numbers<[1], [0], [0], [1], [0, 0, 1, 1], [], []>} : vector<256x128xf32>, vector<128x128xf32>, vector<256x128xf32> -> vector<256x128xf32>
    %c0_66 = arith.constant 0 : index
    %c0_67 = arith.constant 0 : index
    %59 = vector.load %arg15[%c0_66, %c0_67] : memref<256x128xf32, #tpu.memory_space<vmem>>, vector<256x128xf32>
    %60 = arith.addf %59, %58 : vector<256x128xf32>
    %c0_68 = arith.constant 0 : index
    %c0_69 = arith.constant 0 : index
    %61 = vector.load %arg15[%c0_68, %c0_69] : memref<256x128xf32, #tpu.memory_space<vmem>>, vector<256x128xf32>
    tpu.vector_store %arg15[%c0_68, %c0_69], %60 {strides = array<i32>} : memref<256x128xf32, #tpu.memory_space<vmem>>, vector<256x128xf32>,
    %c1_70 = arith.constant 1 : index
    %c2_71 = arith.constant 2 : index
    %c0_72 = arith.constant 0 : index
    %62 = vector.load %arg14[%c1_70, %c2_71, %c0_72] : memref<18x18x128xf32, #tpu.memory_space<vmem>>, vector<16x16x128xf32>
    %63 = vector.shape_cast %62 : vector<16x16x128xf32> to vector<256x128xf32>
    %c5 = arith.constant 5 : index
    %c0_73 = arith.constant 0 : index
    %c0_74 = arith.constant 0 : index
    %64 = vector.load %arg7[%c5, %c0_73, %c0_74] : memref<9x128x128xf32, #tpu.memory_space<vmem>>, vector<1x128x128xf32>
    %65 = vector.shape_cast %64 : vector<1x128x128xf32> to vector<128x128xf32>
    %cst_75 = arith.constant dense<0.000000e+00> : vector<256x128xf32>
    %66 = tpu.matmul %63, %65, %cst_75 {dimension_numbers = #tpu.dot_dimension_numbers<[1], [0], [0], [1], [0, 0, 1, 1], [], []>} : vector<256x128xf32>, vector<128x128xf32>, vector<256x128xf32> -> vector<256x128xf32>
    %c0_76 = arith.constant 0 : index
    %c0_77 = arith.constant 0 : index
    %67 = vector.load %arg15[%c0_76, %c0_77] : memref<256x128xf32, #tpu.memory_space<vmem>>, vector<256x128xf32>
    %68 = arith.addf %67, %66 : vector<256x128xf32>
    %c0_78 = arith.constant 0 : index
    %c0_79 = arith.constant 0 : index
    %69 = vector.load %arg15[%c0_78, %c0_79] : memref<256x128xf32, #tpu.memory_space<vmem>>, vector<256x128xf32>
    tpu.vector_store %arg15[%c0_78, %c0_79], %68 {strides = array<i32>} : memref<256x128xf32, #tpu.memory_space<vmem>>, vector<256x128xf32>,
    %c2_80 = arith.constant 2 : index
    %c0_81 = arith.constant 0 : index
    %c0_82 = arith.constant 0 : index
    %70 = vector.load %arg14[%c2_80, %c0_81, %c0_82] : memref<18x18x128xf32, #tpu.memory_space<vmem>>, vector<16x16x128xf32>
    %71 = vector.shape_cast %70 : vector<16x16x128xf32> to vector<256x128xf32>
    %c6 = arith.constant 6 : index
    %c0_83 = arith.constant 0 : index
    %c0_84 = arith.constant 0 : index
    %72 = vector.load %arg7[%c6, %c0_83, %c0_84] : memref<9x128x128xf32, #tpu.memory_space<vmem>>, vector<1x128x128xf32>
    %73 = vector.shape_cast %72 : vector<1x128x128xf32> to vector<128x128xf32>
    %cst_85 = arith.constant dense<0.000000e+00> : vector<256x128xf32>
    %74 = tpu.matmul %71, %73, %cst_85 {dimension_numbers = #tpu.dot_dimension_numbers<[1], [0], [0], [1], [0, 0, 1, 1], [], []>} : vector<256x128xf32>, vector<128x128xf32>, vector<256x128xf32> -> vector<256x128xf32>
    %c0_86 = arith.constant 0 : index
    %c0_87 = arith.constant 0 : index
    %75 = vector.load %arg15[%c0_86, %c0_87] : memref<256x128xf32, #tpu.memory_space<vmem>>, vector<256x128xf32>
    %76 = arith.addf %75, %74 : vector<256x128xf32>
    %c0_88 = arith.constant 0 : index
    %c0_89 = arith.constant 0 : index
    %77 = vector.load %arg15[%c0_88, %c0_89] : memref<256x128xf32, #tpu.memory_space<vmem>>, vector<256x128xf32>
    tpu.vector_store %arg15[%c0_88, %c0_89], %76 {strides = array<i32>} : memref<256x128xf32, #tpu.memory_space<vmem>>, vector<256x128xf32>,
    %c2_90 = arith.constant 2 : index
    %c1_91 = arith.constant 1 : index
    %c0_92 = arith.constant 0 : index
    %78 = vector.load %arg14[%c2_90, %c1_91, %c0_92] : memref<18x18x128xf32, #tpu.memory_space<vmem>>, vector<16x16x128xf32>
    %79 = vector.shape_cast %78 : vector<16x16x128xf32> to vector<256x128xf32>
    %c7 = arith.constant 7 : index
    %c0_93 = arith.constant 0 : index
    %c0_94 = arith.constant 0 : index
    %80 = vector.load %arg7[%c7, %c0_93, %c0_94] : memref<9x128x128xf32, #tpu.memory_space<vmem>>, vector<1x128x128xf32>
    %81 = vector.shape_cast %80 : vector<1x128x128xf32> to vector<128x128xf32>
    %cst_95 = arith.constant dense<0.000000e+00> : vector<256x128xf32>
    %82 = tpu.matmul %79, %81, %cst_95 {dimension_numbers = #tpu.dot_dimension_numbers<[1], [0], [0], [1], [0, 0, 1, 1], [], []>} : vector<256x128xf32>, vector<128x128xf32>, vector<256x128xf32> -> vector<256x128xf32>
    %c0_96 = arith.constant 0 : index
    %c0_97 = arith.constant 0 : index
    %83 = vector.load %arg15[%c0_96, %c0_97] : memref<256x128xf32, #tpu.memory_space<vmem>>, vector<256x128xf32>
    %84 = arith.addf %83, %82 : vector<256x128xf32>
    %c0_98 = arith.constant 0 : index
    %c0_99 = arith.constant 0 : index
    %85 = vector.load %arg15[%c0_98, %c0_99] : memref<256x128xf32, #tpu.memory_space<vmem>>, vector<256x128xf32>
    tpu.vector_store %arg15[%c0_98, %c0_99], %84 {strides = array<i32>} : memref<256x128xf32, #tpu.memory_space<vmem>>, vector<256x128xf32>,
    %c2_100 = arith.constant 2 : index
    %c2_101 = arith.constant 2 : index
    %c0_102 = arith.constant 0 : index
    %86 = vector.load %arg14[%c2_100, %c2_101, %c0_102] : memref<18x18x128xf32, #tpu.memory_space<vmem>>, vector<16x16x128xf32>
    %87 = vector.shape_cast %86 : vector<16x16x128xf32> to vector<256x128xf32>
    %c8 = arith.constant 8 : index
    %c0_103 = arith.constant 0 : index
    %c0_104 = arith.constant 0 : index
    %88 = vector.load %arg7[%c8, %c0_103, %c0_104] : memref<9x128x128xf32, #tpu.memory_space<vmem>>, vector<1x128x128xf32>
    %89 = vector.shape_cast %88 : vector<1x128x128xf32> to vector<128x128xf32>
    %cst_105 = arith.constant dense<0.000000e+00> : vector<256x128xf32>
    %90 = tpu.matmul %87, %89, %cst_105 {dimension_numbers = #tpu.dot_dimension_numbers<[1], [0], [0], [1], [0, 0, 1, 1], [], []>} : vector<256x128xf32>, vector<128x128xf32>, vector<256x128xf32> -> vector<256x128xf32>
    %c0_106 = arith.constant 0 : index
    %c0_107 = arith.constant 0 : index
    %91 = vector.load %arg15[%c0_106, %c0_107] : memref<256x128xf32, #tpu.memory_space<vmem>>, vector<256x128xf32>
    %92 = arith.addf %91, %90 : vector<256x128xf32>
    %c0_108 = arith.constant 0 : index
    %c0_109 = arith.constant 0 : index
    %93 = vector.load %arg15[%c0_108, %c0_109] : memref<256x128xf32, #tpu.memory_space<vmem>>, vector<256x128xf32>
    tpu.vector_store %arg15[%c0_108, %c0_109], %92 {strides = array<i32>} : memref<256x128xf32, #tpu.memory_space<vmem>>, vector<256x128xf32>,
    %c0_110 = arith.constant 0 : index
    %c0_111 = arith.constant 0 : index
    %94 = vector.load %arg15[%c0_110, %c0_111] : memref<256x128xf32, #tpu.memory_space<vmem>>, vector<256x128xf32>
    %c0_112 = arith.constant 0 : index
    %c0_113 = arith.constant 0 : index
    %95 = vector.load %arg8[%c0_112, %c0_113] : memref<1x128xf32, #tpu.memory_space<vmem>>, vector<1x128xf32>
    %96 = vector.broadcast %95 : vector<1x128xf32> to vector<256x128xf32>
    %97 = arith.mulf %94, %96 : vector<256x128xf32>
    %c0_114 = arith.constant 0 : index
    %c0_115 = arith.constant 0 : index
    %98 = vector.load %arg9[%c0_114, %c0_115] : memref<1x128xf32, #tpu.memory_space<vmem>>, vector<1x128xf32>
    %99 = vector.broadcast %98 : vector<1x128xf32> to vector<256x128xf32>
    %100 = arith.addf %97, %99 : vector<256x128xf32>
    %cst_116 = arith.constant 0.000000e+00 : f32
    %101 = vector.broadcast %cst_116 : f32 to vector<256x128xf32>
    %102 = arith.maximumf %100, %101 : vector<256x128xf32>
    %c0_117 = arith.constant 0 : index
    %c0_118 = arith.constant 0 : index
    %103 = vector.load %arg10[%c0_117, %c0_118] : memref<128x128xf32, #tpu.memory_space<vmem>>, vector<128x128xf32>
    %cst_119 = arith.constant dense<0.000000e+00> : vector<256x128xf32>
    %104 = tpu.matmul %102, %103, %cst_119 {dimension_numbers = #tpu.dot_dimension_numbers<[1], [0], [0], [1], [0, 0, 1, 1], [], []>} : vector<256x128xf32>, vector<128x128xf32>, vector<256x128xf32> -> vector<256x128xf32>
    %c0_120 = arith.constant 0 : index
    %c0_121 = arith.constant 0 : index
    %105 = vector.load %arg11[%c0_120, %c0_121] : memref<1x128xf32, #tpu.memory_space<vmem>>, vector<1x128xf32>
    %106 = vector.broadcast %105 : vector<1x128xf32> to vector<256x128xf32>
    %107 = arith.addf %104, %106 : vector<256x128xf32>
    %c0_122 = arith.constant 0 : index
    %c0_123 = arith.constant 0 : index
    %108 = vector.load %arg12[%c0_122, %c0_123] : memref<128x128xf32, #tpu.memory_space<vmem>>, vector<128x128xf32>
    %cst_124 = arith.constant dense<0.000000e+00> : vector<256x128xf32>
    %109 = tpu.matmul %1, %108, %cst_124 {dimension_numbers = #tpu.dot_dimension_numbers<[1], [0], [0], [1], [0, 0, 1, 1], [], []>} : vector<256x128xf32>, vector<128x128xf32>, vector<256x128xf32> -> vector<256x128xf32>
    %110 = arith.addf %107, %109 : vector<256x128xf32>
    %c0_125 = arith.constant 0 : index
    %c0_126 = arith.constant 0 : index
    %c0_127 = arith.constant 0 : index
    %111 = vector.load %arg13[%c0_125, %c0_126, %c0_127] : memref<1x256x128xf32, #tpu.memory_space<vmem>>, vector<1x256x128xf32>
    %112 = vector.shape_cast %111 : vector<1x256x128xf32> to vector<256x128xf32>
    %113 = vector.shape_cast %110 : vector<256x128xf32> to vector<1x256x128xf32>
    tpu.vector_store %arg13[%c0_125, %c0_126, %c0_127], %113 {strides = array<i32>} : memref<1x256x128xf32, #tpu.memory_space<vmem>>, vector<1x256x128xf32>,
    return
  }
  func.func @transform_0(%arg0: i32) -> (i32, i32, i32) {
    %c0_i32 = arith.constant 0 : i32
    %c0_i32_0 = arith.constant 0 : i32
    %c0_i32_1 = arith.constant 0 : i32
    return %arg0, %c0_i32, %c0_i32_0 : i32, i32, i32
  }
  func.func @transform_1(%arg0: i32) -> (i32, i32) {
    %c0_i32 = arith.constant 0 : i32
    %c0_i32_0 = arith.constant 0 : i32
    %c0_i32_1 = arith.constant 0 : i32
    return %c0_i32, %c0_i32_0 : i32, i32
  }
  func.func @transform_2(%arg0: i32) -> (i32, i32) {
    %c0_i32 = arith.constant 0 : i32
    %c0_i32_0 = arith.constant 0 : i32
    %c0_i32_1 = arith.constant 0 : i32
    return %c0_i32, %c0_i32_0 : i32, i32
  }
  func.func @transform_3(%arg0: i32) -> (i32, i32) {
    %c0_i32 = arith.constant 0 : i32
    %c0_i32_0 = arith.constant 0 : i32
    %c0_i32_1 = arith.constant 0 : i32
    return %c0_i32, %c0_i32_0 : i32, i32
  }
  func.func @transform_4(%arg0: i32) -> (i32, i32) {
    %c0_i32 = arith.constant 0 : i32
    %c0_i32_0 = arith.constant 0 : i32
    %c0_i32_1 = arith.constant 0 : i32
    return %c0_i32, %c0_i32_0 : i32, i32
  }
  func.func @transform_5(%arg0: i32) -> (i32, i32) {
    %c0_i32 = arith.constant 0 : i32
    %c0_i32_0 = arith.constant 0 : i32
    %c0_i32_1 = arith.constant 0 : i32
    return %c0_i32, %c0_i32_0 : i32, i32
  }
  func.func @transform_6(%arg0: i32) -> (i32, i32, i32) {
    %c0_i32 = arith.constant 0 : i32
    %c0_i32_0 = arith.constant 0 : i32
    %c0_i32_1 = arith.constant 0 : i32
    %c0_i32_2 = arith.constant 0 : i32
    return %c0_i32, %c0_i32_0, %c0_i32_1 : i32, i32, i32
  }
  func.func @transform_7(%arg0: i32) -> (i32, i32) {
    %c0_i32 = arith.constant 0 : i32
    %c0_i32_0 = arith.constant 0 : i32
    %c0_i32_1 = arith.constant 0 : i32
    return %c0_i32, %c0_i32_0 : i32, i32
  }
  func.func @transform_8(%arg0: i32) -> (i32, i32) {
    %c0_i32 = arith.constant 0 : i32
    %c0_i32_0 = arith.constant 0 : i32
    %c0_i32_1 = arith.constant 0 : i32
    return %c0_i32, %c0_i32_0 : i32, i32
  }
  func.func @transform_9(%arg0: i32) -> (i32, i32) {
    %c0_i32 = arith.constant 0 : i32
    %c0_i32_0 = arith.constant 0 : i32
    %c0_i32_1 = arith.constant 0 : i32
    return %c0_i32, %c0_i32_0 : i32, i32
  }
  func.func @transform_10(%arg0: i32) -> (i32, i32) {
    %c0_i32 = arith.constant 0 : i32
    %c0_i32_0 = arith.constant 0 : i32
    %c0_i32_1 = arith.constant 0 : i32
    return %c0_i32, %c0_i32_0 : i32, i32
  }
  func.func @transform_11(%arg0: i32) -> (i32, i32) {
    %c0_i32 = arith.constant 0 : i32
    %c0_i32_0 = arith.constant 0 : i32
    %c0_i32_1 = arith.constant 0 : i32
    return %c0_i32, %c0_i32_0 : i32, i32
  }
  func.func @transform_12(%arg0: i32) -> (i32, i32, i32) {
    %c0_i32 = arith.constant 0 : i32
    %c0_i32_0 = arith.constant 0 : i32
    %c0_i32_1 = arith.constant 0 : i32
    return %arg0, %c0_i32, %c0_i32_0 : i32, i32, i32
  }
}

</mosaic_0001>

<bundles_post_ra>
// kernel: residual_forward.1
= control target key start
LH: loop header
LB: loop body
LE: loop exit
PB: predicated region body
PF: predicated region fallthrough
CT: control target
= control target key end

     0   :  { %s7514_s21 = smov 0   ;;  %s9024_s0 = inlined_call_operand.vmem [shape: f32[2,256,128], index: 0, kind: input, shape index: {}]   ;;  %s9025_s1 = inlined_call_operand.vmem [shape: f32[1,128], index: 1, kind: input, shape index: {}]   ;;  %s9026_s2 = inlined_call_operand.vmem [shape: f32[1,128], index: 2, kind: input, shape index: {}]   ;;  %s9027_s3 = inlined_call_operand.vmem [shape: f32[128,128], index: 3, kind: input, shape index: {}]   ;;  %s9028_s4 = inlined_call_operand.vmem [shape: f32[1,128], index: 4, kind: input, shape index: {}]   ;;  %s9029_s5 = inlined_call_operand.vmem [shape: f32[1,128], index: 5, kind: input, shape index: {}]   ;;  %s9030_s6 = inlined_call_operand.vmem [shape: f32[9,128,128], index: 6, kind: input, shape index: {}]   ;;  %s9031_s7 = inlined_call_operand.vmem [shape: f32[1,128], index: 7, kind: input, shape index: {}]   ;;  %s9032_s8 = inlined_call_operand.vmem [shape: f32[1,128], index: 8, kind: input, shape index: {}]   ;;  %s9033_s9 = inlined_call_operand.vmem [shape: f32[128,128], index: 9, kind: input, shape index: {}]   ;;  %s9034_s10 = inlined_call_operand.vmem [shape: f32[1,128], index: 10, kind: input, shape index: {}]   ;;  %s9035_s11 = inlined_call_operand.vmem [shape: f32[128,128], index: 11, kind: input, shape index: {}]   ;;  %s9036_s12 = inlined_call_operand.vmem [shape: f32[2,256,128], index: 12, kind: output, shape index: {}]  }
   0x1 LB: > { %s5010_s22 = sadd.s32 4294967295, %s7446_s21   ;;  %p5014_p0 = scmp.ge.s32.totalorder %s7446_s21, 1  ;;  %s7446_s21 = sphi %s7514_s21, %s22_s21  }
   0x2   : > { %p362_p1 = scmp.lt.s32.totalorder %s7446_s21, 3 }
   0x4   : > { %p363_p2 = pnand %p5014_p0, %p362_p1 }
   0x5   : > { %v556_v0 = vld [vmem:[%s9027_s3] sm:$0xff] (!%p363_p2)  ;;  %v557_v1 = vld [vmem:[%s9027_s3 + $0x8] sm:$0xff] (!%p363_p2)  ;;  %v558_v2 = vld [vmem:[%s9027_s3 + $0x10] sm:$0xff] (!%p363_p2)  ;;  %p404_p3 = scmp.lt.s32.totalorder (!%p363_p2), %s5010_s22, 1 }
   0x6   : > { %366 = sbr.rel (%p363_p2) target bundleno = 1150 (0x47e), region = 68  ;;  %v6694_v3 = vpack.c.bf16 (!%p363_p2), %v557_v1, %v556_v0  ;;  %v559_v4 = vld [vmem:[%s9027_s3 + $0x18] sm:$0xff] (!%p363_p2)  ;;  %v560_v6 = vld [vmem:[%s9027_s3 + $0x20] sm:$0xff] (!%p363_p2)  ;;  %v561_v7 = vld [vmem:[%s9027_s3 + $0x28] sm:$0xff] (!%p363_p2) }
   0x7   : > { %v6698_v5 = vpack.c.bf16 (!%p363_p2), %v559_v4, %v558_v2  ;;  %v6702_v8 = vpack.c.bf16 (!%p363_p2), %v561_v7, %v560_v6  ;;  %v562_v9 = vld [vmem:[%s9027_s3 + $0x30] sm:$0xff] (!%p363_p2)  ;;  %v7556_v10 = vld [vmem:[%s9025_s1] ss:$0 sm:$0xff] (!%p363_p2)  ;;  %v563_v11 = vld [vmem:[%s9027_s3 + $0x38] sm:$0xff] (!%p363_p2) }
   0x8   : > { %6695 = vmatprep.subr.bf16.mxu0 (!%p363_p2), %v6694_v3  ;;  %v7565_v13 = vld [vmem:[%s9026_s2] ss:$0 sm:$0xff] (!%p363_p2)  ;;  %v6706_v15 = vpack.c.bf16 (!%p363_p2), %v563_v11, %v562_v9  ;;  %v565_v18 = vld [vmem:[%s9027_s3 + $0x48] sm:$0xff] (!%p363_p2)  ;;  %v566_v21 = vld [vmem:[%s9027_s3 + $0x50] sm:$0xff] (!%p363_p2) }
   0x9   : > { %6697 = vmatpush3.bf16.msra.mxu0 (!%p363_p2), %v6694_v3  ;;  %v564_v17 = vld [vmem:[%s9027_s3 + $0x40] sm:$0xff] (!%p363_p2)  ;;  %v567_v22 = vld [vmem:[%s9027_s3 + $0x58] sm:$0xff] (!%p363_p2)  ;;  %v569_v25 = vld [vmem:[%s9027_s3 + $0x68] sm:$0xff] (!%p363_p2) }
   0xa   : > { %6699 = vmatprep.subr.bf16.mxu0 (!%p363_p2), %v6698_v5  ;;  %v6710_v20 = vpack.c.bf16 (!%p363_p2), %v565_v18, %v564_v17  ;;  %v6714_v23 = vpack.c.bf16 (!%p363_p2), %v567_v22, %v566_v21  ;;  %v568_v24 = vld [vmem:[%s9027_s3 + $0x60] sm:$0xff] (!%p363_p2)  ;;  %v570_v29 = vld [vmem:[%s9027_s3 + $0x70] sm:$0xff] (!%p363_p2)  ;;  %v571_v31 = vld [vmem:[%s9027_s3 + $0x78] sm:$0xff] (!%p363_p2) }
   0xb   : > { %v6718_v30 = vpack.c.bf16 (!%p363_p2), %v569_v25, %v568_v24  ;;  %v6722_v43 = vpack.c.bf16 (!%p363_p2), %v571_v31, %v570_v29  ;;  %v1026_v62 = vld [vmem:[%s9030_s6] sm:$0xff] (!%p363_p2)  ;;  %v1027_v3 = vld [vmem:[%s9030_s6 + $0x8] sm:$0xff] (!%p363_p2)  ;;  %v5058_v9 = vld [vmem:[%s9030_s6 + $0x198] sm:$0xff] (!%p363_p2) }
   0xc   : > { %v5055_v4 = vld [vmem:[%s9030_s6 + $0x180] sm:$0xff] (!%p363_p2)  ;;  %v6726_v18 = vpack.c.bf16 (!%p363_p2), %v1027_v3, %v1026_v62 }
   0xd   : > { %s9038_s22 = smov (!%p404_p3, %s5010_s22), 1  ;;  %6701 = vmatpush3.bf16.msra.mxu0 %v6698_v5  ;;  %v5056_v5 = vld [vmem:[%s9030_s6 + $0x188] sm:$0xff]  ;;  %v5059_v25 = vld [vmem:[%s9030_s6 + $0x1a0] sm:$0xff] }
   0xe   : > { %s5156_s17 = sshll.u32 %s9038_s22, 8  ;;  %6703 = vmatprep.subr.bf16.mxu0 %v6702_v8  ;;  %v1030_v29 = vld [vmem:[%s9030_s6 + $0x20] sm:$0xff] }
   0xf   : > { %s7551_s24 = scalar_lea.vmem %s9024_s0, %s5156_s17  ;;  %s8955_s15 = scalar_lea.vmem %s9036_s12, %s5156_s17 }
  0x10   : > { %v414_v12 = vld [vmem:[%s7551_s24] sm:$0xff]  ;;  %v415_v26 = vld [vmem:[%s7551_s24 + $0x8] sm:$0xff]  ;;  %v416_v27 = vld [vmem:[%s7551_s24 + $0x10] sm:$0xff] }
  0x11   : > { %v453_v14 = vmul.f32 %v7556_v10, %v414_v12  ;;  %6705 = vmatpush3.bf16.msra.mxu0 %v6702_v8  ;;  %v437_v28 = vld [vmem:[%s7551_s24 + $0xb8] sm:$0xff]  ;;  %v454_v32 = vmul.f32 %v7556_v10, %v415_v26  ;;  %v418_v34 = vld [vmem:[%s7551_s24 + $0x20] sm:$0xff]  ;;  %v455_v35 = vmul.f32 %v7556_v10, %v416_v27  ;;  %v439_v38 = vld [vmem:[%s7551_s24 + $0xc8] sm:$0xff] }
  0x12   : > { %6707 = vmatprep.subr.bf16.mxu0 %v6706_v15  ;;  %v417_v33 = vld [vmem:[%s7551_s24 + $0x18] sm:$0xff]  ;;  %v476_v36 = vmul.f32 %v7556_v10, %v437_v28  ;;  %v438_v37 = vld [vmem:[%s7551_s24 + $0xc0] sm:$0xff]  ;;  %v440_v39 = vld [vmem:[%s7551_s24 + $0xd0] sm:$0xff]  ;;  %v457_v45 = vmul.f32 %v7556_v10, %v418_v34  ;;  %v478_v50 = vmul.f32 %v7556_v10, %v439_v38 }
  0x13   : > { %v492_v16 = vadd.f32 %v7565_v13, %v453_v14  ;;  %v441_v40 = vld [vmem:[%s7551_s24 + $0xd8] sm:$0xff]  ;;  %v442_v41 = vld [vmem:[%s7551_s24 + $0xe0] sm:$0xff]  ;;  %v443_v42 = vld [vmem:[%s7551_s24 + $0xe8] sm:$0xff]  ;;  %v456_v44 = vmul.f32 %v7556_v10, %v417_v33  ;;  %v493_v48 = vadd.f32 %v7565_v13, %v454_v32  ;;  %v477_v49 = vmul.f32 %v7556_v10, %v438_v37 }
  0x14   : > { %v7610_v46 = vadd.f32 %v7565_v13, %v476_v36  ;;  %v444_v47 = vld [vmem:[%s7551_s24 + $0xf0] sm:$0xff]  ;;  %v479_v51 = vmul.f32 %v7556_v10, %v440_v39  ;;  %v445_v52 = vld [vmem:[%s7551_s24 + $0xf8] sm:$0xff]  ;;  %v494_v53 = vadd.f32 %v7565_v13, %v455_v35  ;;  %v480_v54 = vmul.f32 %v7556_v10, %v441_v40  ;;  %v419_v57 = vld [vmem:[%s7551_s24 + $0x28] sm:$0xff] }
  0x15   : > { %v524_v19 = vmax.f32 %v492_v16, 0.0  ;;  %6709 = vmatpush3.bf16.msra.mxu0 %v6706_v15  ;;  %v481_v55 = vmul.f32 %v7556_v10, %v442_v41  ;;  %v482_v56 = vmul.f32 %v7556_v10, %v443_v42  ;;  %v7624_v58 = vadd.f32 %v7565_v13, %v477_v49  ;;  %v420_v6 = vld [vmem:[%s7551_s24 + $0x30] sm:$0xff]  ;;  %v1029_v15 = vld [vmem:[%s9030_s6 + $0x18] sm:$0xff]  ;;  %v5060_v26 = vld [vmem:[%s9030_s6 + $0x1a8] sm:$0xff] }
  0x16   : > { %6711 = vmatprep.subr.bf16.mxu0 %v6710_v20  ;;  %v7627_v59 = vadd.f32 %v7565_v13, %v478_v50  ;;  %v7630_v60 = vadd.f32 %v7565_v13, %v479_v51  ;;  %v483_v61 = vmul.f32 %v7556_v10, %v444_v47  ;;  %v7637_v63 = vadd.f32 %v7565_v13, %v480_v54  ;;  %v5057_v8 = vld [vmem:[%s9030_s6 + $0x190] sm:$0xff]  ;;  %v422_v27 = vld [vmem:[%s7551_s24 + $0x40] sm:$0xff]  ;;  %v423_v38 = vld [vmem:[%s7551_s24 + $0x48] sm:$0xff] }
  0x17   : > { %5766 = vmatprep.mubr.f32.mxu0 %v524_v19  ;;  %v7640_v0 = vadd.f32 %v7565_v13, %v481_v55  ;;  %v7643_v1 = vadd.f32 %v7565_v13, %v482_v56  ;;  %v484_v2 = vmul.f32 %v7556_v10, %v445_v52  ;;  %v458_v11 = vmul.f32 %v7556_v10, %v419_v57  ;;  %v1028_v14 = vld [vmem:[%s9030_s6 + $0x10] sm:$0xff]  ;;  %v5062_v40 = vld [vmem:[%s9030_s6 + $0x1b8] sm:$0xff]  ;;  %v426_v54 = vld [vmem:[%s7551_s24 + $0x60] sm:$0xff] }
  0x18   : > { %v7657_v7 = vadd.f32 %v7565_v13, %v483_v61  ;;  %v525_v16 = vmax.f32 %v493_v48, 0.0  ;;  %v495_v17 = vadd.f32 %v7565_v13, %v456_v44  ;;  %v6822_v19 = vpack.c.bf16 %v5056_v5, %v5055_v4  ;;  %v5061_v39 = vld [vmem:[%s9030_s6 + $0x1b0] sm:$0xff]  ;;  %v1033_v44 = vld [vmem:[%s9030_s6 + $0x38] sm:$0xff]  ;;  %v1034_v56 = vld [vmem:[%s9030_s6 + $0x40] sm:$0xff] }
  0x19   : > { %6713 = vmatpush3.bf16.msra.mxu0 %v6710_v20  ;;  %v7667_v12 = vadd.f32 %v7565_v13, %v484_v2  ;;  %v526_v20 = vmax.f32 %v494_v53, 0.0  ;;  %v496_v21 = vadd.f32 %v7565_v13, %v457_v45  ;;  %v459_v22 = vmul.f32 %v7556_v10, %v420_v6  ;;  %v424_v41 = vld [vmem:[%s7551_s24 + $0x50] sm:$0xff]  ;;  %v425_v53 = vld [vmem:[%s7551_s24 + $0x58] sm:$0xff]  ;;  %v1035_v57 = vld [vmem:[%s9030_s6 + $0x48] sm:$0xff] }
  0x1a   : > { %6715 = vmatprep.subr.bf16.mxu0 %v6714_v23  ;;  %v6826_v24 = vpack.c.bf16 %v5058_v9, %v5057_v8  ;;  %6823 = vmatprep.subr.bf16.mxu1 %v6822_v19  ;;  %v6730_v28 = vpack.c.bf16 %v1029_v15, %v1028_v14  ;;  %v527_v31 = vmax.f32 %v495_v17, 0.0  ;;  %v497_v32 = vadd.f32 %v7565_v13, %v458_v11  ;;  %v427_v6 = vld [vmem:[%s7551_s24 + $0x68] sm:$0xff]  ;;  %v428_v8 = vld [vmem:[%s7551_s24 + $0x70] sm:$0xff] }
  0x1b   : > { %6825 = vmatpush3.bf16.msra.mxu1 %v6822_v19  ;;  %v6830_v34 = vpack.c.bf16 %v5060_v26, %v5059_v25  ;;  %v528_v35 = vmax.f32 %v496_v21, 0.0  ;;  %v498_v36 = vadd.f32 %v7565_v13, %v459_v22  ;;  %v461_v37 = vmul.f32 %v7556_v10, %v422_v27  ;;  %v429_v19 = vld [vmem:[%s7551_s24 + $0x78] sm:$0xff]  ;;  %v431_v27 = vld [vmem:[%s7551_s24 + $0x88] sm:$0xff] }
  0x1c   : > { %6827 = vmatprep.subr.bf16.mxu1 %v6826_v24  ;;  %v529_v45 = vmax.f32 %v497_v32, 0.0  ;;  %v462_v48 = vmul.f32 %v7556_v10, %v423_v38  ;;  %v6834_v49 = vpack.c.bf16 %v5062_v40, %v5061_v39  ;;  %v463_v52 = vmul.f32 %v7556_v10, %v424_v41 }
  0x1d   : > { %6717 = vmatpush3.bf16.msra.mxu0 %v6714_v23  ;;  %v421_v23 = vld [vmem:[%s7551_s24 + $0x38] sm:$0xff]  ;;  %v530_v50 = vmax.f32 %v498_v36, 0.0  ;;  %v500_v51 = vadd.f32 %v7565_v13, %v461_v37  ;;  %v464_v2 = vmul.f32 %v7556_v10, %v425_v53  ;;  %v465_v5 = vmul.f32 %v7556_v10, %v426_v54  ;;  %v434_v36 = vld [vmem:[%s7551_s24 + $0xa0] sm:$0xff] }
  0x1e   : > { %6719 = vmatprep.subr.bf16.mxu0 %v6718_v30  ;;  %v460_v33 = vmul.f32 %v7556_v10, %v421_v23  ;;  %v501_v62 = vadd.f32 %v7565_v13, %v462_v48  ;;  %v502_v4 = vadd.f32 %v7565_v13, %v463_v52  ;;  %v6742_v9 = vpack.c.bf16 %v1035_v57, %v1034_v56 }
  0x1f   : > { %6829 = vmatpush3.bf16.msra.mxu1 %v6826_v24  ;;  %v532_v3 = vmax.f32 %v500_v51, 0.0  ;;  %v503_v14 = vadd.f32 %v7565_v13, %v464_v2  ;;  %v466_v15 = vmul.f32 %v7556_v10, %v427_v6  ;;  %v504_v17 = vadd.f32 %v7565_v13, %v465_v5  ;;  %v5066_v5 = vld [vmem:[%s9030_s6 + $0x1d8] sm:$0xff]  ;;  %v1038_v6 = vld [vmem:[%s9030_s6 + $0x60] sm:$0xff] }
  0x20   : > { %v499_v47 = vadd.f32 %v7565_v13, %v460_v33  ;;  %6831 = vmatprep.subr.bf16.mxu1 %v6830_v34  ;;  %v533_v11 = vmax.f32 %v501_v62, 0.0  ;;  %v468_v23 = vmul.f32 %v7556_v10, %v429_v19  ;;  %v548_v62 = vmax.f32 %v7624_v58, 0.0  ;;  %v1041_v19 = vld [vmem:[%s9030_s6 + $0x78] sm:$0xff] }
  0x21   : > { %6721 = vmatpush3.bf16.msra.mxu0 %v6718_v30  ;;  %v1031_v30 = vld [vmem:[%s9030_s6 + $0x28] sm:$0xff]  ;;  %v535_v21 = vmax.f32 %v503_v14, 0.0  ;;  %v505_v22 = vadd.f32 %v7565_v13, %v466_v15  ;;  %v536_v24 = vmax.f32 %v504_v17, 0.0  ;;  %v550_v2 = vmax.f32 %v7630_v60, 0.0  ;;  %v5067_v15 = vld [vmem:[%s9030_s6 + $0x1e0] sm:$0xff]  ;;  %v1040_v17 = vld [vmem:[%s9030_s6 + $0x70] sm:$0xff] }
  0x22   : > { %6723 = vmatprep.subr.bf16.mxu0 %v6722_v43  ;;  %v6734_v42 = vpack.c.bf16 %v1031_v30, %v1030_v29  ;;  %v531_v61 = vmax.f32 %v499_v47, 0.0  ;;  %v507_v30 = vadd.f32 %v7565_v13, %v468_v23  ;;  %v555_v58 = vmax.f32 %v7667_v12, 0.0  ;;  %v5064_v60 = vld [vmem:[%s9030_s6 + $0x1c8] sm:$0xff]  ;;  %v5065_v12 = vld [vmem:[%s9030_s6 + $0x1d0] sm:$0xff] }
  0x23   : > { %6833 = vmatpush3.bf16.msra.mxu1 %v6830_v34  ;;  %v537_v29 = vmax.f32 %v505_v22, 0.0  ;;  %v7448_v14 = vmov 0.0   ;;  %v5070_v22 = vld [vmem:[%s9030_s6 + $0x1f8] sm:$0xff] }
  0x24   : > { %6835 = vmatprep.subr.bf16.mxu1 %v6834_v49  ;;  %v539_v37 = vmax.f32 %v507_v30, 0.0  ;;  %911 = vst [vmem:[#allocation2 + $0x20] sm:$0xff] %v7448_v14  ;;  %912 = vst [vmem:[#allocation2 + $0x28] sm:$0x3] %v7448_v14  ;;  %v5025_v30 = vld [vmem:[%s9030_s6 + $0x90] sm:$0xff] }
  0x25   : > { %6725 = vmatpush3.bf16.msra.mxu0 %v6722_v43  ;;  %v1032_v43 = vld [vmem:[%s9030_s6 + $0x30] sm:$0xff]  ;;  %907 = vst [vmem:[#allocation2] sm:$0xff] %v7448_v14  ;;  %908 = vst [vmem:[#allocation2 + $0x8] sm:$0xff] %v7448_v14 }
  0x26   : > { %6727 = vmatprep.subr.bf16.mxu0 %v6726_v18  ;;  %v6738_v55 = vpack.c.bf16 %v1033_v44, %v1032_v43  ;;  %v435_v43 = vld [vmem:[%s7551_s24 + $0xa8] sm:$0xff]  ;;  %v436_v44 = vld [vmem:[%s7551_s24 + $0xb0] sm:$0xff]  ;;  %909 = vst [vmem:[#allocation2 + $0x10] sm:$0x3] %v7448_v14  ;;  %910 = vst [vmem:[#allocation2 + $0x18] sm:$0xff] %v7448_v14 }
  0x27   : > { %6837 = vmatpush3.bf16.msra.mxu1 %v6834_v49  ;;  %v474_v48 = vmul.f32 %v7556_v10, %v435_v43  ;;  %v475_v51 = vmul.f32 %v7556_v10, %v436_v44  ;;  %913 = vst [vmem:[#allocation2 + $0x30] sm:$0xff] %v7448_v14  ;;  %914 = vst [vmem:[#allocation2 + $0x38] sm:$0xff] %v7448_v14  ;;  %v5034_v43 = vld [vmem:[%s9030_s6 + $0xd8] sm:$0xff] }
  0x28   : > { %5767 = vmatmul.mubr.f32.vlgmr.msra.gmra.mrb[0].mxu0 %v525_v16  ;;  %v534_v16 = vmax.f32 %v502_v4, 0.0  ;;  %v553_v4 = vmax.f32 %v7643_v1, 0.0  ;;  %v1037_v1 = vld [vmem:[%s9030_s6 + $0x58] sm:$0xff]  ;;  %915 = vst [vmem:[#allocation2 + $0x40] sm:$0x3] %v7448_v14  ;;  %916 = vst [vmem:[#allocation2 + $0x48] sm:$0xff] %v7448_v14 }
  0x29   : > { %5769 = vmatprep.mubr.f32.mxu0 %v526_v20  ;;  %6729 = vmatpush3.bf16.msra.mxu0 %v6726_v18  ;;  %v467_v18 = vmul.f32 %v7556_v10, %v428_v8  ;;  %v430_v20 = vld [vmem:[%s7551_s24 + $0x80] sm:$0xff]  ;;  %v513_v53 = vadd.f32 %v7565_v13, %v474_v48  ;;  %v6842_v8 = vpack.c.bf16 %v5066_v5, %v5065_v12 }
  0x2a   : > { %6731 = vmatprep.subr.bf16.mxu0 %v6730_v28  ;;  %v469_v26 = vmul.f32 %v7556_v10, %v430_v20  ;;  %917 = vst [vmem:[#allocation2 + $0x50] sm:$0xff] %v7448_v14  ;;  %918 = vst [vmem:[#allocation2 + $0x58] sm:$0x3] %v7448_v14  ;;  %v6754_v20 = vpack.c.bf16 %v1041_v19, %v1040_v17 }
  0x2b   : > { %v506_v25 = vadd.f32 %v7565_v13, %v467_v18  ;;  %v545_v56 = vmax.f32 %v513_v53, 0.0  ;;  %919 = vst [vmem:[#allocation2 + $0x60] sm:$0xff] %v7448_v14  ;;  %920 = vst [vmem:[#allocation2 + $0x68] sm:$0xff] %v7448_v14  ;;  %v5040_v53 = vld [vmem:[%s9030_s6 + $0x108] sm:$0xff] }
  0x2c   : > { %5770 = vmatmul.mubr.f32.gmra.mrb[2].mxu0 %v527_v31  ;;  %v470_v31 = vmul.f32 %v7556_v10, %v431_v27  ;;  %v508_v33 = vadd.f32 %v7565_v13, %v469_v26  ;;  %921 = vst [vmem:[#allocation2 + $0x70] sm:$0x3] %v7448_v14  ;;  %922 = vst [vmem:[#allocation2 + $0x78] sm:$0xff] %v7448_v14  ;;  %v5023_v27 = vld [vmem:[%s9030_s6 + $0x80] sm:$0xff] }
  0x2d   : > { %5772 = vmatprep.mubr.f32.mxu0 %v528_v35  ;;  %6733 = vmatpush3.bf16.msra.mxu0 %v6730_v28  ;;  %v432_v28 = vld [vmem:[%s7551_s24 + $0x90] sm:$0xff]  ;;  %v538_v32 = vmax.f32 %v506_v25, 0.0  ;;  %v433_v35 = vld [vmem:[%s7551_s24 + $0x98] sm:$0xff]  ;;  %923 = vst [vmem:[#allocation2 + $0x80] sm:$0xff] %v7448_v14  ;;  %924 = vst [vmem:[#allocation2 + $0x88] sm:$0x3] %v7448_v14 }
  0x2e   : > { %6735 = vmatprep.subr.bf16.mxu0 %v6734_v42  ;;  %v471_v34 = vmul.f32 %v7556_v10, %v432_v28  ;;  %v509_v38 = vadd.f32 %v7565_v13, %v470_v31  ;;  %v472_v39 = vmul.f32 %v7556_v10, %v433_v35  ;;  %v540_v40 = vmax.f32 %v508_v33, 0.0  ;;  %925 = vst [vmem:[#allocation2 + $0x90] sm:$0xff] %v7448_v14  ;;  %v5072_v25 = vld [vmem:[%s9030_s6 + $0x208] sm:$0xff]  ;;  %v5026_v31 = vld [vmem:[%s9030_s6 + $0x98] sm:$0xff]  ;;  %v5027_v33 = vld [vmem:[%s9030_s6 + $0xa0] sm:$0xff] }
  0x2f   : > { %926 = vst [vmem:[#allocation2 + $0x98] sm:$0xff] %v7448_v14  ;;  %927 = vst [vmem:[#allocation2 + $0xa0] sm:$0x3] %v7448_v14  ;;  %v5024_v28 = vld [vmem:[%s9030_s6 + $0x88] sm:$0xff] }
  0x30   : > { %5773 = vmatmul.mubr.f32.gmra.mrb[4].mxu0 %v529_v45  ;;  %v510_v41 = vadd.f32 %v7565_v13, %v471_v34  ;;  %v541_v45 = vmax.f32 %v509_v38, 0.0  ;;  %v511_v47 = vadd.f32 %v7565_v13, %v472_v39  ;;  %928 = vst [vmem:[#allocation2 + $0xa8] sm:$0xff] %v7448_v14  ;;  %929 = vst [vmem:[#allocation2 + $0xb0] sm:$0xff] %v7448_v14  ;;  %v5028_v34 = vld [vmem:[%s9030_s6 + $0xa8] sm:$0xff]  ;;  %v5031_v39 = vld [vmem:[%s9030_s6 + $0xc0] sm:$0xff] }
  0x31   : > { %5775 = vmatprep.mubr.f32.mxu0 %v530_v50  ;;  %6737 = vmatpush3.bf16.msra.mxu0 %v6734_v42  ;;  %v473_v42 = vmul.f32 %v7556_v10, %v434_v36  ;;  %v549_v10 = vmax.f32 %v7627_v59, 0.0  ;;  %v5063_v59 = vld [vmem:[%s9030_s6 + $0x1c0] sm:$0xff]  ;;  %930 = vst [vmem:[#allocation2 + $0xb8] sm:$0x3] %v7448_v14  ;;  %931 = vst [vmem:[#allocation2 + $0xc0] sm:$0xff] %v7448_v14  ;;  %v6766_v35 = vpack.c.bf16 %v5028_v34, %v5027_v33  ;;  %v5029_v36 = vld [vmem:[%s9030_s6 + $0xb0] sm:$0xff] }
  0x32   : > { %6739 = vmatprep.subr.bf16.mxu0 %v6738_v55  ;;  %v542_v49 = vmax.f32 %v510_v41, 0.0  ;;  %v543_v52 = vmax.f32 %v511_v47, 0.0  ;;  %932 = vst [vmem:[#allocation2 + $0xc8] sm:$0xff] %v7448_v14  ;;  %933 = vst [vmem:[#allocation2 + $0xd0] sm:$0x3] %v7448_v14  ;;  %v5036_v47 = vld [vmem:[%s9030_s6 + $0xe8] sm:$0xff] }
  0x33   : > { %v512_v50 = vadd.f32 %v7565_v13, %v473_v42  ;;  %934 = vst [vmem:[#allocation2 + $0xd8] sm:$0xff] %v7448_v14  ;;  %935 = vst [vmem:[#allocation2 + $0xe0] sm:$0xff] %v7448_v14  ;;  %v5033_v42 = vld [vmem:[%s9030_s6 + $0xd0] sm:$0xff] }
  0x34   : > { %5776 = vmatmul.mubr.f32.gmra.mrb[6].mxu0 %v531_v61  ;;  %v547_v61 = vmax.f32 %v7610_v46, 0.0  ;;  %v554_v46 = vmax.f32 %v7657_v7, 0.0  ;;  %936 = vst [vmem:[#allocation2 + $0xe8] sm:$0x3] %v7448_v14  ;;  %937 = vst [vmem:[#allocation2 + $0xf0] sm:$0xff] %v7448_v14  ;;  %v6778_v44 = vpack.c.bf16 %v5034_v43, %v5033_v42  ;;  %v5077_v42 = vld [vmem:[%s9030_s6 + $0x230] sm:$0xff] }
  0x35   : > { %5778 = vmatprep.mubr.f32.mxu0 %v532_v3  ;;  %6741 = vmatpush3.bf16.msra.mxu0 %v6738_v55  ;;  %v544_v54 = vmax.f32 %v512_v50, 0.0  ;;  %v514_v55 = vadd.f32 %v7565_v13, %v475_v51  ;;  %v551_v3 = vmax.f32 %v7637_v63, 0.0  ;;  %v552_v13 = vmax.f32 %v7640_v0, 0.0  ;;  %v1036_v63 = vld [vmem:[%s9030_s6 + $0x50] sm:$0xff]  ;;  %938 = vst [vmem:[#allocation2 + $0xf8] sm:$0xff] %v7448_v14  ;;  %940 = vst [vmem:[#allocation2 + $0x108] sm:$0xff] %v7448_v14 }
  0x36   : > { %6743 = vmatprep.subr.bf16.mxu0 %v6742_v9  ;;  %v6838_v0 = vpack.c.bf16 %v5064_v60, %v5063_v59  ;;  %v6746_v7 = vpack.c.bf16 %v1037_v1, %v1036_v63  ;;  %939 = vst [vmem:[#allocation2 + $0x100] sm:$0x3] %v7448_v14  ;;  %941 = vst [vmem:[#allocation2 + $0x110] sm:$0xff] %v7448_v14  ;;  %v5038_v50 = vld [vmem:[%s9030_s6 + $0xf8] sm:$0xff] }
  0x37   : > { %v546_v57 = vmax.f32 %v514_v55, 0.0  ;;  %942 = vst [vmem:[#allocation2 + $0x118] sm:$0x3] %v7448_v14  ;;  %943 = vst [vmem:[#allocation2 + $0x120] sm:$0xff] %v7448_v14  ;;  %v7934_v55 = vld [vmem:[%s9028_s4] ss:$0 sm:$0xff] }
  0x38   : > { %5779 = vmatmul.mubr.f32.gmra.mrb[8].mxu0 %v533_v11  ;;  %6839 = vmatprep.subr.bf16.mxu1 %v6838_v0  ;;  %944 = vst [vmem:[#allocation2 + $0x128] sm:$0xff] %v7448_v14  ;;  %945 = vst [vmem:[#allocation2 + $0x130] sm:$0x3] %v7448_v14 }
  0x39   : > { %5781 = vmatprep.mubr.f32.mxu0 %v534_v16  ;;  %6745 = vmatpush3.bf16.msra.mxu0 %v6742_v9  ;;  %v1039_v9 = vld [vmem:[%s9030_s6 + $0x68] sm:$0xff]  ;;  %946 = vst [vmem:[#allocation2 + $0x138] sm:$0xff] %v7448_v14  ;;  %947 = vst [vmem:[#allocation2 + $0x140] sm:$0xff] %v7448_v14 }
  0x3a   : > { %6747 = vmatprep.subr.bf16.mxu0 %v6746_v7  ;;  %6841 = vmatpush3.bf16.msra.mxu1 %v6838_v0  ;;  %v6750_v11 = vpack.c.bf16 %v1039_v9, %v1038_v6  ;;  %948 = vst [vmem:[#allocation2 + $0x148] sm:$0x3] %v7448_v14  ;;  %949 = vst [vmem:[#allocation2 + $0x150] sm:$0xff] %v7448_v14  ;;  %v5068_v16 = vld [vmem:[%s9030_s6 + $0x1e8] sm:$0xff] }
  0x3b   : > { %6843 = vmatprep.subr.bf16.mxu1 %v6842_v8  ;;  %950 = vst [vmem:[#allocation2 + $0x158] sm:$0xff] %v7448_v14  ;;  %951 = vst [vmem:[#allocation2 + $0x160] sm:$0x3] %v7448_v14  ;;  %v6846_v18 = vpack.c.bf16 %v5068_v16, %v5067_v15  ;;  %v5073_v15 = vld [vmem:[%s9030_s6 + $0x210] sm:$0xff]  ;;  %v5074_v16 = vld [vmem:[%s9030_s6 + $0x218] sm:$0xff] }
  0x3c   : > { %5782 = vmatmul.mubr.f32.gmra.mrb[10].mxu0 %v535_v21  ;;  %952 = vst [vmem:[#allocation2 + $0x168] sm:$0xff] %v7448_v14  ;;  %953 = vst [vmem:[#allocation2 + $0x170] sm:$0xff] %v7448_v14  ;;  %v5069_v21 = vld [vmem:[%s9030_s6 + $0x1f0] sm:$0xff] }
  0x3d   : > { %5784 = vmatprep.mubr.f32.mxu0 %v536_v24  ;;  %6749 = vmatpush3.bf16.msra.mxu0 %v6746_v7  ;;  %954 = vst [vmem:[#allocation2 + $0x178] sm:$0x3] %v7448_v14  ;;  %955 = vst [vmem:[#allocation2 + $0x180] sm:$0xff] %v7448_v14  ;;  %v6850_v23 = vpack.c.bf16 %v5070_v22, %v5069_v21  ;;  %v5071_v24 = vld [vmem:[%s9030_s6 + $0x200] sm:$0xff] }
  0x3e   : > { %956 = vst [vmem:[#allocation2 + $0x188] sm:$0xff] %v7448_v14  ;;  %957 = vst [vmem:[#allocation2 + $0x190] sm:$0x3] %v7448_v14  ;;  %6751 = vmatprep.subr.bf16.mxu0 %v6750_v11  ;;  %6845 = vmatpush3.bf16.msra.mxu1 %v6842_v8  ;;  %v7871_v26 = vpack.c.bf16 %v5072_v25, %v5071_v24  ;;  %v6858_v25 = vpack.c.bf16 %v5074_v16, %v5073_v15 }
  0x3f   : > { %958 = vst [vmem:[#allocation2 + $0x198] sm:$0xff] %v7448_v14  ;;  %959 = vst [vmem:[#allocation2 + $0x1a0] sm:$0xff] %v7448_v14  ;;  %6847 = vmatprep.subr.bf16.mxu1 %v6846_v18 }
  0x40   : > { %5785 = vmatmul.mubr.f32.gmra.mrb[12].mxu0 %v537_v29  ;;  %960 = vst [vmem:[#allocation2 + $0x1a8] sm:$0x3] %v7448_v14  ;;  %v6758_v29 = vpack.c.bf16 %v5024_v28, %v5023_v27 }
  0x41   : > { %5787 = vmatprep.mubr.f32.mxu0 %v538_v32  ;;  %6753 = vmatpush3.bf16.msra.mxu0 %v6750_v11  ;;  %v6762_v32 = vpack.c.bf16 %v5026_v31, %v5025_v30  ;;  %v5076_v30 = vld [vmem:[%s9030_s6 + $0x228] sm:$0xff] }
  0x42   : > { %6755 = vmatprep.subr.bf16.mxu0 %v6754_v20  ;;  %6849 = vmatpush3.bf16.msra.mxu1 %v6846_v18 }
  0x43   : > { %6851 = vmatprep.subr.bf16.mxu1 %v6850_v23 }
  0x44   : > { %5788 = vmatmul.mubr.f32.gmra.mrb[14].mxu0 %v539_v37  ;;  %v5030_v37 = vld [vmem:[%s9030_s6 + $0xb8] sm:$0xff] }
  0x45   : > { %5790 = vmatprep.mubr.f32.mxu0 %v540_v40  ;;  %6757 = vmatpush3.bf16.msra.mxu0 %v6754_v20  ;;  %v6770_v38 = vpack.c.bf16 %v5030_v37, %v5029_v36  ;;  %v5032_v40 = vld [vmem:[%s9030_s6 + $0xc8] sm:$0xff] }
  0x46   : > { %6853 = vmatpush3.bf16.msra.mxu1 %v6850_v23  ;;  %6759 = vmatprep.subr.bf16.mxu0 %v6758_v29  ;;  %v6774_v41 = vpack.c.bf16 %v5032_v40, %v5031_v39 }
  0x47   : > { %6855 = vmatprep.subr.bf16.mxu1 %v7871_v26 }
  0x48   : > { %5791 = vmatmul.mubr.f32.gmra.mrb[16].mxu0 %v541_v45  ;;  %v5035_v45 = vld [vmem:[%s9030_s6 + $0xe0] sm:$0xff] }
  0x49   : > { %5793 = vmatprep.mubr.f32.mxu0 %v542_v49  ;;  %v6782_v48 = vpack.c.bf16 %v5036_v47, %v5035_v45  ;;  %v5037_v49 = vld [vmem:[%s9030_s6 + $0xf0] sm:$0xff] }
  0x4a   : > { %v6786_v51 = vpack.c.bf16 %v5038_v50, %v5037_v49 }
  0x4c   : > { %5794 = vmatmul.mubr.f32.gmra.mrb[18].mxu0 %v543_v52  ;;  %v5039_v52 = vld [vmem:[%s9030_s6 + $0x100] sm:$0xff] }
  0x4d   : > { %5796 = vmatprep.mubr.f32.mxu0 %v544_v54  ;;  %v7928_v54 = vpack.c.bf16 %v5040_v53, %v5039_v52 }
  0x50   : > { %5797 = vmatmul.mubr.f32.gmra.mrb[20].mxu0 %v545_v56 }
  0x51   : > { %5799 = vmatprep.mubr.f32.mxu0 %v546_v57  ;;  %v7939_v57 = vld [vmem:[%s9029_s5] ss:$0 sm:$0xff] }
  0x54   : > { %5800 = vmatmul.mubr.f32.gmra.mrb[22].mxu0 %v547_v61 }
  0x55   : > { %5802 = vmatprep.mubr.f32.mxu0 %v548_v62 }
  0x58   : > { %5803 = vmatmul.mubr.f32.gmra.mrb[24].mxu0 %v549_v10 }
  0x59   : > { %5805 = vmatprep.mubr.f32.mxu0 %v550_v2 }
  0x5c   : > { %5806 = vmatmul.mubr.f32.gmra.mrb[26].mxu0 %v551_v3 }
  0x5d   : > { %5808 = vmatprep.mubr.f32.mxu0 %v552_v13 }
  0x60   : > { %5809 = vmatmul.mubr.f32.gmra.mrb[28].mxu0 %v553_v4 }
  0x61   : > { %5811 = vmatprep.mubr.f32.mxu0 %v554_v46 }
  0x64   : > { %5812 = vmatmul.mubr.f32.gmra.mrb[30].mxu0 %v555_v58 }
  0x65   : > { %5846 = vmatprep.mubr.f32.mxu0 %v7448_v14 }
  0x68   : > { %5847 = vmatmul.mubr.f32.vlgmr.msra.gmra.mrb[32].mxu0 %v7448_v14 }
  0x69   : > { %6761 = vmatpush3.bf16.msra.mxu0 %v6758_v29  ;;  %v5075_v29 = vld [vmem:[%s9030_s6 + $0x220] sm:$0xff] }
  0x6a   : > { %6763 = vmatprep.subr.bf16.mxu0 %v6762_v32  ;;  %v6862_v39 = vpack.c.bf16 %v5076_v30, %v5075_v29 }
  0x6d   : > { %6765 = vmatpush3.bf16.msra.mxu0 %v6762_v32 }
  0x6e   : > { %6767 = vmatprep.subr.bf16.mxu0 %v6766_v35 }
  0x71   : > { %6769 = vmatpush3.bf16.msra.mxu0 %v6766_v35 }
  0x72   : > { %6771 = vmatprep.subr.bf16.mxu0 %v6770_v38 }
  0x75   : > { %6773 = vmatpush3.bf16.msra.mxu0 %v6770_v38 }
  0x76   : > { %6775 = vmatprep.subr.bf16.mxu0 %v6774_v41 }
  0x79   : > { %6777 = vmatpush3.bf16.msra.mxu0 %v6774_v41 }
  0x7a   : > { %6779 = vmatprep.subr.bf16.mxu0 %v6778_v44 }
  0x7d   : > { %6781 = vmatpush3.bf16.msra.mxu0 %v6778_v44 }
  0x7e   : > { %6783 = vmatprep.subr.bf16.mxu0 %v6782_v48 }
  0x81   : > { %6785 = vmatpush3.bf16.msra.mxu0 %v6782_v48 }
  0x82   : > { %6787 = vmatprep.subr.bf16.mxu0 %v6786_v51 }
  0x85   : > { %6789 = vmatpush3.bf16.msra.mxu0 %v6786_v51 }
  0x86   : > { %6791 = vmatprep.subr.bf16.mxu0 %v7928_v54 }
  0xfb   : > { %v5768_v56 = vpop.f32.mrb[0].mxu0 }
  0xfc   : > { %v805_v61 = vmul.f32 %v5768_v56, %v7934_v55  ;;  %v638_v62 = vpop.f32.mrb[1].mxu0 }
  0xfd   : > { %v804_v10 = vmul.f32 %v7934_v55, %v638_v62  ;;  %v5080_v62 = vld [vmem:[%s9030_s6 + $0x248] sm:$0xff] }
  0xfe   : > { %v844_v2 = vadd.f32 %v7939_v57, %v805_v61  ;;  %v5079_v61 = vld [vmem:[%s9030_s6 + $0x240] sm:$0xff] }
  0xff   : > { %v843_v3 = vadd.f32 %v7939_v57, %v804_v10  ;;  %v5771_v13 = vpop.f32.mrb[2].mxu0 }
 0x100   : > { %v7945_v4 = vmax.f32 %v844_v2, 0.0  ;;  %v807_v46 = vmul.f32 %v5771_v13, %v7934_v55  ;;  %v648_v58 = vpop.f32.mrb[3].mxu0 }
 0x101   : > { %v7948_v59 = vmax.f32 %v843_v3, 0.0  ;;  %v806_v60 = vmul.f32 %v7934_v55, %v648_v58 }
 0x102   : > { %963 = vst [vmem:[#allocation2 + $0x21] sm:$0xff] %v7945_v4  ;;  %v846_v63 = vadd.f32 %v7939_v57, %v807_v46 }
 0x103   : > { %962 = vst [vmem:[#allocation2 + $0x19] sm:$0xff] %v7948_v59  ;;  %v845_v0 = vadd.f32 %v7939_v57, %v806_v60  ;;  %v5774_v1 = vpop.f32.mrb[4].mxu0 }
 0x104   : > { %v7955_v7 = vmax.f32 %v846_v63, 0.0  ;;  %v809_v12 = vmul.f32 %v5774_v1, %v7934_v55  ;;  %v658_v5 = vpop.f32.mrb[5].mxu0 }
 0x105   : > { %v7958_v6 = vmax.f32 %v845_v0, 0.0  ;;  %v808_v8 = vmul.f32 %v7934_v55, %v658_v5  ;;  %v6870_v0 = vpack.c.bf16 %v5080_v62, %v5079_v61  ;;  %v5081_v5 = vld [vmem:[%s9030_s6 + $0x250] sm:$0xff]  ;;  %v5087_v62 = vld [vmem:[%s9030_s6 + $0x280] sm:$0xff] }
 0x106   : > { %965 = vst [vmem:[#allocation2 + $0x39] sm:$0xff] %v7955_v7  ;;  %v848_v9 = vadd.f32 %v7939_v57, %v809_v12 }
 0x107   : > { %964 = vst [vmem:[#allocation2 + $0x31] sm:$0xff] %v7958_v6  ;;  %v847_v11 = vadd.f32 %v7939_v57, %v808_v8  ;;  %v5777_v14 = vpop.f32.mrb[6].mxu0  ;;  %v5082_v8 = vld [vmem:[%s9030_s6 + $0x258] sm:$0xff] }
 0x108   : > { %v7971_v17 = vmax.f32 %v848_v9, 0.0  ;;  %v811_v18 = vmul.f32 %v5777_v14, %v7934_v55  ;;  %v668_v19 = vpop.f32.mrb[7].mxu0 }
 0x109   : > { %v7974_v20 = vmax.f32 %v847_v11, 0.0  ;;  %v810_v21 = vmul.f32 %v7934_v55, %v668_v19 }
 0x10a   : > { %967 = vst [vmem:[#allocation2 + $0x51] sm:$0xff] %v7971_v17  ;;  %v850_v22 = vadd.f32 %v7939_v57, %v811_v18  ;;  %v996_v23 = vld [vmem:[#allocation2 + $0x18] sm:$0xff]  ;;  %v997_v24 = vld [vmem:[#allocation2 + $0x20] sm:$0xff] }
 0x10b   : > { %966 = vst [vmem:[#allocation2 + $0x49] sm:$0xff] %v7974_v20  ;;  %v849_v27 = vadd.f32 %v7939_v57, %v810_v21  ;;  %v5780_v28 = vpop.f32.mrb[8].mxu0  ;;  %5849 = vmatprep.mubr.f32.mxu0 %v996_v23  ;;  %6086 = vmatprep.mubr.f32.mxu1 %v996_v23 }
 0x10c   : > { %v7987_v31 = vmax.f32 %v850_v22, 0.0  ;;  %v813_v32 = vmul.f32 %v5780_v28, %v7934_v55  ;;  %v678_v33 = vpop.f32.mrb[9].mxu0  ;;  %5850 = vmatmul.mubr.f32.gmra.mrb[34].mxu0 %v997_v24  ;;  %6087 = vmatmul.mubr.f32.vlgmr.msra.gmra.mrb[0].mxu1 %v997_v24  ;;  %v6874_v22 = vpack.c.bf16 %v5082_v8, %v5081_v5 }
 0x10d   : > { %v7990_v34 = vmax.f32 %v849_v27, 0.0  ;;  %v812_v35 = vmul.f32 %v7934_v55, %v678_v33  ;;  %6857 = vmatpush3.bf16.msra.mxu1 %v7871_v26  ;;  %v5078_v26 = vld [vmem:[%s9030_s6 + $0x238] sm:$0xff]  ;;  %v5084_v27 = vld [vmem:[%s9030_s6 + $0x268] sm:$0xff] }
 0x10e   : > { %969 = vst [vmem:[#allocation2 + $0x69] sm:$0xff] %v7987_v31  ;;  %v852_v36 = vadd.f32 %v7939_v57, %v813_v32  ;;  %v998_v37 = vld [vmem:[#allocation2 + $0x30] sm:$0xff]  ;;  %v999_v38 = vld [vmem:[#allocation2 + $0x38] sm:$0xff]  ;;  %6859 = vmatprep.subr.bf16.mxu1 %v6858_v25  ;;  %v6866_v52 = vpack.c.bf16 %v5078_v26, %v5077_v42 }
 0x10f   : > { %968 = vst [vmem:[#allocation2 + $0x61] sm:$0xff] %v7990_v34  ;;  %v851_v40 = vadd.f32 %v7939_v57, %v812_v35  ;;  %v5783_v41 = vpop.f32.mrb[10].mxu0  ;;  %5852 = vmatprep.mubr.f32.mxu0 %v998_v37  ;;  %6089 = vmatprep.mubr.f32.mxu1 %v998_v37  ;;  %v5086_v42 = vld [vmem:[%s9030_s6 + $0x278] sm:$0xff] }
 0x110   : > { %v8004_v43 = vmax.f32 %v852_v36, 0.0  ;;  %v815_v44 = vmul.f32 %v5783_v41, %v7934_v55  ;;  %v688_v45 = vpop.f32.mrb[11].mxu0  ;;  %5853 = vmatmul.mubr.f32.gmra.mrb[36].mxu0 %v999_v38  ;;  %6090 = vmatmul.mubr.f32.gmra.mrb[2].mxu1 %v999_v38  ;;  %v5085_v41 = vld [vmem:[%s9030_s6 + $0x270] sm:$0xff] }
 0x111   : > { %v8007_v47 = vmax.f32 %v851_v40, 0.0  ;;  %v814_v48 = vmul.f32 %v7934_v55, %v688_v45  ;;  %6861 = vmatpush3.bf16.msra.mxu1 %v6858_v25  ;;  %v5083_v25 = vld [vmem:[%s9030_s6 + $0x260] sm:$0xff] }
 0x112   : > { %971 = vst [vmem:[#allocation2 + $0x81] sm:$0xff] %v8004_v43  ;;  %v854_v49 = vadd.f32 %v7939_v57, %v815_v44  ;;  %v1000_v50 = vld [vmem:[#allocation2 + $0x48] sm:$0xff]  ;;  %v1001_v51 = vld [vmem:[#allocation2 + $0x50] sm:$0xff]  ;;  %6863 = vmatprep.subr.bf16.mxu1 %v6862_v39  ;;  %v6878_v38 = vpack.c.bf16 %v5084_v27, %v5083_v25 }
 0x113   : > { %970 = vst [vmem:[#allocation2 + $0x79] sm:$0xff] %v8007_v47  ;;  %v853_v53 = vadd.f32 %v7939_v57, %v814_v48  ;;  %v5786_v56 = vpop.f32.mrb[12].mxu0  ;;  %5855 = vmatprep.mubr.f32.mxu0 %v1000_v50  ;;  %6092 = vmatprep.mubr.f32.mxu1 %v1000_v50 }
 0x114   : > { %v8020_v10 = vmax.f32 %v854_v49, 0.0  ;;  %v817_v2 = vmul.f32 %v5786_v56, %v7934_v55  ;;  %v698_v3 = vpop.f32.mrb[13].mxu0  ;;  %5856 = vmatmul.mubr.f32.gmra.mrb[38].mxu0 %v1001_v51  ;;  %6093 = vmatmul.mubr.f32.gmra.mrb[4].mxu1 %v1001_v51 }
 0x115   : > { %v8023_v13 = vmax.f32 %v853_v53, 0.0  ;;  %v816_v46 = vmul.f32 %v7934_v55, %v698_v3  ;;  %6865 = vmatpush3.bf16.msra.mxu1 %v6862_v39  ;;  %v6882_v53 = vpack.c.bf16 %v5086_v42, %v5085_v41 }
 0x116   : > { %973 = vst [vmem:[#allocation2 + $0x99] sm:$0xff] %v8020_v10  ;;  %v856_v58 = vadd.f32 %v7939_v57, %v817_v2  ;;  %v1002_v60 = vld [vmem:[#allocation2 + $0x60] sm:$0xff]  ;;  %v1003_v63 = vld [vmem:[#allocation2 + $0x68] sm:$0xff]  ;;  %6867 = vmatprep.subr.bf16.mxu1 %v6866_v52 }
 0x117   : > { %972 = vst [vmem:[#allocation2 + $0x91] sm:$0xff] %v8023_v13  ;;  %v855_v1 = vadd.f32 %v7939_v57, %v816_v46  ;;  %v5789_v12 = vpop.f32.mrb[14].mxu0  ;;  %5858 = vmatprep.mubr.f32.mxu0 %v1002_v60  ;;  %6095 = vmatprep.mubr.f32.mxu1 %v1002_v60  ;;  %v5088_v2 = vld [vmem:[%s9030_s6 + $0x288] sm:$0xff] }
 0x118   : > { %v8036_v9 = vmax.f32 %v856_v58, 0.0  ;;  %v819_v11 = vmul.f32 %v5789_v12, %v7934_v55  ;;  %v708_v14 = vpop.f32.mrb[15].mxu0  ;;  %5859 = vmatmul.mubr.f32.gmra.mrb[40].mxu0 %v1003_v63  ;;  %6096 = vmatmul.mubr.f32.gmra.mrb[6].mxu1 %v1003_v63  ;;  %v8092_v5 = vpack.c.bf16 %v5088_v2, %v5087_v62 }
 0x119   : > { %v8039_v15 = vmax.f32 %v855_v1, 0.0  ;;  %v818_v16 = vmul.f32 %v7934_v55, %v708_v14  ;;  %6869 = vmatpush3.bf16.msra.mxu1 %v6866_v52 }
 0x11a   : > { %975 = vst [vmem:[#allocation2 + $0xb1] sm:$0xff] %v8036_v9  ;;  %v858_v18 = vadd.f32 %v7939_v57, %v819_v11  ;;  %v1004_v19 = vld [vmem:[#allocation2 + $0x78] sm:$0xff]  ;;  %v1005_v21 = vld [vmem:[#allocation2 + $0x80] sm:$0xff]  ;;  %6871 = vmatprep.subr.bf16.mxu1 %v6870_v0 }
 0x11b   : > { %974 = vst [vmem:[#allocation2 + $0xa9] sm:$0xff] %v8039_v15  ;;  %v857_v23 = vadd.f32 %v7939_v57, %v818_v16  ;;  %v5792_v24 = vpop.f32.mrb[16].mxu0  ;;  %5861 = vmatprep.mubr.f32.mxu0 %v1004_v19  ;;  %6098 = vmatprep.mubr.f32.mxu1 %v1004_v19 }
 0x11c   : > { %v8052_v28 = vmax.f32 %v858_v18, 0.0  ;;  %v821_v29 = vmul.f32 %v5792_v24, %v7934_v55  ;;  %v718_v30 = vpop.f32.mrb[17].mxu0  ;;  %5862 = vmatmul.mubr.f32.gmra.mrb[42].mxu0 %v1005_v21  ;;  %6099 = vmatmul.mubr.f32.gmra.mrb[8].mxu1 %v1005_v21 }
 0x11d   : > { %v8055_v32 = vmax.f32 %v857_v23, 0.0  ;;  %v820_v33 = vmul.f32 %v7934_v55, %v718_v30  ;;  %6873 = vmatpush3.bf16.msra.mxu1 %v6870_v0 }
 0x11e   : > { %977 = vst [vmem:[#allocation2 + $0xc9] sm:$0xff] %v8052_v28  ;;  %v860_v35 = vadd.f32 %v7939_v57, %v821_v29  ;;  %v1006_v36 = vld [vmem:[#allocation2 + $0x90] sm:$0xff]  ;;  %v1007_v37 = vld [vmem:[#allocation2 + $0x98] sm:$0xff]  ;;  %6875 = vmatprep.subr.bf16.mxu1 %v6874_v22 }
 0x11f   : > { %976 = vst [vmem:[#allocation2 + $0xc1] sm:$0xff] %v8055_v32  ;;  %v859_v39 = vadd.f32 %v7939_v57, %v820_v33  ;;  %v5795_v40 = vpop.f32.mrb[18].mxu0  ;;  %5864 = vmatprep.mubr.f32.mxu0 %v1006_v36  ;;  %6101 = vmatprep.mubr.f32.mxu1 %v1006_v36 }
 0x120   : > { %v8068_v26 = vmax.f32 %v860_v35, 0.0  ;;  %v823_v44 = vmul.f32 %v5795_v40, %v7934_v55  ;;  %v728_v45 = vpop.f32.mrb[19].mxu0  ;;  %5865 = vmatmul.mubr.f32.gmra.mrb[44].mxu0 %v1007_v37  ;;  %6102 = vmatmul.mubr.f32.gmra.mrb[10].mxu1 %v1007_v37 }
 0x121   : > { %v8071_v48 = vmax.f32 %v859_v39, 0.0  ;;  %v822_v49 = vmul.f32 %v7934_v55, %v728_v45  ;;  %6877 = vmatpush3.bf16.msra.mxu1 %v6874_v22 }
 0x122   : > { %979 = vst [vmem:[#allocation2 + $0xe1] sm:$0xff] %v8068_v26  ;;  %v862_v50 = vadd.f32 %v7939_v57, %v823_v44  ;;  %v1008_v51 = vld [vmem:[#allocation2 + $0xa8] sm:$0xff]  ;;  %v1009_v52 = vld [vmem:[#allocation2 + $0xb0] sm:$0xff]  ;;  %6879 = vmatprep.subr.bf16.mxu1 %v6878_v38 }
 0x123   : > { %978 = vst [vmem:[#allocation2 + $0xd9] sm:$0xff] %v8071_v48  ;;  %v861_v56 = vadd.f32 %v7939_v57, %v822_v49  ;;  %v5798_v61 = vpop.f32.mrb[20].mxu0  ;;  %5867 = vmatprep.mubr.f32.mxu0 %v1008_v51  ;;  %6104 = vmatprep.mubr.f32.mxu1 %v1008_v51 }
 0x124   : > { %v8084_v3 = vmax.f32 %v862_v50, 0.0  ;;  %v825_v46 = vmul.f32 %v5798_v61, %v7934_v55  ;;  %v738_v58 = vpop.f32.mrb[21].mxu0  ;;  %5868 = vmatmul.mubr.f32.gmra.mrb[46].mxu0 %v1009_v52  ;;  %6105 = vmatmul.mubr.f32.gmra.mrb[12].mxu1 %v1009_v52 }
 0x125   : > { %v8087_v60 = vmax.f32 %v861_v56, 0.0  ;;  %v824_v63 = vmul.f32 %v7934_v55, %v738_v58  ;;  %6881 = vmatpush3.bf16.msra.mxu1 %v6878_v38 }
 0x126   : > { %981 = vst [vmem:[#allocation2 + $0xf9] sm:$0xff] %v8084_v3  ;;  %v864_v0 = vadd.f32 %v7939_v57, %v825_v46  ;;  %v1010_v1 = vld [vmem:[#allocation2 + $0xc0] sm:$0xff]  ;;  %v1011_v12 = vld [vmem:[#allocation2 + $0xc8] sm:$0xff]  ;;  %6883 = vmatprep.subr.bf16.mxu1 %v6882_v53 }
 0x127   : > { %980 = vst [vmem:[#allocation2 + $0xf1] sm:$0xff] %v8087_v60  ;;  %v863_v8 = vadd.f32 %v7939_v57, %v824_v63  ;;  %v5801_v11 = vpop.f32.mrb[22].mxu0  ;;  %5870 = vmatprep.mubr.f32.mxu0 %v1010_v1  ;;  %6107 = vmatprep.mubr.f32.mxu1 %v1010_v1 }
 0x128   : > { %v8096_v14 = vmax.f32 %v864_v0, 0.0  ;;  %v827_v16 = vmul.f32 %v5801_v11, %v7934_v55  ;;  %v748_v18 = vpop.f32.mrb[23].mxu0  ;;  %5871 = vmatmul.mubr.f32.gmra.mrb[48].mxu0 %v1011_v12  ;;  %6108 = vmatmul.mubr.f32.gmra.mrb[14].mxu1 %v1011_v12 }
 0x129   : > { %v8099_v19 = vmax.f32 %v863_v8, 0.0  ;;  %v826_v21 = vmul.f32 %v7934_v55, %v748_v18  ;;  %6885 = vmatpush3.bf16.msra.mxu1 %v6882_v53 }
 0x12a   : > { %983 = vst [vmem:[#allocation2 + $0x111] sm:$0xff] %v8096_v14  ;;  %v866_v22 = vadd.f32 %v7939_v57, %v827_v16  ;;  %v1012_v23 = vld [vmem:[#allocation2 + $0xd8] sm:$0xff]  ;;  %v1013_v24 = vld [vmem:[#allocation2 + $0xe0] sm:$0xff]  ;;  %6887 = vmatprep.subr.bf16.mxu1 %v8092_v5 }
 0x12b   : > { %982 = vst [vmem:[#allocation2 + $0x109] sm:$0xff] %v8099_v19  ;;  %v865_v25 = vadd.f32 %v7939_v57, %v826_v21  ;;  %v5804_v27 = vpop.f32.mrb[24].mxu0  ;;  %5873 = vmatprep.mubr.f32.mxu0 %v1012_v23  ;;  %6110 = vmatprep.mubr.f32.mxu1 %v1012_v23 }
 0x12c   : > { %v8107_v29 = vmax.f32 %v866_v22, 0.0  ;;  %v829_v30 = vmul.f32 %v5804_v27, %v7934_v55  ;;  %v758_v33 = vpop.f32.mrb[25].mxu0  ;;  %5874 = vmatmul.mubr.f32.gmra.mrb[50].mxu0 %v1013_v24  ;;  %6111 = vmatmul.mubr.f32.gmra.mrb[16].mxu1 %v1013_v24 }
 0x12d   : > { %v8110_v35 = vmax.f32 %v865_v25, 0.0  ;;  %v828_v36 = vmul.f32 %v7934_v55, %v758_v33 }
 0x12e   : > { %985 = vst [vmem:[#allocation2 + $0x129] sm:$0xff] %v8107_v29  ;;  %v868_v37 = vadd.f32 %v7939_v57, %v829_v30  ;;  %v1014_v38 = vld [vmem:[#allocation2 + $0xf0] sm:$0xff]  ;;  %v1015_v39 = vld [vmem:[#allocation2 + $0xf8] sm:$0xff] }
 0x12f   : > { %984 = vst [vmem:[#allocation2 + $0x121] sm:$0xff] %v8110_v35  ;;  %v867_v40 = vadd.f32 %v7939_v57, %v828_v36  ;;  %v5807_v41 = vpop.f32.mrb[26].mxu0  ;;  %5876 = vmatprep.mubr.f32.mxu0 %v1014_v38  ;;  %6113 = vmatprep.mubr.f32.mxu1 %v1014_v38 }
 0x130   : > { %v8117_v42 = vmax.f32 %v868_v37, 0.0  ;;  %v831_v44 = vmul.f32 %v5807_v41, %v7934_v55  ;;  %v768_v45 = vpop.f32.mrb[27].mxu0  ;;  %5877 = vmatmul.mubr.f32.gmra.mrb[52].mxu0 %v1015_v39  ;;  %6114 = vmatmul.mubr.f32.gmra.mrb[18].mxu1 %v1015_v39  ;;  %v1299_v39 = vld [vmem:[#allocation2 + $0x1] sm:$0xff]  ;;  %v5042_v41 = vld [vmem:[%s9030_s6 + $0x118] sm:$0xff] }
 0x131   : > { %v8120_v49 = vmax.f32 %v867_v40, 0.0  ;;  %v830_v50 = vmul.f32 %v7934_v55, %v768_v45  ;;  %v5041_v40 = vld [vmem:[%s9030_s6 + $0x110] sm:$0xff] }
 0x132   : > { %987 = vst [vmem:[#allocation2 + $0x141] sm:$0xff] %v8117_v42  ;;  %v870_v51 = vadd.f32 %v7939_v57, %v831_v44  ;;  %v1016_v52 = vld [vmem:[#allocation2 + $0x108] sm:$0xff]  ;;  %v1017_v53 = vld [vmem:[#allocation2 + $0x110] sm:$0xff] }
 0x133   : > { %986 = vst [vmem:[#allocation2 + $0x139] sm:$0xff] %v8120_v49  ;;  %v869_v56 = vadd.f32 %v7939_v57, %v830_v50  ;;  %v5810_v61 = vpop.f32.mrb[28].mxu0  ;;  %5879 = vmatprep.mubr.f32.mxu0 %v1016_v52  ;;  %6116 = vmatprep.mubr.f32.mxu1 %v1016_v52  ;;  %v1300_v44 = vld [vmem:[#allocation2 + $0x9] sm:$0xff]  ;;  %v5090_v52 = vld [vmem:[%s9030_s6 + $0x298] sm:$0xff] }
 0x134   : > { %v8127_v62 = vmax.f32 %v870_v51, 0.0  ;;  %v833_v2 = vmul.f32 %v5810_v61, %v7934_v55  ;;  %v778_v46 = vpop.f32.mrb[29].mxu0  ;;  %5880 = vmatmul.mubr.f32.gmra.mrb[54].mxu0 %v1017_v53  ;;  %6117 = vmatmul.mubr.f32.gmra.mrb[20].mxu1 %v1017_v53  ;;  %v5089_v51 = vld [vmem:[%s9030_s6 + $0x290] sm:$0xff]  ;;  %v6794_v53 = vpack.c.bf16 %v5042_v41, %v5041_v40  ;;  %v5043_v61 = vld [vmem:[%s9030_s6 + $0x120] sm:$0xff]  ;;  %v5050_v40 = vld [vmem:[%s9030_s6 + $0x158] sm:$0xff] }
 0x135   : > { %v8130_v58 = vmax.f32 %v869_v56, 0.0  ;;  %v832_v63 = vmul.f32 %v7934_v55, %v778_v46  ;;  %v6890_v56 = vpack.c.bf16 %v5090_v52, %v5089_v51  ;;  %v5098_v41 = vld [vmem:[%s9030_s6 + $0x2d8] sm:$0xff]  ;;  %v5052_v52 = vld [vmem:[%s9030_s6 + $0x168] sm:$0xff] }
 0x136   : > { %989 = vst [vmem:[#allocation2 + $0x159] sm:$0xff] %v8127_v62  ;;  %v872_v0 = vadd.f32 %v7939_v57, %v833_v2  ;;  %v8135_v1 = vld [vmem:[#allocation2 + $0x120] sm:$0xff]  ;;  %v8137_v12 = vld [vmem:[#allocation2 + $0x128] sm:$0xff] }
 0x137   : > { %988 = vst [vmem:[#allocation2 + $0x151] sm:$0xff] %v8130_v58  ;;  %v871_v8 = vadd.f32 %v7939_v57, %v832_v63  ;;  %v5813_v11 = vpop.f32.mrb[30].mxu0  ;;  %5882 = vmatprep.mubr.f32.mxu0 %v8135_v1  ;;  %6119 = vmatprep.mubr.f32.mxu1 %v8135_v1  ;;  %v5044_v2 = vld [vmem:[%s9030_s6 + $0x128] sm:$0xff] }
 0x138   : > { %v8143_v16 = vmax.f32 %v872_v0, 0.0  ;;  %v835_v18 = vmul.f32 %v5813_v11, %v7934_v55  ;;  %v788_v21 = vpop.f32.mrb[31].mxu0  ;;  %5883 = vmatmul.mubr.f32.gmra.mrb[56].mxu0 %v8137_v12  ;;  %6120 = vmatmul.mubr.f32.gmra.mrb[22].mxu1 %v8137_v12  ;;  %v6798_v46 = vpack.c.bf16 %v5044_v2, %v5043_v61  ;;  %v5046_v0 = vld [vmem:[%s9030_s6 + $0x138] sm:$0xff] }
 0x139   : > { %v8148_v22 = vmax.f32 %v871_v8, 0.0  ;;  %v834_v23 = vmul.f32 %v7934_v55, %v788_v21  ;;  %v5096_v21 = vld [vmem:[%s9030_s6 + $0x2c8] sm:$0xff]  ;;  %v5054_v2 = vld [vmem:[%s9030_s6 + $0x178] sm:$0xff] }
 0x13a   : > { %991 = vst [vmem:[#allocation2 + $0x171] sm:$0xff] %v8143_v16  ;;  %v8153_v24 = vadd.f32 %v7939_v57, %v835_v18  ;;  %v8155_v25 = vld [vmem:[#allocation2 + $0x138] sm:$0xff]  ;;  %v8157_v27 = vld [vmem:[#allocation2 + $0x140] sm:$0xff]  ;;  %v5048_v18 = vld [vmem:[%s9030_s6 + $0x148] sm:$0xff] }
 0x13b   : > { %990 = vst [vmem:[#allocation2 + $0x169] sm:$0xff] %v8148_v22  ;;  %v8161_v30 = vadd.f32 %v7939_v57, %v834_v23  ;;  %5885 = vmatprep.mubr.f32.mxu0 %v8155_v25  ;;  %6122 = vmatprep.mubr.f32.mxu1 %v8155_v25 }
 0x13c   : > { %v906_v55 = vmax.f32 %v8153_v24, 0.0  ;;  %5886 = vmatmul.mubr.f32.gmra.mrb[58].mxu0 %v8157_v27  ;;  %6123 = vmatmul.mubr.f32.gmra.mrb[24].mxu1 %v8157_v27  ;;  %v8385_v24 = vld [vmem:[#allocation2 + $0x62] sm:$0xff] }
 0x13d   : > { %v905_v33 = vmax.f32 %v8161_v30, 0.0  ;;  %v5111_v30 = vld [vmem:[%s9030_s6 + $0x340] sm:$0xff] }
 0x13e   : > { %993 = vst [vmem:[#allocation2 + $0x189] sm:$0xff] %v906_v55  ;;  %v8171_v36 = vld [vmem:[#allocation2 + $0x150] sm:$0xff]  ;;  %v8173_v37 = vld [vmem:[#allocation2 + $0x158] sm:$0xff] }
 0x13f   : > { %992 = vst [vmem:[#allocation2 + $0x181] sm:$0xff] %v905_v33  ;;  %5888 = vmatprep.mubr.f32.mxu0 %v8171_v36  ;;  %6125 = vmatprep.mubr.f32.mxu1 %v8171_v36 }
 0x140   : > { %5889 = vmatmul.mubr.f32.gmra.mrb[60].mxu0 %v8173_v37  ;;  %6126 = vmatmul.mubr.f32.gmra.mrb[26].mxu1 %v8173_v37 }
 0x142   : > { %v8181_v57 = vld [vmem:[#allocation2 + $0x168] sm:$0xff]  ;;  %v8183_v38 = vld [vmem:[#allocation2 + $0x170] sm:$0xff] }
 0x143   : > { %5891 = vmatprep.mubr.f32.mxu0 %v8181_v57  ;;  %6128 = vmatprep.mubr.f32.mxu1 %v8181_v57 }
 0x144   : > { %5892 = vmatmul.mubr.f32.gmra.mrb[62].mxu0 %v8183_v38  ;;  %6129 = vmatmul.mubr.f32.gmra.mrb[28].mxu1 %v8183_v38 }
 0x145   : > { %5926 = vmatprep.mubr.f32.mxu0 %v1299_v39 }
 0x146   : > { %v8195_v45 = vld [vmem:[#allocation2 + $0x180] sm:$0xff]  ;;  %v8197_v50 = vld [vmem:[#allocation2 + $0x188] sm:$0xff] }
 0x147   : > { %6131 = vmatprep.mubr.f32.mxu1 %v8195_v45 }
 0x148   : > { %5927 = vmatmul.mubr.f32.vlgmr.msra.gmra.mrb[32].mxu0 %v1300_v44  ;;  %6132 = vmatmul.mubr.f32.gmra.mrb[30].mxu1 %v8197_v50 }
 0x149   : > { %5929 = vmatprep.mubr.f32.mxu0 %v7948_v59  ;;  %6166 = vmatprep.mubr.f32.mxu1 %v7948_v59  ;;  %v5091_v59 = vld [vmem:[%s9030_s6 + $0x2a0] sm:$0xff] }
 0x14a   : > { %6793 = vmatpush3.bf16.msra.mxu0 %v7928_v54  ;;  %v5092_v54 = vld [vmem:[%s9030_s6 + $0x2a8] sm:$0xff] }
 0x14b   : > { %6795 = vmatprep.subr.bf16.mxu0 %v6794_v53  ;;  %v6894_v63 = vpack.c.bf16 %v5092_v54, %v5091_v59  ;;  %v5102_v59 = vld [vmem:[%s9030_s6 + $0x2f8] sm:$0xff] }
 0x14c   : > { %5930 = vmatmul.mubr.f32.gmra.mrb[34].mxu0 %v7945_v4  ;;  %6167 = vmatmul.mubr.f32.vlgmr.msra.gmra.mrb[0].mxu1 %v7945_v4  ;;  %v5045_v4 = vld [vmem:[%s9030_s6 + $0x130] sm:$0xff] }
 0x14d   : > { %6889 = vmatpush3.bf16.msra.mxu1 %v8092_v5  ;;  %5932 = vmatprep.mubr.f32.mxu0 %v7958_v6  ;;  %v5094_v5 = vld [vmem:[%s9030_s6 + $0x2b8] sm:$0xff]  ;;  %v6802_v8 = vpack.c.bf16 %v5046_v0, %v5045_v4 }
 0x14e   : > { %6169 = vmatprep.mubr.f32.mxu1 %v7958_v6  ;;  %6891 = vmatprep.subr.bf16.mxu1 %v6890_v56  ;;  %v5093_v6 = vld [vmem:[%s9030_s6 + $0x2b0] sm:$0xff]  ;;  %v8399_v0 = vld [vmem:[#allocation2 + $0x7a] sm:$0xff] }
 0x14f   : > { %6797 = vmatpush3.bf16.msra.mxu0 %v6794_v53  ;;  %v6898_v11 = vpack.c.bf16 %v5094_v5, %v5093_v6  ;;  %v5100_v53 = vld [vmem:[%s9030_s6 + $0x2e8] sm:$0xff]  ;;  %v5113_v6 = vld [vmem:[%s9030_s6 + $0x350] sm:$0xff]  ;;  %v5114_v5 = vld [vmem:[%s9030_s6 + $0x358] sm:$0xff] }
 0x150   : > { %5933 = vmatmul.mubr.f32.gmra.mrb[36].mxu0 %v7955_v7  ;;  %6170 = vmatmul.mubr.f32.gmra.mrb[2].mxu1 %v7955_v7  ;;  %v5047_v7 = vld [vmem:[%s9030_s6 + $0x140] sm:$0xff] }
 0x151   : > { %5935 = vmatprep.mubr.f32.mxu0 %v7974_v20  ;;  %6172 = vmatprep.mubr.f32.mxu1 %v7974_v20  ;;  %v5095_v20 = vld [vmem:[%s9030_s6 + $0x2c0] sm:$0xff]  ;;  %v6806_v23 = vpack.c.bf16 %v5048_v18, %v5047_v7  ;;  %v8413_v7 = vld [vmem:[#allocation2 + $0x92] sm:$0xff] }
 0x152   : > { %6893 = vmatpush3.bf16.msra.mxu1 %v6890_v56  ;;  %6799 = vmatprep.subr.bf16.mxu0 %v6798_v46  ;;  %v6902_v39 = vpack.c.bf16 %v5096_v21, %v5095_v20  ;;  %v5115_v18 = vld [vmem:[%s9030_s6 + $0x360] sm:$0xff]  ;;  %v5116_v20 = vld [vmem:[%s9030_s6 + $0x368] sm:$0xff] }
 0x153   : > { %6895 = vmatprep.subr.bf16.mxu1 %v6894_v63  ;;  %6801 = vmatpush3.bf16.msra.mxu0 %v6798_v46  ;;  %v8423_v21 = vld [vmem:[#allocation2 + $0x9a] sm:$0xff] }
 0x154   : > { %5936 = vmatmul.mubr.f32.gmra.mrb[38].mxu0 %v7971_v17  ;;  %6173 = vmatmul.mubr.f32.gmra.mrb[4].mxu1 %v7971_v17  ;;  %v5049_v17 = vld [vmem:[%s9030_s6 + $0x150] sm:$0xff] }
 0x155   : > { %5938 = vmatprep.mubr.f32.mxu0 %v7990_v34  ;;  %6175 = vmatprep.mubr.f32.mxu1 %v7990_v34  ;;  %v5097_v34 = vld [vmem:[%s9030_s6 + $0x2d0] sm:$0xff]  ;;  %v6810_v44 = vpack.c.bf16 %v5050_v40, %v5049_v17  ;;  %v5118_v40 = vld [vmem:[%s9030_s6 + $0x378] sm:$0xff] }
 0x156   : > { %6897 = vmatpush3.bf16.msra.mxu1 %v6894_v63  ;;  %6803 = vmatprep.subr.bf16.mxu0 %v6802_v8  ;;  %v6906_v51 = vpack.c.bf16 %v5098_v41, %v5097_v34  ;;  %v5104_v63 = vld [vmem:[%s9030_s6 + $0x308] sm:$0xff]  ;;  %v5117_v17 = vld [vmem:[%s9030_s6 + $0x370] sm:$0xff] }
 0x157   : > { %6899 = vmatprep.subr.bf16.mxu1 %v6898_v11  ;;  %6805 = vmatpush3.bf16.msra.mxu0 %v6802_v8  ;;  %v8409_v8 = vld [vmem:[#allocation2 + $0x82] sm:$0xff]  ;;  %v8437_v34 = vld [vmem:[#allocation2 + $0xb2] sm:$0xff]  ;;  %v6946_v41 = vpack.c.bf16 %v5118_v40, %v5117_v17 }
 0x158   : > { %5939 = vmatmul.mubr.f32.gmra.mrb[40].mxu0 %v7987_v31  ;;  %6176 = vmatmul.mubr.f32.gmra.mrb[6].mxu1 %v7987_v31  ;;  %v5051_v31 = vld [vmem:[%s9030_s6 + $0x160] sm:$0xff] }
 0x159   : > { %5941 = vmatprep.mubr.f32.mxu0 %v8007_v47  ;;  %6178 = vmatprep.mubr.f32.mxu1 %v8007_v47  ;;  %v5099_v47 = vld [vmem:[%s9030_s6 + $0x2e0] sm:$0xff]  ;;  %v6814_v56 = vpack.c.bf16 %v5052_v52, %v5051_v31  ;;  %v5120_v31 = vld [vmem:[%s9030_s6 + $0x388] sm:$0xff] }
 0x15a   : > { %6901 = vmatpush3.bf16.msra.mxu1 %v6898_v11  ;;  %6807 = vmatprep.subr.bf16.mxu0 %v6806_v23  ;;  %v6910_v61 = vpack.c.bf16 %v5100_v53, %v5099_v47  ;;  %v6938_v11 = vpack.c.bf16 %v5114_v5, %v5113_v6  ;;  %v8451_v52 = vld [vmem:[#allocation2 + $0xca] sm:$0xff]  ;;  %v8455_v53 = vld [vmem:[#allocation2 + $0xda] sm:$0xff] }
 0x15b   : > { %6903 = vmatprep.subr.bf16.mxu1 %v6902_v39  ;;  %6809 = vmatpush3.bf16.msra.mxu0 %v6806_v23  ;;  %v6942_v23 = vpack.c.bf16 %v5116_v20, %v5115_v18  ;;  %v3154_v6 = vld [vmem:[#allocation2 + $0x60] sm:$0xff]  ;;  %v5128_v20 = vld [vmem:[%s9030_s6 + $0x3c8] sm:$0xff] }
 0x15c   : > { %5942 = vmatmul.mubr.f32.gmra.mrb[42].mxu0 %v8004_v43  ;;  %6179 = vmatmul.mubr.f32.gmra.mrb[8].mxu1 %v8004_v43  ;;  %v5053_v43 = vld [vmem:[%s9030_s6 + $0x170] sm:$0xff]  ;;  %v5127_v18 = vld [vmem:[%s9030_s6 + $0x3c0] sm:$0xff] }
 0x15d   : > { %5944 = vmatprep.mubr.f32.mxu0 %v8023_v13  ;;  %6181 = vmatprep.mubr.f32.mxu1 %v8023_v13  ;;  %v5101_v13 = vld [vmem:[%s9030_s6 + $0x2f0] sm:$0xff]  ;;  %v6818_v54 = vpack.c.bf16 %v5054_v2, %v5053_v43  ;;  %v8467_v43 = vld [vmem:[#allocation2 + $0xfa] sm:$0xff]  ;;  %v6966_v17 = vpack.c.bf16 %v5128_v20, %v5127_v18 }
 0x15e   : > { %6905 = vmatpush3.bf16.msra.mxu1 %v6902_v39  ;;  %6811 = vmatprep.subr.bf16.mxu0 %v6810_v44  ;;  %v6914_v46 = vpack.c.bf16 %v5102_v59, %v5101_v13  ;;  %v8427_v39 = vld [vmem:[#allocation2 + $0xaa] sm:$0xff]  ;;  %v8475_v13 = vld [vmem:[#allocation2 + $0x112] sm:$0xff]  ;;  %v8479_v59 = vld [vmem:[#allocation2 + $0x122] sm:$0xff] }
 0x15f   : > { %6907 = vmatprep.subr.bf16.mxu1 %v6906_v51  ;;  %6813 = vmatpush3.bf16.msra.mxu0 %v6810_v44  ;;  %v8441_v44 = vld [vmem:[#allocation2 + $0xc2] sm:$0xff]  ;;  %v8471_v2 = vld [vmem:[#allocation2 + $0x10a] sm:$0xff] }
 0x160   : > { %5945 = vmatmul.mubr.f32.gmra.mrb[44].mxu0 %v8020_v10  ;;  %6182 = vmatmul.mubr.f32.gmra.mrb[10].mxu1 %v8020_v10  ;;  %v5103_v10 = vld [vmem:[%s9030_s6 + $0x300] sm:$0xff]  ;;  %v3166_v20 = vld [vmem:[#allocation2 + $0xf0] sm:$0xff] }
 0x161   : > { %5947 = vmatprep.mubr.f32.mxu0 %v8039_v15  ;;  %6184 = vmatprep.mubr.f32.mxu1 %v8039_v15  ;;  %v6918_v15 = vpack.c.bf16 %v5104_v63, %v5103_v10  ;;  %v8491_v10 = vld [vmem:[#allocation2 + $0x142] sm:$0xff]  ;;  %v8495_v63 = vld [vmem:[#allocation2 + $0x152] sm:$0xff] }
 0x162   : > { %6909 = vmatpush3.bf16.msra.mxu1 %v6906_v51  ;;  %6815 = vmatprep.subr.bf16.mxu0 %v6814_v56  ;;  %v5119_v51 = vld [vmem:[%s9030_s6 + $0x380] sm:$0xff] }
 0x163   : > { %6911 = vmatprep.subr.bf16.mxu1 %v6910_v61  ;;  %6817 = vmatpush3.bf16.msra.mxu0 %v6814_v56  ;;  %v6950_v47 = vpack.c.bf16 %v5120_v31, %v5119_v51  ;;  %v8459_v56 = vld [vmem:[#allocation2 + $0xe2] sm:$0xff]  ;;  %v5130_v51 = vld [vmem:[%s9030_s6 + $0x3d8] sm:$0xff]  ;;  %v3158_v31 = vld [vmem:[#allocation2 + $0x90] sm:$0xff] }
 0x164   : > { %5948 = vmatmul.mubr.f32.gmra.mrb[46].mxu0 %v8036_v9  ;;  %6185 = vmatmul.mubr.f32.gmra.mrb[12].mxu1 %v8036_v9  ;;  %v1669_v9 = vld [vmem:[#allocation2 + $0x2] sm:$0xff] }
 0x165   : > { %5950 = vmatprep.mubr.f32.mxu0 %v8055_v32  ;;  %6187 = vmatprep.mubr.f32.mxu1 %v8055_v32  ;;  %v5105_v32 = vld [vmem:[%s9030_s6 + $0x310] sm:$0xff]  ;;  %v3157_v40 = vld [vmem:[#allocation2 + $0x80] sm:$0xff] }
 0x166   : > { %6913 = vmatpush3.bf16.msra.mxu1 %v6910_v61  ;;  %6819 = vmatprep.subr.bf16.mxu0 %v6818_v54  ;;  %v8463_v61 = vld [vmem:[#allocation2 + $0xf2] sm:$0xff]  ;;  %v3165_v18 = vld [vmem:[#allocation2 + $0xe0] sm:$0xff] }
 0x167   : > { %6915 = vmatprep.subr.bf16.mxu1 %v6914_v46  ;;  %6821 = vmatpush3.bf16.msra.mxu0 %v6818_v54  ;;  %v8483_v54 = vld [vmem:[#allocation2 + $0x12a] sm:$0xff] }
 0x168   : > { %5951 = vmatmul.mubr.f32.gmra.mrb[48].mxu0 %v8052_v28  ;;  %6188 = vmatmul.mubr.f32.gmra.mrb[14].mxu1 %v8052_v28  ;;  %v1670_v28 = vld [vmem:[#allocation2 + $0xa] sm:$0xff] }
 0x169   : > { %5953 = vmatprep.mubr.f32.mxu0 %v8071_v48  ;;  %6190 = vmatprep.mubr.f32.mxu1 %v8071_v48  ;;  %v1671_v48 = vld [vmem:[#allocation2 + $0x1a] sm:$0xff] }
 0x16a   : > { %6917 = vmatpush3.bf16.msra.mxu1 %v6914_v46  ;;  %v8487_v46 = vld [vmem:[#allocation2 + $0x13a] sm:$0xff] }
 0x16b   : > { %6919 = vmatprep.subr.bf16.mxu1 %v6918_v15 }
 0x16c   : > { %5954 = vmatmul.mubr.f32.gmra.mrb[50].mxu0 %v8068_v26  ;;  %6191 = vmatmul.mubr.f32.gmra.mrb[16].mxu1 %v8068_v26  ;;  %v5106_v26 = vld [vmem:[%s9030_s6 + $0x318] sm:$0xff] }
 0x16d   : > { %5956 = vmatprep.mubr.f32.mxu0 %v8087_v60  ;;  %6193 = vmatprep.mubr.f32.mxu1 %v8087_v60  ;;  %v1672_v60 = vld [vmem:[#allocation2 + $0x22] sm:$0xff] }
 0x170   : > { %5957 = vmatmul.mubr.f32.gmra.mrb[52].mxu0 %v8084_v3  ;;  %6194 = vmatmul.mubr.f32.gmra.mrb[18].mxu1 %v8084_v3  ;;  %v6922_v3 = vpack.c.bf16 %v5106_v26, %v5105_v32  ;;  %v8511_v32 = vld [vmem:[#allocation2 + $0x182] sm:$0xff]  ;;  %v8514_v26 = vld [vmem:[#allocation2 + $0x18a] sm:$0xff] }
 0x171   : > { %5959 = vmatprep.mubr.f32.mxu0 %v8099_v19  ;;  %6196 = vmatprep.mubr.f32.mxu1 %v8099_v19  ;;  %v5107_v19 = vld [vmem:[%s9030_s6 + $0x320] sm:$0xff] }
 0x174   : > { %5960 = vmatmul.mubr.f32.gmra.mrb[54].mxu0 %v8096_v14  ;;  %6197 = vmatmul.mubr.f32.gmra.mrb[20].mxu1 %v8096_v14  ;;  %v8357_v14 = vld [vmem:[#allocation2 + $0x32] sm:$0xff] }
 0x175   : > { %5962 = vmatprep.mubr.f32.mxu0 %v8110_v35  ;;  %6199 = vmatprep.mubr.f32.mxu1 %v8110_v35  ;;  %v8367_v35 = vld [vmem:[#allocation2 + $0x3a] sm:$0xff] }
 0x178   : > { %5963 = vmatmul.mubr.f32.gmra.mrb[56].mxu0 %v8107_v29  ;;  %6200 = vmatmul.mubr.f32.gmra.mrb[22].mxu1 %v8107_v29  ;;  %v5108_v29 = vld [vmem:[%s9030_s6 + $0x328] sm:$0xff] }
 0x179   : > { %5965 = vmatprep.mubr.f32.mxu0 %v8120_v49  ;;  %6202 = vmatprep.mubr.f32.mxu1 %v8120_v49  ;;  %v8371_v49 = vld [vmem:[#allocation2 + $0x4a] sm:$0xff] }
 0x17c   : > { %5966 = vmatmul.mubr.f32.gmra.mrb[58].mxu0 %v8117_v42  ;;  %6203 = vmatmul.mubr.f32.gmra.mrb[24].mxu1 %v8117_v42  ;;  %v6926_v42 = vpack.c.bf16 %v5108_v29, %v5107_v19  ;;  %v3151_v29 = vld [vmem:[#allocation2 + $0x38] sm:$0xff] }
 0x17d   : > { %5968 = vmatprep.mubr.f32.mxu0 %v8130_v58  ;;  %6205 = vmatprep.mubr.f32.mxu1 %v8130_v58  ;;  %v5110_v58 = vld [vmem:[%s9030_s6 + $0x338] sm:$0xff] }
 0x180   : > { %5969 = vmatmul.mubr.f32.gmra.mrb[60].mxu0 %v8127_v62  ;;  %6206 = vmatmul.mubr.f32.gmra.mrb[26].mxu1 %v8127_v62  ;;  %v5109_v62 = vld [vmem:[%s9030_s6 + $0x330] sm:$0xff] }
 0x181   : > { %5971 = vmatprep.mubr.f32.mxu0 %v8148_v22  ;;  %6208 = vmatprep.mubr.f32.mxu1 %v8148_v22  ;;  %v6930_v22 = vpack.c.bf16 %v5110_v58, %v5109_v62  ;;  %v5124_v62 = vld [vmem:[%s9030_s6 + $0x3a8] sm:$0xff] }
 0x182   : > { %v3152_v58 = vld [vmem:[#allocation2 + $0x48] sm:$0xff] }
 0x184   : > { %5972 = vmatmul.mubr.f32.gmra.mrb[62].mxu0 %v8143_v16  ;;  %6209 = vmatmul.mubr.f32.gmra.mrb[28].mxu1 %v8143_v16  ;;  %v8381_v16 = vld [vmem:[#allocation2 + $0x52] sm:$0xff] }
 0x185   : > { %6211 = vmatprep.mubr.f32.mxu1 %v905_v33  ;;  %6006 = vmatprep.mubr.f32.mxu0 %v1669_v9  ;;  %v8395_v33 = vld [vmem:[#allocation2 + $0x6a] sm:$0xff] }
 0x186   : > { %v8503_v9 = vld [vmem:[#allocation2 + $0x16a] sm:$0xff] }
 0x188   : > { %6007 = vmatmul.mubr.f32.vlgmr.msra.gmra.mrb[32].mxu0 %v1670_v28  ;;  %6212 = vmatmul.mubr.f32.gmra.mrb[30].mxu1 %v906_v55  ;;  %v5112_v55 = vld [vmem:[%s9030_s6 + $0x348] sm:$0xff]  ;;  %v8507_v28 = vld [vmem:[#allocation2 + $0x172] sm:$0xff] }
 0x189   : > { %6009 = vmatprep.mubr.f32.mxu0 %v1671_v48  ;;  %6246 = vmatprep.mubr.f32.mxu1 %v1671_v48  ;;  %v6934_v4 = vpack.c.bf16 %v5112_v55, %v5111_v30  ;;  %v5121_v48 = vld [vmem:[%s9030_s6 + $0x390] sm:$0xff] }
 0x18a   : > { %v3153_v30 = vld [vmem:[#allocation2 + $0x50] sm:$0xff] }
 0x18b   : > { %v5125_v55 = vld [vmem:[%s9030_s6 + $0x3b0] sm:$0xff] }
 0x18c   : > { %6010 = vmatmul.mubr.f32.gmra.mrb[34].mxu0 %v1672_v60  ;;  %6247 = vmatmul.mubr.f32.vlgmr.msra.gmra.mrb[0].mxu1 %v1672_v60  ;;  %v3150_v60 = vld [vmem:[#allocation2 + $0x30] sm:$0xff] }
 0x18d   : > { %6921 = vmatpush3.bf16.msra.mxu1 %v6918_v15  ;;  %6012 = vmatprep.mubr.f32.mxu0 %v8357_v14  ;;  %v8499_v15 = vld [vmem:[#allocation2 + $0x15a] sm:$0xff] }
 0x18e   : > { %6249 = vmatprep.mubr.f32.mxu1 %v8357_v14  ;;  %6923 = vmatprep.subr.bf16.mxu1 %v6922_v3 }
 0x190   : > { %6013 = vmatmul.mubr.f32.gmra.mrb[36].mxu0 %v8367_v35  ;;  %6250 = vmatmul.mubr.f32.gmra.mrb[2].mxu1 %v8367_v35 }
 0x191   : > { %6015 = vmatprep.mubr.f32.mxu0 %v8371_v49  ;;  %6252 = vmatprep.mubr.f32.mxu1 %v8371_v49 }
 0x192   : > { %6925 = vmatpush3.bf16.msra.mxu1 %v6922_v3  ;;  %v5122_v3 = vld [vmem:[%s9030_s6 + $0x398] sm:$0xff] }
 0x193   : > { %6927 = vmatprep.subr.bf16.mxu1 %v6926_v42  ;;  %v6954_v19 = vpack.c.bf16 %v5122_v3, %v5121_v48  ;;  %v3159_v48 = vld [vmem:[#allocation2 + $0x98] sm:$0xff]  ;;  %v5131_v3 = vld [vmem:[%s9030_s6 + $0x3e0] sm:$0xff] }
 0x194   : > { %6016 = vmatmul.mubr.f32.gmra.mrb[38].mxu0 %v8381_v16  ;;  %6253 = vmatmul.mubr.f32.gmra.mrb[4].mxu1 %v8381_v16 }
 0x195   : > { %6018 = vmatprep.mubr.f32.mxu0 %v8385_v24  ;;  %6255 = vmatprep.mubr.f32.mxu1 %v8385_v24 }
 0x196   : > { %6929 = vmatpush3.bf16.msra.mxu1 %v6926_v42  ;;  %v5123_v42 = vld [vmem:[%s9030_s6 + $0x3a0] sm:$0xff] }
 0x197   : > { %6931 = vmatprep.subr.bf16.mxu1 %v6930_v22 }
 0x198   : > { %6019 = vmatmul.mubr.f32.gmra.mrb[40].mxu0 %v8395_v33  ;;  %6256 = vmatmul.mubr.f32.gmra.mrb[6].mxu1 %v8395_v33 }
 0x199   : > { %6021 = vmatprep.mubr.f32.mxu0 %v8399_v0  ;;  %6258 = vmatprep.mubr.f32.mxu1 %v8399_v0 }
 0x19a   : > { %6933 = vmatpush3.bf16.msra.mxu1 %v6930_v22  ;;  %v6958_v22 = vpack.c.bf16 %v5124_v62, %v5123_v42  ;;  %v3161_v42 = vld [vmem:[#allocation2 + $0xb0] sm:$0xff] }
 0x19b   : > { %6935 = vmatprep.subr.bf16.mxu1 %v6934_v4  ;;  %v5133_v62 = vld [vmem:[%s9030_s6 + $0x3f0] sm:$0xff] }
 0x19c   : > { %6022 = vmatmul.mubr.f32.gmra.mrb[42].mxu0 %v8409_v8  ;;  %6259 = vmatmul.mubr.f32.gmra.mrb[8].mxu1 %v8409_v8 }
 0x19d   : > { %6024 = vmatprep.mubr.f32.mxu0 %v8413_v7  ;;  %6261 = vmatprep.mubr.f32.mxu1 %v8413_v7 }
 0x19e   : > { %6937 = vmatpush3.bf16.msra.mxu1 %v6934_v4  ;;  %v5126_v4 = vld [vmem:[%s9030_s6 + $0x3b8] sm:$0xff] }
 0x19f   : > { %6939 = vmatprep.subr.bf16.mxu1 %v6938_v11  ;;  %v6962_v5 = vpack.c.bf16 %v5126_v4, %v5125_v55  ;;  %v3163_v55 = vld [vmem:[#allocation2 + $0xc8] sm:$0xff]  ;;  %v5135_v4 = vld [vmem:[%s9030_s6 + $0x400] sm:$0xff] }
 0x1a0   : > { %6025 = vmatmul.mubr.f32.gmra.mrb[44].mxu0 %v8423_v21  ;;  %6262 = vmatmul.mubr.f32.gmra.mrb[10].mxu1 %v8423_v21 }
 0x1a1   : > { %6027 = vmatprep.mubr.f32.mxu0 %v8427_v39  ;;  %6264 = vmatprep.mubr.f32.mxu1 %v8427_v39 }
 0x1a2   : > { %6941 = vmatpush3.bf16.msra.mxu1 %v6938_v11  ;;  %v3155_v11 = vld [vmem:[#allocation2 + $0x68] sm:$0xff] }
 0x1a3   : > { %6943 = vmatprep.subr.bf16.mxu1 %v6942_v23 }
 0x1a4   : > { %6028 = vmatmul.mubr.f32.gmra.mrb[46].mxu0 %v8437_v34  ;;  %6265 = vmatmul.mubr.f32.gmra.mrb[12].mxu1 %v8437_v34 }
 0x1a5   : > { %6030 = vmatprep.mubr.f32.mxu0 %v8441_v44  ;;  %6267 = vmatprep.mubr.f32.mxu1 %v8441_v44 }
 0x1a6   : > { %6945 = vmatpush3.bf16.msra.mxu1 %v6942_v23  ;;  %v3156_v23 = vld [vmem:[#allocation2 + $0x78] sm:$0xff] }
 0x1a7   : > { %6947 = vmatprep.subr.bf16.mxu1 %v6946_v41 }
 0x1a8   : > { %6031 = vmatmul.mubr.f32.gmra.mrb[48].mxu0 %v8451_v52  ;;  %6268 = vmatmul.mubr.f32.gmra.mrb[14].mxu1 %v8451_v52 }
 0x1a9   : > { %6033 = vmatprep.mubr.f32.mxu0 %v8455_v53  ;;  %6270 = vmatprep.mubr.f32.mxu1 %v8455_v53 }
 0x1aa   : > { %6949 = vmatpush3.bf16.msra.mxu1 %v6946_v41  ;;  %v5129_v41 = vld [vmem:[%s9030_s6 + $0x3d0] sm:$0xff] }
 0x1ab   : > { %6951 = vmatprep.subr.bf16.mxu1 %v6950_v47 }
 0x1ac   : > { %6034 = vmatmul.mubr.f32.gmra.mrb[50].mxu0 %v8459_v56  ;;  %6271 = vmatmul.mubr.f32.gmra.mrb[16].mxu1 %v8459_v56 }
 0x1ad   : > { %6036 = vmatprep.mubr.f32.mxu0 %v8463_v61  ;;  %6273 = vmatprep.mubr.f32.mxu1 %v8463_v61 }
 0x1b0   : > { %6037 = vmatmul.mubr.f32.gmra.mrb[52].mxu0 %v8467_v43  ;;  %6274 = vmatmul.mubr.f32.gmra.mrb[18].mxu1 %v8467_v43 }
 0x1b1   : > { %6039 = vmatprep.mubr.f32.mxu0 %v8471_v2  ;;  %6276 = vmatprep.mubr.f32.mxu1 %v8471_v2 }
 0x1b4   : > { %6040 = vmatmul.mubr.f32.gmra.mrb[54].mxu0 %v8475_v13  ;;  %6277 = vmatmul.mubr.f32.gmra.mrb[20].mxu1 %v8475_v13 }
 0x1b5   : > { %6042 = vmatprep.mubr.f32.mxu0 %v8479_v59  ;;  %6279 = vmatprep.mubr.f32.mxu1 %v8479_v59 }
 0x1b8   : > { %6043 = vmatmul.mubr.f32.gmra.mrb[56].mxu0 %v8483_v54  ;;  %6280 = vmatmul.mubr.f32.gmra.mrb[22].mxu1 %v8483_v54 }
 0x1b9   : > { %6045 = vmatprep.mubr.f32.mxu0 %v8487_v46  ;;  %6282 = vmatprep.mubr.f32.mxu1 %v8487_v46 }
 0x1bc   : > { %6046 = vmatmul.mubr.f32.gmra.mrb[58].mxu0 %v8491_v10  ;;  %6283 = vmatmul.mubr.f32.gmra.mrb[24].mxu1 %v8491_v10 }
 0x1bd   : > { %6048 = vmatprep.mubr.f32.mxu0 %v8495_v63  ;;  %6285 = vmatprep.mubr.f32.mxu1 %v8495_v63 }
 0x1c0   : > { %6049 = vmatmul.mubr.f32.gmra.mrb[60].mxu0 %v8499_v15  ;;  %6286 = vmatmul.mubr.f32.gmra.mrb[26].mxu1 %v8499_v15 }
 0x1c1   : > { %6051 = vmatprep.mubr.f32.mxu0 %v8503_v9  ;;  %6288 = vmatprep.mubr.f32.mxu1 %v8503_v9 }
 0x1c4   : > { %6052 = vmatmul.mubr.f32.gmra.mrb[62].mxu0 %v8507_v28  ;;  %6289 = vmatmul.mubr.f32.gmra.mrb[28].mxu1 %v8507_v28 }
 0x1c5   : > { %6291 = vmatprep.mubr.f32.mxu1 %v8511_v32 }
 0x1c8   : > { %6292 = vmatmul.mubr.f32.gmra.mrb[30].mxu1 %v8514_v26 }
 0x1c9   : > { %6326 = vmatprep.mubr.f32.mxu1 %v3150_v60  ;;  %v5132_v60 = vld [vmem:[%s9030_s6 + $0x3e8] sm:$0xff] }
 0x1cc   : > { %6327 = vmatmul.mubr.f32.vlgmr.msra.gmra.mrb[0].mxu1 %v3151_v29  ;;  %v6974_v29 = vpack.c.bf16 %v5132_v60, %v5131_v3  ;;  %v3525_v3 = vld [vmem:[#allocation2 + $0x69] sm:$0xff]  ;;  %v5143_v60 = vld [vmem:[%s9030_s6 + $0x440] sm:$0xff] }
 0x1cd   : > { %6953 = vmatpush3.bf16.msra.mxu1 %v6950_v47  ;;  %6329 = vmatprep.mubr.f32.mxu1 %v3152_v58  ;;  %v6970_v47 = vpack.c.bf16 %v5130_v51, %v5129_v41  ;;  %v5134_v58 = vld [vmem:[%s9030_s6 + $0x3f8] sm:$0xff]  ;;  %v7407_v41 = vld [vmem:[#allocation2] sm:$0xff]  ;;  %v5141_v51 = vld [vmem:[%s9030_s6 + $0x430] sm:$0xff] }
 0x1ce   : > { %6955 = vmatprep.subr.bf16.mxu1 %v6954_v19 }
 0x1d0   : > { %6330 = vmatmul.mubr.f32.gmra.mrb[2].mxu1 %v3153_v30  ;;  %v6978_v30 = vpack.c.bf16 %v5134_v58, %v5133_v62  ;;  %v3528_v58 = vld [vmem:[#allocation2 + $0x91] sm:$0xff] }
 0x1d1   : > { %6332 = vmatprep.mubr.f32.mxu1 %v3154_v6  ;;  %6957 = vmatpush3.bf16.msra.mxu1 %v6954_v19  ;;  %v3160_v19 = vld [vmem:[#allocation2 + $0xa8] sm:$0xff] }
 0x1d2   : > { %6959 = vmatprep.subr.bf16.mxu1 %v6958_v22  ;;  %v5136_v6 = vld [vmem:[%s9030_s6 + $0x408] sm:$0xff] }
 0x1d4   : > { %6333 = vmatmul.mubr.f32.gmra.mrb[4].mxu1 %v3155_v11  ;;  %v6982_v11 = vpack.c.bf16 %v5136_v6, %v5135_v4  ;;  %v4403_v4 = vld [vmem:[%s9033_s9 + $0x8] sm:$0xff]  ;;  %v4404_v6 = vld [vmem:[%s9033_s9 + $0x10] sm:$0xff] }
 0x1d5   : > { %6335 = vmatprep.mubr.f32.mxu1 %v3156_v23  ;;  %6961 = vmatpush3.bf16.msra.mxu1 %v6958_v22  ;;  %v3162_v22 = vld [vmem:[#allocation2 + $0xc0] sm:$0xff]  ;;  %v3167_v23 = vld [vmem:[#allocation2 + $0xf8] sm:$0xff] }
 0x1d6   : > { %6963 = vmatprep.subr.bf16.mxu1 %v6962_v5 }
 0x1d8   : > { %6336 = vmatmul.mubr.f32.gmra.mrb[6].mxu1 %v3157_v40  ;;  %v3169_v40 = vld [vmem:[#allocation2 + $0x110] sm:$0xff] }
 0x1d9   : > { %6338 = vmatprep.mubr.f32.mxu1 %v3158_v31  ;;  %6965 = vmatpush3.bf16.msra.mxu1 %v6962_v5  ;;  %v3164_v5 = vld [vmem:[#allocation2 + $0xd8] sm:$0xff] }
 0x1da   : > { %6967 = vmatprep.subr.bf16.mxu1 %v6966_v17  ;;  %v5142_v31 = vld [vmem:[%s9030_s6 + $0x438] sm:$0xff] }
 0x1dc   : > { %6339 = vmatmul.mubr.f32.gmra.mrb[8].mxu1 %v3159_v48  ;;  %v6994_v48 = vpack.c.bf16 %v5142_v31, %v5141_v51 }
 0x1dd   : > { %6341 = vmatprep.mubr.f32.mxu1 %v3160_v19  ;;  %6969 = vmatpush3.bf16.msra.mxu1 %v6966_v17  ;;  %v3168_v17 = vld [vmem:[#allocation2 + $0x108] sm:$0xff] }
 0x1de   : > { %6971 = vmatprep.subr.bf16.mxu1 %v6970_v47  ;;  %v5144_v19 = vld [vmem:[%s9030_s6 + $0x448] sm:$0xff] }
 0x1df   : > { %v6998_v62 = vpack.c.bf16 %v5144_v19, %v5143_v60  ;;  %v3534_v60 = vld [vmem:[#allocation2 + $0xd9] sm:$0xff] }
 0x1e0   : > { %6342 = vmatmul.mubr.f32.gmra.mrb[10].mxu1 %v3161_v42  ;;  %v3527_v42 = vld [vmem:[#allocation2 + $0x81] sm:$0xff] }
 0x1e1   : > { %6344 = vmatprep.mubr.f32.mxu1 %v3162_v22  ;;  %6973 = vmatpush3.bf16.msra.mxu1 %v6970_v47  ;;  %v3524_v47 = vld [vmem:[#allocation2 + $0x61] sm:$0xff]  ;;  %v5145_v22 = vld [vmem:[%s9030_s6 + $0x450] sm:$0xff] }
 0x1e2   : > { %6975 = vmatprep.subr.bf16.mxu1 %v6974_v29 }
 0x1e4   : > { %6345 = vmatmul.mubr.f32.gmra.mrb[12].mxu1 %v3163_v55  ;;  %v4402_v55 = vld [vmem:[%s9033_s9] sm:$0xff] }
 0x1e5   : > { %6347 = vmatprep.mubr.f32.mxu1 %v3164_v5  ;;  %6977 = vmatpush3.bf16.msra.mxu1 %v6974_v29  ;;  %v3526_v29 = vld [vmem:[#allocation2 + $0x79] sm:$0xff]  ;;  %v7014_v5 = vpack.c.bf16 %v4403_v4, %v4402_v55  ;;  %v4415_v55 = vld [vmem:[%s9033_s9 + $0x68] sm:$0xff] }
 0x1e6   : > { %6979 = vmatprep.subr.bf16.mxu1 %v6978_v30  ;;  %v3537_v4 = vld [vmem:[#allocation2 + $0xf9] sm:$0xff] }
 0x1e7   : > { %7015 = vmatprep.subr.bf16.mxu0 %v7014_v5 }
 0x1e8   : > { %6348 = vmatmul.mubr.f32.gmra.mrb[14].mxu1 %v3165_v18  ;;  %v3529_v18 = vld [vmem:[#allocation2 + $0x99] sm:$0xff]  ;;  %7017 = vmatpush3.bf16.msra.mxu0 %v7014_v5 }
 0x1e9   : > { %6350 = vmatprep.mubr.f32.mxu1 %v3166_v20  ;;  %6981 = vmatpush3.bf16.msra.mxu1 %v6978_v30  ;;  %v5146_v30 = vld [vmem:[%s9030_s6 + $0x458] sm:$0xff] }
 0x1ea   : > { %6983 = vmatprep.subr.bf16.mxu1 %v6982_v11  ;;  %v7002_v20 = vpack.c.bf16 %v5146_v30, %v5145_v22  ;;  %v4414_v30 = vld [vmem:[%s9033_s9 + $0x60] sm:$0xff] }
 0x1eb   : > { %v7038_v5 = vpack.c.bf16 %v4415_v55, %v4414_v30 }
 0x1ec   : > { %6351 = vmatmul.mubr.f32.gmra.mrb[16].mxu1 %v3167_v23  ;;  %v5147_v23 = vld [vmem:[%s9030_s6 + $0x460] sm:$0xff] }
 0x1ed   : > { %6353 = vmatprep.mubr.f32.mxu1 %v3168_v17 }
 0x1f0   : > { %6354 = vmatmul.mubr.f32.gmra.mrb[18].mxu1 %v3169_v40  ;;  %v5148_v40 = vld [vmem:[%s9030_s6 + $0x468] sm:$0xff] }
 0x1f1   : > { %6356 = vmatprep.mubr.f32.mxu1 %v8135_v1  ;;  %v5137_v1 = vld [vmem:[%s9030_s6 + $0x410] sm:$0xff] }
 0x1f4   : > { %6357 = vmatmul.mubr.f32.gmra.mrb[20].mxu1 %v8137_v12  ;;  %v5138_v12 = vld [vmem:[%s9030_s6 + $0x418] sm:$0xff] }
 0x1f5   : > { %6359 = vmatprep.mubr.f32.mxu1 %v8155_v25  ;;  %v3520_v25 = vld [vmem:[#allocation2 + $0x31] sm:$0xff] }
 0x1f8   : > { %6360 = vmatmul.mubr.f32.gmra.mrb[22].mxu1 %v8157_v27  ;;  %v6986_v27 = vpack.c.bf16 %v5138_v12, %v5137_v1  ;;  %v4407_v1 = vld [vmem:[%s9033_s9 + $0x28] sm:$0xff] }
 0x1f9   : > { %6362 = vmatprep.mubr.f32.mxu1 %v8171_v36  ;;  %v3521_v36 = vld [vmem:[#allocation2 + $0x39] sm:$0xff]  ;;  %v3530_v12 = vld [vmem:[#allocation2 + $0xa9] sm:$0xff] }
 0x1fc   : > { %6363 = vmatmul.mubr.f32.gmra.mrb[24].mxu1 %v8173_v37  ;;  %v5139_v37 = vld [vmem:[%s9030_s6 + $0x420] sm:$0xff] }
 0x1fd   : > { %6365 = vmatprep.mubr.f32.mxu1 %v8181_v57  ;;  %v5140_v57 = vld [vmem:[%s9030_s6 + $0x428] sm:$0xff] }
 0x200   : > { %6366 = vmatmul.mubr.f32.gmra.mrb[26].mxu1 %v8183_v38  ;;  %v3522_v38 = vld [vmem:[#allocation2 + $0x49] sm:$0xff] }
 0x201   : > { %6368 = vmatprep.mubr.f32.mxu1 %v8195_v45  ;;  %v6990_v45 = vpack.c.bf16 %v5140_v57, %v5139_v37  ;;  %v5150_v57 = vld [vmem:[%s9030_s6 + $0x478] sm:$0xff] }
 0x204   : > { %6369 = vmatmul.mubr.f32.gmra.mrb[28].mxu1 %v8197_v50  ;;  %v3523_v50 = vld [vmem:[#allocation2 + $0x51] sm:$0xff] }
 0x205   : > { %6371 = vmatprep.mubr.f32.mxu1 %v7407_v41 }
 0x208   : > { %6372 = vmatmul.mubr.f32.gmra.mrb[30].mxu1 %v7407_v41  ;;  %v4406_v41 = vld [vmem:[%s9033_s9 + $0x20] sm:$0xff] }
 0x209   : > { %6406 = vmatprep.mubr.f32.mxu1 %v3520_v25  ;;  %v3531_v25 = vld [vmem:[#allocation2 + $0xb1] sm:$0xff]  ;;  %v7022_v37 = vpack.c.bf16 %v4407_v1, %v4406_v41  ;;  %v3545_v41 = vld [vmem:[#allocation2 + $0x159] sm:$0xff]  ;;  %v3546_v1 = vld [vmem:[#allocation2 + $0x169] sm:$0xff] }
 0x20c   : > { %6407 = vmatmul.mubr.f32.vlgmr.msra.gmra.mrb[0].mxu1 %v3521_v36  ;;  %v5149_v36 = vld [vmem:[%s9030_s6 + $0x470] sm:$0xff] }
 0x20d   : > { %6985 = vmatpush3.bf16.msra.mxu1 %v6982_v11  ;;  %6409 = vmatprep.mubr.f32.mxu1 %v3522_v38  ;;  %v4405_v11 = vld [vmem:[%s9033_s9 + $0x18] sm:$0xff]  ;;  %v4408_v38 = vld [vmem:[%s9033_s9 + $0x30] sm:$0xff]  ;;  %v7010_v51 = vpack.c.bf16 %v5150_v57, %v5149_v36 }
 0x20e   : > { %6987 = vmatprep.subr.bf16.mxu1 %v6986_v27  ;;  %v7018_v17 = vpack.c.bf16 %v4405_v11, %v4404_v6  ;;  %v3538_v6 = vld [vmem:[#allocation2 + $0x109] sm:$0xff]  ;;  %v3539_v11 = vld [vmem:[#allocation2 + $0x111] sm:$0xff] }
 0x20f   : > { %v3549_v36 = vld [vmem:[#allocation2 + $0x189] sm:$0xff] }
 0x210   : > { %6410 = vmatmul.mubr.f32.gmra.mrb[2].mxu1 %v3523_v50  ;;  %7019 = vmatprep.subr.bf16.mxu0 %v7018_v17  ;;  %v3532_v50 = vld [vmem:[#allocation2 + $0xc1] sm:$0xff] }
 0x211   : > { %6412 = vmatprep.mubr.f32.mxu1 %v3524_v47  ;;  %6989 = vmatpush3.bf16.msra.mxu1 %v6986_v27  ;;  %v7006_v27 = vpack.c.bf16 %v5148_v40, %v5147_v23  ;;  %v3533_v47 = vld [vmem:[#allocation2 + $0xc9] sm:$0xff]  ;;  %v3542_v23 = vld [vmem:[#allocation2 + $0x139] sm:$0xff]  ;;  %v3544_v40 = vld [vmem:[#allocation2 + $0x151] sm:$0xff] }
 0x212   : > { %6991 = vmatprep.subr.bf16.mxu1 %v6990_v45  ;;  %7021 = vmatpush3.bf16.msra.mxu0 %v7018_v17  ;;  %v3543_v17 = vld [vmem:[#allocation2 + $0x141] sm:$0xff] }
 0x213   : > { %7023 = vmatprep.subr.bf16.mxu0 %v7022_v37 }
 0x214   : > { %6413 = vmatmul.mubr.f32.gmra.mrb[4].mxu1 %v3525_v3  ;;  %v4411_v3 = vld [vmem:[%s9033_s9 + $0x48] sm:$0xff] }
 0x215   : > { %6415 = vmatprep.mubr.f32.mxu1 %v3526_v29  ;;  %6993 = vmatpush3.bf16.msra.mxu1 %v6990_v45  ;;  %v4409_v45 = vld [vmem:[%s9033_s9 + $0x38] sm:$0xff]  ;;  %v4412_v29 = vld [vmem:[%s9033_s9 + $0x50] sm:$0xff] }
 0x216   : > { %6995 = vmatprep.subr.bf16.mxu1 %v6994_v48  ;;  %v7026_v31 = vpack.c.bf16 %v4409_v45, %v4408_v38  ;;  %7025 = vmatpush3.bf16.msra.mxu0 %v7022_v37  ;;  %v3551_v37 = vld [vmem:[#allocation2 + $0x1a1] sm:$0xff] }
 0x218   : > { %6416 = vmatmul.mubr.f32.gmra.mrb[6].mxu1 %v3527_v42  ;;  %7027 = vmatprep.subr.bf16.mxu0 %v7026_v31  ;;  %v4413_v42 = vld [vmem:[%s9033_s9 + $0x58] sm:$0xff] }
 0x219   : > { %6418 = vmatprep.mubr.f32.mxu1 %v3528_v58  ;;  %6997 = vmatpush3.bf16.msra.mxu1 %v6994_v48  ;;  %v4410_v48 = vld [vmem:[%s9033_s9 + $0x40] sm:$0xff]  ;;  %v3536_v58 = vld [vmem:[#allocation2 + $0xf1] sm:$0xff]  ;;  %v7034_v22 = vpack.c.bf16 %v4413_v42, %v4412_v29 }
 0x21a   : > { %6999 = vmatprep.subr.bf16.mxu1 %v6998_v62  ;;  %v7030_v19 = vpack.c.bf16 %v4411_v3, %v4410_v48  ;;  %7029 = vmatpush3.bf16.msra.mxu0 %v7026_v31  ;;  %v4417_v31 = vld [vmem:[%s9033_s9 + $0x78] sm:$0xff]  ;;  %v4650_v48 = vld [vmem:[%s9035_s11] sm:$0xff]  ;;  %v4651_v3 = vld [vmem:[%s9035_s11 + $0x8] sm:$0xff] }
 0x21b   : > { %v8768_v29 = vld [vmem:[%s9031_s7] ss:$0 sm:$0xff] }
 0x21c   : > { %6419 = vmatmul.mubr.f32.gmra.mrb[8].mxu1 %v3529_v18  ;;  %7031 = vmatprep.subr.bf16.mxu0 %v7030_v19  ;;  %v3540_v18 = vld [vmem:[#allocation2 + $0x121] sm:$0xff] }
 0x21d   : > { %6421 = vmatprep.mubr.f32.mxu1 %v3530_v12  ;;  %7001 = vmatpush3.bf16.msra.mxu1 %v6998_v62  ;;  %v3535_v62 = vld [vmem:[#allocation2 + $0xe1] sm:$0xff]  ;;  %v3547_v12 = vld [vmem:[#allocation2 + $0x171] sm:$0xff] }
 0x21e   : > { %7003 = vmatprep.subr.bf16.mxu1 %v7002_v20  ;;  %7033 = vmatpush3.bf16.msra.mxu0 %v7030_v19 }
 0x21f   : > { %7035 = vmatprep.subr.bf16.mxu0 %v7034_v22 }
 0x220   : > { %6422 = vmatmul.mubr.f32.gmra.mrb[10].mxu1 %v3531_v25  ;;  %v3548_v25 = vld [vmem:[#allocation2 + $0x181] sm:$0xff] }
 0x221   : > { %6424 = vmatprep.mubr.f32.mxu1 %v3532_v50  ;;  %7005 = vmatpush3.bf16.msra.mxu1 %v7002_v20  ;;  %v3541_v20 = vld [vmem:[#allocation2 + $0x129] sm:$0xff] }
 0x222   : > { %7007 = vmatprep.subr.bf16.mxu1 %v7006_v27  ;;  %7037 = vmatpush3.bf16.msra.mxu0 %v7034_v22 }
 0x223   : > { %7039 = vmatprep.subr.bf16.mxu0 %v7038_v5 }
 0x224   : > { %6425 = vmatmul.mubr.f32.gmra.mrb[12].mxu1 %v3533_v47 }
 0x225   : > { %6427 = vmatprep.mubr.f32.mxu1 %v3534_v60  ;;  %7009 = vmatpush3.bf16.msra.mxu1 %v7006_v27  ;;  %v3550_v27 = vld [vmem:[#allocation2 + $0x199] sm:$0xff]  ;;  %v7046_v60 = vpack.c.bf16 %v4651_v3, %v4650_v48 }
 0x226   : > { %7011 = vmatprep.subr.bf16.mxu1 %v7010_v51  ;;  %7041 = vmatpush3.bf16.msra.mxu0 %v7038_v5 }
 0x228   : > { %6428 = vmatmul.mubr.f32.gmra.mrb[14].mxu1 %v3535_v62 }
 0x229   : > { %6430 = vmatprep.mubr.f32.mxu1 %v3536_v58  ;;  %7013 = vmatpush3.bf16.msra.mxu1 %v7010_v51  ;;  %v4416_v51 = vld [vmem:[%s9033_s9 + $0x70] sm:$0xff]  ;;  %v8774_v58 = vld [vmem:[%s9032_s8] ss:$0 sm:$0xff] }
 0x22a   : > { %v7042_v47 = vpack.c.bf16 %v4417_v31, %v4416_v51 }
 0x22c   : > { %6431 = vmatmul.mubr.f32.gmra.mrb[16].mxu1 %v3537_v4  ;;  %7043 = vmatprep.subr.bf16.mxu0 %v7042_v47 }
 0x22d   : > { %6433 = vmatprep.mubr.f32.mxu1 %v3538_v6  ;;  %7045 = vmatpush3.bf16.msra.mxu0 %v7042_v47 }
 0x22e   : > { %7047 = vmatprep.subr.bf16.mxu0 %v7046_v60 }
 0x230   : > { %6434 = vmatmul.mubr.f32.gmra.mrb[18].mxu1 %v3539_v11 }
 0x231   : > { %6436 = vmatprep.mubr.f32.mxu1 %v3540_v18 }
 0x234   : > { %6437 = vmatmul.mubr.f32.gmra.mrb[20].mxu1 %v3541_v20 }
 0x235   : > { %6439 = vmatprep.mubr.f32.mxu1 %v3542_v23  ;;  %v4652_v23 = vld [vmem:[%s9035_s11 + $0x10] sm:$0xff] }
 0x238   : > { %6440 = vmatmul.mubr.f32.gmra.mrb[22].mxu1 %v3543_v17  ;;  %v4653_v17 = vld [vmem:[%s9035_s11 + $0x18] sm:$0xff] }
 0x239   : > { %6442 = vmatprep.mubr.f32.mxu1 %v3544_v40 }
 0x23c   : > { %6443 = vmatmul.mubr.f32.gmra.mrb[24].mxu1 %v3545_v41 }
 0x23d   : > { %6445 = vmatprep.mubr.f32.mxu1 %v3546_v1 }
 0x240   : > { %6446 = vmatmul.mubr.f32.gmra.mrb[26].mxu1 %v3547_v12 }
 0x241   : > { %6448 = vmatprep.mubr.f32.mxu1 %v3548_v25 }
 0x244   : > { %6449 = vmatmul.mubr.f32.gmra.mrb[28].mxu1 %v3549_v36 }
 0x245   : > { %6451 = vmatprep.mubr.f32.mxu1 %v3550_v27 }
 0x248   : > { %6452 = vmatmul.mubr.f32.gmra.mrb[30].mxu1 %v3551_v37 }
 0x249   : > { %6486 = vmatprep.mubr.f32.mxu1 %v8357_v14 }
 0x24c   : > { %6487 = vmatmul.mubr.f32.vlgmr.msra.gmra.mrb[0].mxu1 %v8367_v35 }
 0x24d   : > { %6489 = vmatprep.mubr.f32.mxu1 %v8371_v49 }
 0x250   : > { %6490 = vmatmul.mubr.f32.gmra.mrb[2].mxu1 %v8381_v16 }
 0x251   : > { %6492 = vmatprep.mubr.f32.mxu1 %v8385_v24 }
 0x254   : > { %6493 = vmatmul.mubr.f32.gmra.mrb[4].mxu1 %v8395_v33 }
 0x255   : > { %6495 = vmatprep.mubr.f32.mxu1 %v8399_v0 }
 0x258   : > { %6496 = vmatmul.mubr.f32.gmra.mrb[6].mxu1 %v8409_v8 }
 0x259   : > { %6498 = vmatprep.mubr.f32.mxu1 %v8413_v7 }
 0x25b   : > { %v8668_v57 = vpop.f32.mrb[32].mxu0 }
 0x25c   : > { %6499 = vmatmul.mubr.f32.gmra.mrb[8].mxu1 %v8423_v21  ;;  %v8671_v14 = vpop.f32.mrb[33].mxu0 }
 0x25d   : > { %6501 = vmatprep.mubr.f32.mxu1 %v8427_v39 }
 0x25f   : > { %v8674_v35 = vpop.f32.mrb[34].mxu0 }
 0x260   : > { %v8676_v49 = vpop.f32.mrb[35].mxu0  ;;  %6502 = vmatmul.mubr.f32.gmra.mrb[10].mxu1 %v8437_v34 }
 0x261   : > { %6504 = vmatprep.mubr.f32.mxu1 %v8441_v44 }
 0x263   : > { %v8680_v16 = vpop.f32.mrb[36].mxu0 }
 0x264   : > { %v8682_v24 = vpop.f32.mrb[37].mxu0  ;;  %6505 = vmatmul.mubr.f32.gmra.mrb[12].mxu1 %v8451_v52 }
 0x265   : > { %6507 = vmatprep.mubr.f32.mxu1 %v8455_v53 }
 0x267   : > { %v8686_v33 = vpop.f32.mrb[38].mxu0 }
 0x268   : > { %v8688_v0 = vpop.f32.mrb[39].mxu0  ;;  %6508 = vmatmul.mubr.f32.gmra.mrb[14].mxu1 %v8459_v56 }
 0x269   : > { %6510 = vmatprep.mubr.f32.mxu1 %v8463_v61 }
 0x26b   : > { %v8692_v8 = vpop.f32.mrb[40].mxu0 }
 0x26c   : > { %v8694_v7 = vpop.f32.mrb[41].mxu0  ;;  %6511 = vmatmul.mubr.f32.gmra.mrb[16].mxu1 %v8467_v43 }
 0x26d   : > { %6513 = vmatprep.mubr.f32.mxu1 %v8471_v2 }
 0x26f   : > { %v8698_v21 = vpop.f32.mrb[42].mxu0 }
 0x270   : > { %v8700_v39 = vpop.f32.mrb[43].mxu0  ;;  %6514 = vmatmul.mubr.f32.gmra.mrb[18].mxu1 %v8475_v13  ;;  %v3920_v13 = vld [vmem:[#allocation2 + $0x19a] sm:$0xff] }
 0x271   : > { %6516 = vmatprep.mubr.f32.mxu1 %v8479_v59 }
 0x273   : > { %v8704_v34 = vpop.f32.mrb[44].mxu0 }
 0x274   : > { %v8706_v44 = vpop.f32.mrb[45].mxu0  ;;  %6517 = vmatmul.mubr.f32.gmra.mrb[20].mxu1 %v8483_v54 }
 0x275   : > { %6519 = vmatprep.mubr.f32.mxu1 %v8487_v46  ;;  %v3921_v46 = vld [vmem:[#allocation2 + $0x1a2] sm:$0xff] }
 0x277   : > { %v8710_v52 = vpop.f32.mrb[46].mxu0 }
 0x278   : > { %v8712_v53 = vpop.f32.mrb[47].mxu0  ;;  %6520 = vmatmul.mubr.f32.gmra.mrb[22].mxu1 %v8491_v10 }
 0x279   : > { %6522 = vmatprep.mubr.f32.mxu1 %v8495_v63 }
 0x27b   : > { %v8716_v56 = vpop.f32.mrb[48].mxu0 }
 0x27c   : > { %v8718_v61 = vpop.f32.mrb[49].mxu0  ;;  %6523 = vmatmul.mubr.f32.gmra.mrb[24].mxu1 %v8499_v15 }
 0x27d   : > { %6525 = vmatprep.mubr.f32.mxu1 %v8503_v9 }
 0x27f   : > { %v8722_v43 = vpop.f32.mrb[50].mxu0 }
 0x280   : > { %v8724_v2 = vpop.f32.mrb[51].mxu0  ;;  %6526 = vmatmul.mubr.f32.gmra.mrb[26].mxu1 %v8507_v28 }
 0x281   : > { %6528 = vmatprep.mubr.f32.mxu1 %v8511_v32 }
 0x283   : > { %v8728_v59 = vpop.f32.mrb[52].mxu0 }
 0x284   : > { %v8730_v54 = vpop.f32.mrb[53].mxu0  ;;  %6529 = vmatmul.mubr.f32.gmra.mrb[28].mxu1 %v8514_v26 }
 0x285   : > { %6531 = vmatprep.mubr.f32.mxu1 %v3920_v13  ;;  %v4655_v13 = vld [vmem:[%s9035_s11 + $0x28] sm:$0xff] }
 0x287   : > { %v8733_v10 = vpop.f32.mrb[54].mxu0 }
 0x288   : > { %v8735_v63 = vpop.f32.mrb[55].mxu0  ;;  %6532 = vmatmul.mubr.f32.gmra.mrb[30].mxu1 %v3921_v46 }
 0x28b   : > { %v8737_v15 = vpop.f32.mrb[56].mxu0 }
 0x28c   : > { %v8739_v9 = vpop.f32.mrb[57].mxu0 }
 0x28f   : > { %v8741_v28 = vpop.f32.mrb[58].mxu0 }
 0x290   : > { %v8743_v32 = vpop.f32.mrb[59].mxu0 }
 0x293   : > { %v8745_v38 = vpop.f32.mrb[60].mxu0 }
 0x294   : > { %v8747_v45 = vpop.f32.mrb[61].mxu0 }
 0x297   : > { %v8749_v26 = vpop.f32.mrb[62].mxu0 }
 0x298   : > { %v8751_v50 = vpop.f32.mrb[63].mxu0 }
 0x31f   : > { %v6488_v19 = vpop.f32.mrb[0].mxu1 }
 0x320   : > { %v7078_v42 = vadd.f32 %v6488_v19, %v8668_v57  ;;  %v4005_v62 = vpop.f32.mrb[1].mxu1  ;;  %v7050_v57 = vpack.c.bf16 %v4653_v17, %v4652_v23  ;;  %v4658_v17 = vld [vmem:[%s9035_s11 + $0x40] sm:$0xff] }
 0x321   : > { %v7079_v22 = vadd.f32 %v4005_v62, %v8671_v14 }
 0x322   : > { %v4300_v30 = vmul.f32 %v7078_v42, %v8768_v29 }
 0x323   : > { %v4299_v55 = vmul.f32 %v7079_v22, %v8768_v29  ;;  %v6491_v4 = vpop.f32.mrb[2].mxu1  ;;  %v4656_v22 = vld [vmem:[%s9035_s11 + $0x30] sm:$0xff] }
 0x324   : > { %v4339_v6 = vadd.f32 %v8774_v58, %v4300_v30  ;;  %v7080_v5 = vadd.f32 %v6491_v4, %v8674_v35  ;;  %v4015_v11 = vpop.f32.mrb[3].mxu1 }
 0x325   : > { %v7081_v18 = vadd.f32 %v4015_v11, %v8676_v49  ;;  %v4338_v20 = vadd.f32 %v8774_v58, %v4299_v55  ;;  %v4654_v49 = vld [vmem:[%s9035_s11 + $0x20] sm:$0xff] }
 0x326   : > { %v4302_v40 = vmul.f32 %v7080_v5, %v8768_v29  ;;  %v4371_v25 = vmax.f32 %v4339_v6, 0.0  ;;  %v7054_v19 = vpack.c.bf16 %v4655_v13, %v4654_v49  ;;  %v4661_v49 = vld [vmem:[%s9035_s11 + $0x58] sm:$0xff] }
 0x327   : > { %v4301_v41 = vmul.f32 %v7081_v18, %v8768_v29  ;;  %v6494_v1 = vpop.f32.mrb[4].mxu1  ;;  %v4370_v12 = vmax.f32 %v4338_v20, 0.0 }
 0x328   : > { %v7082_v27 = vadd.f32 %v6494_v1, %v8680_v16  ;;  %v4025_v36 = vpop.f32.mrb[5].mxu1  ;;  %v4341_v37 = vadd.f32 %v8774_v58, %v4302_v40  ;;  %v4659_v40 = vld [vmem:[%s9035_s11 + $0x48] sm:$0xff] }
 0x329   : > { %v7083_v14 = vadd.f32 %v4025_v36, %v8682_v24  ;;  %6566 = vmatprep.mubr.f32.mxu0 %v4370_v12  ;;  %v4340_v35 = vadd.f32 %v8774_v58, %v4301_v41 }
 0x32a   : > { %v4304_v46 = vmul.f32 %v7082_v27, %v8768_v29  ;;  %6567 = vmatmul.mubr.f32.vlgmr.msra.gmra.mrb[64].mxu0 %v4371_v25  ;;  %v4373_v48 = vmax.f32 %v4341_v37, 0.0  ;;  %v7062_v37 = vpack.c.bf16 %v4659_v40, %v4658_v17 }
 0x32b   : > { %v4303_v16 = vmul.f32 %v7083_v14, %v8768_v29  ;;  %7049 = vmatpush3.bf16.msra.mxu0 %v7046_v60  ;;  %v6497_v51 = vpop.f32.mrb[6].mxu1  ;;  %v4372_v31 = vmax.f32 %v4340_v35, 0.0  ;;  %v4657_v60 = vld [vmem:[%s9035_s11 + $0x38] sm:$0xff]  ;;  %v4660_v35 = vld [vmem:[%s9035_s11 + $0x50] sm:$0xff] }
 0x32c   : > { %v7084_v24 = vadd.f32 %v6497_v51, %v8686_v33  ;;  %v4035_v47 = vpop.f32.mrb[7].mxu1  ;;  %7051 = vmatprep.subr.bf16.mxu0 %v7050_v57  ;;  %v4343_v3 = vadd.f32 %v8774_v58, %v4304_v46  ;;  %v7058_v18 = vpack.c.bf16 %v4657_v60, %v4656_v22 }
 0x32d   : > { %v7085_v42 = vadd.f32 %v4035_v47, %v8688_v0  ;;  %6569 = vmatprep.mubr.f32.mxu0 %v4372_v31  ;;  %v4342_v62 = vadd.f32 %v8774_v58, %v4303_v16  ;;  %v7066_v47 = vpack.c.bf16 %v4661_v49, %v4660_v35 }
 0x32e   : > { %v4306_v33 = vmul.f32 %v7084_v24, %v8768_v29  ;;  %6570 = vmatmul.mubr.f32.gmra.mrb[66].mxu0 %v4373_v48  ;;  %v4375_v5 = vmax.f32 %v4343_v3, 0.0 }
 0x32f   : > { %v4305_v30 = vmul.f32 %v7085_v42, %v8768_v29  ;;  %v6500_v55 = vpop.f32.mrb[8].mxu1  ;;  %v4374_v4 = vmax.f32 %v4342_v62, 0.0  ;;  %7053 = vmatpush3.bf16.msra.mxu0 %v7050_v57  ;;  %v4663_v42 = vld [vmem:[%s9035_s11 + $0x68] sm:$0xff] }
 0x330   : > { %v7086_v0 = vadd.f32 %v6500_v55, %v8692_v8  ;;  %v4045_v6 = vpop.f32.mrb[9].mxu1  ;;  %v4345_v11 = vadd.f32 %v8774_v58, %v4306_v33  ;;  %7055 = vmatprep.subr.bf16.mxu0 %v7054_v19 }
 0x331   : > { %v7087_v20 = vadd.f32 %v4045_v6, %v8694_v7  ;;  %6572 = vmatprep.mubr.f32.mxu0 %v4374_v4  ;;  %v4344_v23 = vadd.f32 %v8774_v58, %v4305_v30 }
 0x332   : > { %v4308_v8 = vmul.f32 %v7086_v0, %v8768_v29  ;;  %6573 = vmatmul.mubr.f32.gmra.mrb[68].mxu0 %v4375_v5  ;;  %v4377_v27 = vmax.f32 %v4345_v11, 0.0  ;;  %v4664_v5 = vld [vmem:[%s9035_s11 + $0x70] sm:$0xff]  ;;  %v4665_v11 = vld [vmem:[%s9035_s11 + $0x78] sm:$0xff] }
 0x333   : > { %v4307_v41 = vmul.f32 %v7087_v20, %v8768_v29  ;;  %v6503_v1 = vpop.f32.mrb[10].mxu1  ;;  %v4376_v12 = vmax.f32 %v4344_v23, 0.0  ;;  %7057 = vmatpush3.bf16.msra.mxu0 %v7054_v19  ;;  %v4662_v19 = vld [vmem:[%s9035_s11 + $0x60] sm:$0xff] }
 0x334   : > { %v7088_v7 = vadd.f32 %v6503_v1, %v8698_v21  ;;  %v4055_v25 = vpop.f32.mrb[11].mxu1  ;;  %v4347_v36 = vadd.f32 %v8774_v58, %v4308_v8  ;;  %7059 = vmatprep.subr.bf16.mxu0 %v7058_v18  ;;  %v7070_v4 = vpack.c.bf16 %v4663_v42, %v4662_v19 }
 0x335   : > { %v7089_v57 = vadd.f32 %v4055_v25, %v8700_v39  ;;  %6575 = vmatprep.mubr.f32.mxu0 %v4376_v12  ;;  %v4346_v14 = vadd.f32 %v8774_v58, %v4307_v41  ;;  %v7074_v41 = vpack.c.bf16 %v4665_v11, %v4664_v5 }
 0x336   : > { %v4310_v21 = vmul.f32 %v7088_v7, %v8768_v29  ;;  %6576 = vmatmul.mubr.f32.gmra.mrb[70].mxu0 %v4377_v27  ;;  %v4379_v31 = vmax.f32 %v4347_v36, 0.0 }
 0x337   : > { %v4309_v13 = vmul.f32 %v7089_v57, %v8768_v29  ;;  %v6506_v46 = vpop.f32.mrb[12].mxu1  ;;  %v4378_v16 = vmax.f32 %v4346_v14, 0.0  ;;  %7061 = vmatpush3.bf16.msra.mxu0 %v7058_v18 }
 0x338   : > { %v7090_v39 = vadd.f32 %v6506_v46, %v8704_v34  ;;  %v4065_v51 = vpop.f32.mrb[13].mxu1  ;;  %v4349_v24 = vadd.f32 %v8774_v58, %v4310_v21  ;;  %7063 = vmatprep.subr.bf16.mxu0 %v7062_v37 }
 0x339   : > { %v7091_v48 = vadd.f32 %v4065_v51, %v8706_v44  ;;  %6578 = vmatprep.mubr.f32.mxu0 %v4378_v16  ;;  %v4348_v3 = vadd.f32 %v8774_v58, %v4309_v13 }
 0x33a   : > { %v4312_v34 = vmul.f32 %v7090_v39, %v8768_v29  ;;  %6579 = vmatmul.mubr.f32.gmra.mrb[72].mxu0 %v4379_v31  ;;  %v4381_v30 = vmax.f32 %v4349_v24, 0.0 }
 0x33b   : > { %v4311_v62 = vmul.f32 %v7091_v48, %v8768_v29  ;;  %v6509_v22 = vpop.f32.mrb[14].mxu1  ;;  %v4380_v60 = vmax.f32 %v4348_v3, 0.0  ;;  %7065 = vmatpush3.bf16.msra.mxu0 %v7062_v37 }
 0x33c   : > { %v7092_v44 = vadd.f32 %v6509_v22, %v8710_v52  ;;  %v4075_v33 = vpop.f32.mrb[15].mxu1  ;;  %v4351_v55 = vadd.f32 %v8774_v58, %v4312_v34  ;;  %7067 = vmatprep.subr.bf16.mxu0 %v7066_v47 }
 0x33d   : > { %v7093_v0 = vadd.f32 %v4075_v33, %v8712_v53  ;;  %6581 = vmatprep.mubr.f32.mxu0 %v4380_v60  ;;  %v4350_v6 = vadd.f32 %v8774_v58, %v4311_v62 }
 0x33e   : > { %v4314_v52 = vmul.f32 %v7092_v44, %v8768_v29  ;;  %6582 = vmatmul.mubr.f32.gmra.mrb[74].mxu0 %v4381_v30  ;;  %v4383_v40 = vmax.f32 %v4351_v55, 0.0 }
 0x33f   : > { %v4313_v18 = vmul.f32 %v7093_v0, %v8768_v29  ;;  %v6512_v20 = vpop.f32.mrb[16].mxu1  ;;  %v4382_v23 = vmax.f32 %v4350_v6, 0.0  ;;  %7069 = vmatpush3.bf16.msra.mxu0 %v7066_v47 }
 0x340   : > { %v7094_v53 = vadd.f32 %v6512_v20, %v8716_v56  ;;  %v4085_v17 = vpop.f32.mrb[17].mxu1  ;;  %v4353_v8 = vadd.f32 %v8774_v58, %v4314_v52  ;;  %7071 = vmatprep.subr.bf16.mxu0 %v7070_v4 }
 0x341   : > { %v7095_v1 = vadd.f32 %v4085_v17, %v8718_v61  ;;  %6584 = vmatprep.mubr.f32.mxu0 %v4382_v23  ;;  %v4352_v12 = vadd.f32 %v8774_v58, %v4313_v18 }
 0x342   : > { %v4316_v7 = vmul.f32 %v7094_v53, %v8768_v29  ;;  %6585 = vmatmul.mubr.f32.gmra.mrb[76].mxu0 %v4383_v40  ;;  %v4385_v57 = vmax.f32 %v4353_v8, 0.0 }
 0x343   : > { %v4315_v25 = vmul.f32 %v7095_v1, %v8768_v29  ;;  %v6515_v27 = vpop.f32.mrb[18].mxu1  ;;  %v4384_v36 = vmax.f32 %v4352_v12, 0.0  ;;  %7073 = vmatpush3.bf16.msra.mxu0 %v7070_v4 }
 0x344   : > { %v7096_v56 = vadd.f32 %v6515_v27, %v8722_v43  ;;  %v4095_v37 = vpop.f32.mrb[19].mxu1  ;;  %v4355_v14 = vadd.f32 %v8774_v58, %v4316_v7  ;;  %7075 = vmatprep.subr.bf16.mxu0 %v7074_v41 }
 0x345   : > { %v7097_v61 = vadd.f32 %v4095_v37, %v8724_v2  ;;  %6587 = vmatprep.mubr.f32.mxu0 %v4384_v36  ;;  %v4354_v35 = vadd.f32 %v8774_v58, %v4315_v25 }
 0x346   : > { %v4318_v49 = vmul.f32 %v7096_v56, %v8768_v29  ;;  %6588 = vmatmul.mubr.f32.gmra.mrb[78].mxu0 %v4385_v57  ;;  %v4387_v39 = vmax.f32 %v4355_v14, 0.0 }
 0x347   : > { %v4317_v21 = vmul.f32 %v7097_v61, %v8768_v29  ;;  %v6518_v13 = vpop.f32.mrb[20].mxu1  ;;  %v4386_v46 = vmax.f32 %v4354_v35, 0.0  ;;  %7077 = vmatpush3.bf16.msra.mxu0 %v7074_v41 }
 0x348   : > { %v7098_v43 = vadd.f32 %v6518_v13, %v8728_v59  ;;  %v4105_v16 = vpop.f32.mrb[21].mxu1  ;;  %v4357_v51 = vadd.f32 %v8774_v58, %v4318_v49 }
 0x349   : > { %v7099_v31 = vadd.f32 %v4105_v16, %v8730_v54  ;;  %6590 = vmatprep.mubr.f32.mxu0 %v4386_v46  ;;  %v4356_v2 = vadd.f32 %v8774_v58, %v4317_v21 }
 0x34a   : > { %v4320_v24 = vmul.f32 %v7098_v43, %v8768_v29  ;;  %6591 = vmatmul.mubr.f32.gmra.mrb[80].mxu0 %v4387_v39  ;;  %v4389_v59 = vmax.f32 %v4357_v51, 0.0  ;;  %v7408_v39 = vld [vmem:[%s7551_s24] sm:$0xff]  ;;  %v7410_v51 = vld [vmem:[%s7551_s24 + $0x10] sm:$0xff] }
 0x34b   : > { %v4319_v47 = vmul.f32 %v7099_v31, %v8768_v29  ;;  %v6521_v48 = vpop.f32.mrb[22].mxu1  ;;  %v4388_v3 = vmax.f32 %v4356_v2, 0.0  ;;  %v7411_v31 = vld [vmem:[%s7551_s24 + $0x18] sm:$0xff]  ;;  %v7413_v2 = vld [vmem:[%s7551_s24 + $0x28] sm:$0xff] }
 0x34c   : > { %v7100_v19 = vadd.f32 %v6521_v48, %v8733_v10  ;;  %v4115_v42 = vpop.f32.mrb[23].mxu1  ;;  %v4359_v34 = vadd.f32 %v8774_v58, %v4320_v24  ;;  %v7414_v24 = vld [vmem:[%s7551_s24 + $0x30] sm:$0xff]  ;;  %v7416_v48 = vld [vmem:[%s7551_s24 + $0x40] sm:$0xff] }
 0x34d   : > { %v7101_v62 = vadd.f32 %v4115_v42, %v8735_v63  ;;  %6593 = vmatprep.mubr.f32.mxu0 %v4388_v3  ;;  %v4358_v54 = vadd.f32 %v8774_v58, %v4319_v47  ;;  %v7415_v47 = vld [vmem:[%s7551_s24 + $0x38] sm:$0xff]  ;;  %v7417_v3 = vld [vmem:[%s7551_s24 + $0x48] sm:$0xff] }
 0x34e   : > { %v4322_v22 = vmul.f32 %v7100_v19, %v8768_v29  ;;  %6594 = vmatmul.mubr.f32.gmra.mrb[82].mxu0 %v4389_v59  ;;  %v4391_v10 = vmax.f32 %v4359_v34, 0.0  ;;  %v7418_v19 = vld [vmem:[%s7551_s24 + $0x50] sm:$0xff]  ;;  %v7419_v42 = vld [vmem:[%s7551_s24 + $0x58] sm:$0xff]  ;;  %v7420_v59 = vld [vmem:[%s7551_s24 + $0x60] sm:$0xff] }
 0x34f   : > { %v4321_v60 = vmul.f32 %v7101_v62, %v8768_v29  ;;  %v6524_v44 = vpop.f32.mrb[24].mxu1  ;;  %v4390_v33 = vmax.f32 %v4358_v54, 0.0  ;;  %v7421_v34 = vld [vmem:[%s7551_s24 + $0x68] sm:$0xff]  ;;  %v7422_v62 = vld [vmem:[%s7551_s24 + $0x70] sm:$0xff]  ;;  %v7423_v54 = vld [vmem:[%s7551_s24 + $0x78] sm:$0xff] }
 0x350   : > { %v7102_v30 = vadd.f32 %v6524_v44, %v8737_v15  ;;  %v4125_v55 = vpop.f32.mrb[25].mxu1  ;;  %v4361_v4 = vadd.f32 %v8774_v58, %v4322_v22  ;;  %v7424_v22 = vld [vmem:[%s7551_s24 + $0x80] sm:$0xff]  ;;  %v7426_v44 = vld [vmem:[%s7551_s24 + $0x90] sm:$0xff] }
 0x351   : > { %v7103_v0 = vadd.f32 %v4125_v55, %v8739_v9  ;;  %6596 = vmatprep.mubr.f32.mxu0 %v4390_v33  ;;  %v4360_v63 = vadd.f32 %v8774_v58, %v4321_v60  ;;  %v7425_v60 = vld [vmem:[%s7551_s24 + $0x88] sm:$0xff]  ;;  %v7427_v33 = vld [vmem:[%s7551_s24 + $0x98] sm:$0xff] }
 0x352   : > { %v4324_v6 = vmul.f32 %v7102_v30, %v8768_v29  ;;  %6597 = vmatmul.mubr.f32.gmra.mrb[84].mxu0 %v4391_v10  ;;  %v4393_v15 = vmax.f32 %v4361_v4, 0.0  ;;  %v7428_v30 = vld [vmem:[%s7551_s24 + $0xa0] sm:$0xff]  ;;  %v7429_v55 = vld [vmem:[%s7551_s24 + $0xa8] sm:$0xff]  ;;  %v7430_v10 = vld [vmem:[%s7551_s24 + $0xb0] sm:$0xff] }
 0x353   : > { %v4323_v5 = vmul.f32 %v7103_v0, %v8768_v29  ;;  %v6527_v11 = vpop.f32.mrb[26].mxu1  ;;  %v4392_v52 = vmax.f32 %v4360_v63, 0.0  ;;  %v7431_v4 = vld [vmem:[%s7551_s24 + $0xb8] sm:$0xff]  ;;  %v7432_v0 = vld [vmem:[%s7551_s24 + $0xc0] sm:$0xff]  ;;  %v7433_v63 = vld [vmem:[%s7551_s24 + $0xc8] sm:$0xff] }
 0x354   : > { %v7104_v18 = vadd.f32 %v6527_v11, %v8741_v28  ;;  %v4135_v20 = vpop.f32.mrb[27].mxu1  ;;  %v4363_v23 = vadd.f32 %v8774_v58, %v4324_v6  ;;  %v7434_v6 = vld [vmem:[%s7551_s24 + $0xd0] sm:$0xff]  ;;  %v7436_v11 = vld [vmem:[%s7551_s24 + $0xe0] sm:$0xff] }
 0x355   : > { %v7105_v53 = vadd.f32 %v4135_v20, %v8743_v32  ;;  %6599 = vmatprep.mubr.f32.mxu0 %v4392_v52  ;;  %v4362_v9 = vadd.f32 %v8774_v58, %v4323_v5  ;;  %v7435_v5 = vld [vmem:[%s7551_s24 + $0xd8] sm:$0xff]  ;;  %v7437_v52 = vld [vmem:[%s7551_s24 + $0xe8] sm:$0xff] }
 0x356   : > { %v4326_v17 = vmul.f32 %v7104_v18, %v8768_v29  ;;  %6600 = vmatmul.mubr.f32.gmra.mrb[86].mxu0 %v4393_v15  ;;  %v4395_v28 = vmax.f32 %v4363_v23, 0.0  ;;  %v7438_v18 = vld [vmem:[%s7551_s24 + $0xf0] sm:$0xff]  ;;  %v7439_v20 = vld [vmem:[%s7551_s24 + $0xf8] sm:$0xff]  ;;  %v8948_v15 = vld [vmem:[%s9034_s10] ss:$0 sm:$0xff] }
 0x357   : > { %v4325_v40 = vmul.f32 %v7105_v53, %v8768_v29  ;;  %v6530_v8 = vpop.f32.mrb[28].mxu1  ;;  %v4394_v41 = vmax.f32 %v4362_v9, 0.0 }
 0x358   : > { %v7106_v1 = vadd.f32 %v6530_v8, %v8745_v38  ;;  %v4145_v12 = vpop.f32.mrb[29].mxu1  ;;  %v4365_v7 = vadd.f32 %v8774_v58, %v4326_v17 }
 0x359   : > { %v7107_v25 = vadd.f32 %v4145_v12, %v8747_v45  ;;  %6602 = vmatprep.mubr.f32.mxu0 %v4394_v41  ;;  %v4364_v32 = vadd.f32 %v8774_v58, %v4325_v40 }
 0x35a   : > { %v4328_v27 = vmul.f32 %v7106_v1, %v8768_v29  ;;  %6603 = vmatmul.mubr.f32.gmra.mrb[88].mxu0 %v4395_v28  ;;  %v4397_v38 = vmax.f32 %v4365_v7, 0.0 }
 0x35b   : > { %v4327_v36 = vmul.f32 %v7107_v25, %v8768_v29  ;;  %v6533_v56 = vpop.f32.mrb[30].mxu1  ;;  %v4396_v37 = vmax.f32 %v4364_v32, 0.0 }
 0x35c   : > { %v7108_v57 = vadd.f32 %v6533_v56, %v8749_v26  ;;  %v4155_v14 = vpop.f32.mrb[31].mxu1  ;;  %v4367_v61 = vadd.f32 %v8774_v58, %v4328_v27 }
 0x35d   : > { %v7109_v35 = vadd.f32 %v4155_v14, %v8751_v50  ;;  %6605 = vmatprep.mubr.f32.mxu0 %v4396_v37  ;;  %v4366_v45 = vadd.f32 %v8774_v58, %v4327_v36 }
 0x35e   : > { %v4330_v49 = vmul.f32 %v7108_v57, %v8768_v29  ;;  %6606 = vmatmul.mubr.f32.gmra.mrb[90].mxu0 %v4397_v38  ;;  %v4399_v26 = vmax.f32 %v4367_v61, 0.0 }
 0x35f   : > { %v4329_v21 = vmul.f32 %v7109_v35, %v8768_v29  ;;  %v4398_v13 = vmax.f32 %v4366_v45, 0.0  ;;  %v7409_v29 = vld [vmem:[%s7551_s24 + $0x8] sm:$0xff] }
 0x360   : > { %v4369_v46 = vadd.f32 %v8774_v58, %v4330_v49 }
 0x361   : > { %6608 = vmatprep.mubr.f32.mxu0 %v4398_v13  ;;  %v4368_v50 = vadd.f32 %v8774_v58, %v4329_v21  ;;  %v7412_v58 = vld [vmem:[%s7551_s24 + $0x20] sm:$0xff] }
 0x362   : > { %6609 = vmatmul.mubr.f32.gmra.mrb[92].mxu0 %v4399_v26  ;;  %v4401_v16 = vmax.f32 %v4369_v46, 0.0 }
 0x363   : > { %v4400_v43 = vmax.f32 %v4368_v50, 0.0 }
 0x365   : > { %6611 = vmatprep.mubr.f32.mxu0 %v4400_v43 }
 0x366   : > { %6612 = vmatmul.mubr.f32.gmra.mrb[94].mxu0 %v4401_v16 }
 0x367   : > { %6646 = vmatprep.mubr.f32.mxu0 %v7408_v39 }
 0x36a   : > { %6647 = vmatmul.mubr.f32.vlgmr.msra.gmra.mrb[64].mxu0 %v7409_v29 }
 0x36b   : > { %6649 = vmatprep.mubr.f32.mxu0 %v7410_v51 }
 0x36e   : > { %6650 = vmatmul.mubr.f32.gmra.mrb[66].mxu0 %v7411_v31 }
 0x36f   : > { %6652 = vmatprep.mubr.f32.mxu0 %v7412_v58 }
 0x372   : > { %6653 = vmatmul.mubr.f32.gmra.mrb[68].mxu0 %v7413_v2 }
 0x373   : > { %6655 = vmatprep.mubr.f32.mxu0 %v7414_v24 }
 0x376   : > { %6656 = vmatmul.mubr.f32.gmra.mrb[70].mxu0 %v7415_v47 }
 0x377   : > { %6658 = vmatprep.mubr.f32.mxu0 %v7416_v48 }
 0x37a   : > { %6659 = vmatmul.mubr.f32.gmra.mrb[72].mxu0 %v7417_v3 }
 0x37b   : > { %6661 = vmatprep.mubr.f32.mxu0 %v7418_v19 }
 0x37e   : > { %6662 = vmatmul.mubr.f32.gmra.mrb[74].mxu0 %v7419_v42 }
 0x37f   : > { %6664 = vmatprep.mubr.f32.mxu0 %v7420_v59 }
 0x382   : > { %6665 = vmatmul.mubr.f32.gmra.mrb[76].mxu0 %v7421_v34 }
 0x383   : > { %6667 = vmatprep.mubr.f32.mxu0 %v7422_v62 }
 0x386   : > { %6668 = vmatmul.mubr.f32.gmra.mrb[78].mxu0 %v7423_v54 }
 0x387   : > { %6670 = vmatprep.mubr.f32.mxu0 %v7424_v22 }
 0x38a   : > { %6671 = vmatmul.mubr.f32.gmra.mrb[80].mxu0 %v7425_v60 }
 0x38b   : > { %6673 = vmatprep.mubr.f32.mxu0 %v7426_v44 }
 0x38e   : > { %6674 = vmatmul.mubr.f32.gmra.mrb[82].mxu0 %v7427_v33 }
 0x38f   : > { %6676 = vmatprep.mubr.f32.mxu0 %v7428_v30 }
 0x392   : > { %6677 = vmatmul.mubr.f32.gmra.mrb[84].mxu0 %v7429_v55 }
 0x393   : > { %6679 = vmatprep.mubr.f32.mxu0 %v7430_v10 }
 0x396   : > { %6680 = vmatmul.mubr.f32.gmra.mrb[86].mxu0 %v7431_v4 }
 0x397   : > { %6682 = vmatprep.mubr.f32.mxu0 %v7432_v0 }
 0x39a   : > { %6683 = vmatmul.mubr.f32.gmra.mrb[88].mxu0 %v7433_v63 }
 0x39b   : > { %6685 = vmatprep.mubr.f32.mxu0 %v7434_v6 }
 0x39e   : > { %6686 = vmatmul.mubr.f32.gmra.mrb[90].mxu0 %v7435_v5 }
 0x39f   : > { %6688 = vmatprep.mubr.f32.mxu0 %v7436_v11 }
 0x3a2   : > { %6689 = vmatmul.mubr.f32.gmra.mrb[92].mxu0 %v7437_v52 }
 0x3a3   : > { %6691 = vmatprep.mubr.f32.mxu0 %v7438_v18 }
 0x3a6   : > { %6692 = vmatmul.mubr.f32.gmra.mrb[94].mxu0 %v7439_v20 }
 0x43d   : > { %v6648_v23 = vpop.f32.mrb[64].mxu0 }
 0x43e   : > { %v7110_v53 = vadd.f32 %v6648_v23, %v8948_v15  ;;  %v4732_v9 = vpop.f32.mrb[65].mxu0 }
 0x43f   : > { %v7111_v17 = vadd.f32 %v8948_v15, %v4732_v9 }
 0x440   : > { %4924 = vst [vmem:[%s8955_s15 + $0x8] sm:$0xff] %v7110_v53 }
 0x441   : > { %4923 = vst [vmem:[%s8955_s15] sm:$0xff] %v7111_v17  ;;  %v6651_v40 = vpop.f32.mrb[66].mxu0 }
 0x442   : > { %v7112_v8 = vadd.f32 %v6651_v40, %v8948_v15  ;;  %v4742_v41 = vpop.f32.mrb[67].mxu0 }
 0x443   : > { %v7113_v1 = vadd.f32 %v8948_v15, %v4742_v41 }
 0x444   : > { %4926 = vst [vmem:[%s8955_s15 + $0x18] sm:$0xff] %v7112_v8 }
 0x445   : > { %4925 = vst [vmem:[%s8955_s15 + $0x10] sm:$0xff] %v7113_v1  ;;  %v6654_v12 = vpop.f32.mrb[68].mxu0 }
 0x446   : > { %v7114_v28 = vadd.f32 %v6654_v12, %v8948_v15  ;;  %v4752_v7 = vpop.f32.mrb[69].mxu0 }
 0x447   : > { %v7115_v25 = vadd.f32 %v8948_v15, %v4752_v7 }
 0x448   : > { %4928 = vst [vmem:[%s8955_s15 + $0x28] sm:$0xff] %v7114_v28 }
 0x449   : > { %4927 = vst [vmem:[%s8955_s15 + $0x20] sm:$0xff] %v7115_v25  ;;  %v6657_v32 = vpop.f32.mrb[70].mxu0 }
 0x44a   : > { %v7116_v27 = vadd.f32 %v6657_v32, %v8948_v15  ;;  %v4762_v36 = vpop.f32.mrb[71].mxu0 }
 0x44b   : > { %v7117_v56 = vadd.f32 %v8948_v15, %v4762_v36 }
 0x44c   : > { %4930 = vst [vmem:[%s8955_s15 + $0x38] sm:$0xff] %v7116_v27 }
 0x44d   : > { %4929 = vst [vmem:[%s8955_s15 + $0x30] sm:$0xff] %v7117_v56  ;;  %v6660_v37 = vpop.f32.mrb[72].mxu0 }
 0x44e   : > { %v7118_v57 = vadd.f32 %v6660_v37, %v8948_v15  ;;  %v4772_v14 = vpop.f32.mrb[73].mxu0 }
 0x44f   : > { %v7119_v38 = vadd.f32 %v8948_v15, %v4772_v14 }
 0x450   : > { %4932 = vst [vmem:[%s8955_s15 + $0x48] sm:$0xff] %v7118_v57 }
 0x451   : > { %4931 = vst [vmem:[%s8955_s15 + $0x40] sm:$0xff] %v7119_v38  ;;  %v6663_v61 = vpop.f32.mrb[74].mxu0 }
 0x452   : > { %v7120_v35 = vadd.f32 %v6663_v61, %v8948_v15  ;;  %v4782_v45 = vpop.f32.mrb[75].mxu0 }
 0x453   : > { %v7121_v49 = vadd.f32 %v8948_v15, %v4782_v45 }
 0x454   : > { %4934 = vst [vmem:[%s8955_s15 + $0x58] sm:$0xff] %v7120_v35 }
 0x455   : > { %4933 = vst [vmem:[%s8955_s15 + $0x50] sm:$0xff] %v7121_v49  ;;  %v6666_v21 = vpop.f32.mrb[76].mxu0 }
 0x456   : > { %v7122_v13 = vadd.f32 %v6666_v21, %v8948_v15  ;;  %v4792_v26 = vpop.f32.mrb[77].mxu0 }
 0x457   : > { %v7123_v46 = vadd.f32 %v8948_v15, %v4792_v26 }
 0x458   : > { %4936 = vst [vmem:[%s8955_s15 + $0x68] sm:$0xff] %v7122_v13 }
 0x459   : > { %4935 = vst [vmem:[%s8955_s15 + $0x60] sm:$0xff] %v7123_v46  ;;  %v6669_v50 = vpop.f32.mrb[78].mxu0 }
 0x45a   : > { %v7124_v43 = vadd.f32 %v6669_v50, %v8948_v15  ;;  %v4802_v16 = vpop.f32.mrb[79].mxu0 }
 0x45b   : > { %v7125_v39 = vadd.f32 %v8948_v15, %v4802_v16 }
 0x45c   : > { %4938 = vst [vmem:[%s8955_s15 + $0x78] sm:$0xff] %v7124_v43 }
 0x45d   : > { %4937 = vst [vmem:[%s8955_s15 + $0x70] sm:$0xff] %v7125_v39  ;;  %v6672_v29 = vpop.f32.mrb[80].mxu0 }
 0x45e   : > { %v7126_v51 = vadd.f32 %v6672_v29, %v8948_v15  ;;  %v4812_v31 = vpop.f32.mrb[81].mxu0 }
 0x45f   : > { %v7127_v58 = vadd.f32 %v8948_v15, %v4812_v31 }
 0x460   : > { %4940 = vst [vmem:[%s8955_s15 + $0x88] sm:$0xff] %v7126_v51 }
 0x461   : > { %4939 = vst [vmem:[%s8955_s15 + $0x80] sm:$0xff] %v7127_v58  ;;  %v6675_v2 = vpop.f32.mrb[82].mxu0 }
 0x462   : > { %v7128_v24 = vadd.f32 %v6675_v2, %v8948_v15  ;;  %v4822_v47 = vpop.f32.mrb[83].mxu0 }
 0x463   : > { %v7129_v48 = vadd.f32 %v8948_v15, %v4822_v47 }
 0x464   : > { %4942 = vst [vmem:[%s8955_s15 + $0x98] sm:$0xff] %v7128_v24 }
 0x465   : > { %4941 = vst [vmem:[%s8955_s15 + $0x90] sm:$0xff] %v7129_v48  ;;  %v6678_v3 = vpop.f32.mrb[84].mxu0 }
 0x466   : > { %v7130_v19 = vadd.f32 %v6678_v3, %v8948_v15  ;;  %v4832_v42 = vpop.f32.mrb[85].mxu0 }
 0x467   : > { %v7131_v59 = vadd.f32 %v8948_v15, %v4832_v42 }
 0x468   : > { %4944 = vst [vmem:[%s8955_s15 + $0xa8] sm:$0xff] %v7130_v19 }
 0x469   : > { %4943 = vst [vmem:[%s8955_s15 + $0xa0] sm:$0xff] %v7131_v59  ;;  %v6681_v34 = vpop.f32.mrb[86].mxu0 }
 0x46a   : > { %v7132_v62 = vadd.f32 %v6681_v34, %v8948_v15  ;;  %v4842_v54 = vpop.f32.mrb[87].mxu0 }
 0x46b   : > { %v7133_v22 = vadd.f32 %v8948_v15, %v4842_v54 }
 0x46c   : > { %4946 = vst [vmem:[%s8955_s15 + $0xb8] sm:$0xff] %v7132_v62 }
 0x46d   : > { %4945 = vst [vmem:[%s8955_s15 + $0xb0] sm:$0xff] %v7133_v22  ;;  %v6684_v60 = vpop.f32.mrb[88].mxu0 }
 0x46e   : > { %v7134_v44 = vadd.f32 %v6684_v60, %v8948_v15  ;;  %v4852_v33 = vpop.f32.mrb[89].mxu0 }
 0x46f   : > { %v7135_v30 = vadd.f32 %v8948_v15, %v4852_v33 }
 0x470   : > { %4948 = vst [vmem:[%s8955_s15 + $0xc8] sm:$0xff] %v7134_v44 }
 0x471   : > { %4947 = vst [vmem:[%s8955_s15 + $0xc0] sm:$0xff] %v7135_v30  ;;  %v6687_v55 = vpop.f32.mrb[90].mxu0 }
 0x472   : > { %v7136_v10 = vadd.f32 %v6687_v55, %v8948_v15  ;;  %v4862_v4 = vpop.f32.mrb[91].mxu0 }
 0x473   : > { %v7137_v0 = vadd.f32 %v8948_v15, %v4862_v4 }
 0x474   : > { %4950 = vst [vmem:[%s8955_s15 + $0xd8] sm:$0xff] %v7136_v10 }
 0x475   : > { %4949 = vst [vmem:[%s8955_s15 + $0xd0] sm:$0xff] %v7137_v0  ;;  %v6690_v63 = vpop.f32.mrb[92].mxu0 }
 0x476   : > { %v7138_v6 = vadd.f32 %v6690_v63, %v8948_v15  ;;  %v4872_v5 = vpop.f32.mrb[93].mxu0 }
 0x477   : > { %v7139_v11 = vadd.f32 %v8948_v15, %v4872_v5 }
 0x478   : > { %4952 = vst [vmem:[%s8955_s15 + $0xe8] sm:$0xff] %v7138_v6 }
 0x479   : > { %4951 = vst [vmem:[%s8955_s15 + $0xe0] sm:$0xff] %v7139_v11  ;;  %v6693_v52 = vpop.f32.mrb[94].mxu0 }
 0x47a   : > { %v7140_v18 = vadd.f32 %v6693_v52, %v8948_v15  ;;  %v4882_v20 = vpop.f32.mrb[95].mxu0 }
 0x47b   : > { %v7141_v23 = vadd.f32 %v8948_v15, %v4882_v20 }
 0x47c   : > { %4954 = vst [vmem:[%s8955_s15 + $0xf8] sm:$0xff] %v7140_v18 }
 0x47d   : > { %4953 = vst [vmem:[%s8955_s15 + $0xf0] sm:$0xff] %v7141_v23 }
 0x47e PF: > { %s22_s21 = sadd.s32 1, %s7446_s21  }
 0x47f   : > { %p19_p4 = scmp.ge.s32.totalorder %s22_s21, 4  }
 0x481   :  { %21 = sbr.rel (!%p19_p4) target bundleno = 1 (0x1), region = 108 }

</bundles_post_ra>
